<compile_context>
chip_gen: v5e
topology: v5e:2x2
jax: 0.10.0
libtpu: 0.0.40
codegen_flags: <defaults>
</compile_context>

<pallas_src>
import functools

import jax
import jax.numpy as jnp
from jax.experimental import pallas as pl
from jax.experimental.pallas import tpu as pltpu


_PARAM_ORDER = ("wqkv", "bqkv", "wo", "bo", "ln1w", "ln1b",
                "w1", "b1", "w2", "b2", "ln2w", "ln2b")
_MATMUL_WEIGHTS = ("wqkv", "wo", "w1", "w2")

# Softmax denominator: EUP approximate reciprocal (separate issue slot, nearly
# free).  Set False for exact division if tighter parity with jax.nn.softmax
# is required (both pass the 2e-2 check below).
_SOFTMAX_APPROX_RECIP = True


def _layer_norm(x, w, b, eps=1e-5):
    mu = jnp.mean(x, axis=-1, keepdims=True)
    var = jnp.mean((x - mu) ** 2, axis=-1, keepdims=True)
    return (x - mu) * jax.lax.rsqrt(var + eps) * w + b


def _mm(a, w_bf16, b_f32):
    """(M, K) x (K, O): bf16 MXU operands, f32 accumulation, f32 bias add."""
    return jax.lax.dot_general(
        a.astype(jnp.bfloat16), w_bf16,
        dimension_numbers=(((1,), (0,)), ((), ())),
        preferred_element_type=jnp.float32) + b_f32


# ----------------------------------------------------------------------------
# Pallas kernel: one grid step == one post-norm TransformerEncoderLayer
# (PyTorch defaults: norm_first=False, activation=relu, eval -> dropout = id)
# applied to a (tile_m, E) activation tile held in VMEM scratch across layers.
# ----------------------------------------------------------------------------
def _encoder_stack_kernel(x_ref, wqkv_ref, bqkv_ref, wo_ref, bo_ref,
                          ln1w_ref, ln1b_ref, w1_ref, b1_ref, w2_ref, b2_ref,
                          ln2w_ref, ln2b_ref, o_ref, acc_ref,
                          *, num_heads, seqs_per_tile, seq_len, ff_chunks,
                          weights_resident):
    layer = pl.program_id(1)
    num_layers = pl.num_programs(1)
    # Resident weights: whole stacked arrays live in VMEM, pick this layer's
    # slab with a dynamic leading-axis index.  Streamed weights: the BlockSpec
    # already delivered layer `layer`, so index 0.
    li = layer if weights_resident else 0

    @pl.when(layer == 0)
    def _():
        acc_ref[...] = x_ref[...].astype(jnp.float32)

    x = acc_ref[...]                                # (Mt, E) f32 activation
    Mt, E = x.shape
    H = num_heads
    D = E // H
    N = seqs_per_tile
    L = seq_len
    scale = 1.0 / (D ** 0.5)

    # ---- multi-head self-attention (heads unrolled, sequences batched) -----
    qkv = _mm(x, wqkv_ref[li], bqkv_ref[li])        # (Mt, 3E) f32
    q = (qkv[:, :E] * scale).astype(jnp.bfloat16)   # fold 1/sqrt(D) into q
    k = qkv[:, E:2 * E].astype(jnp.bfloat16)
    v = qkv[:, 2 * E:].astype(jnp.bfloat16)

    head_outs = []
    for h in range(H):                              # H is small and static
        sl = slice(h * D, (h + 1) * D)
        qh = q[:, sl].reshape(N, L, D)
        kh = k[:, sl].reshape(N, L, D)
        vh = v[:, sl].reshape(N, L, D)
        # Batched over sequences; contraction consumes K in natural layout.
        s = jnp.einsum("nld,nmd->nlm", qh, kh,
                       preferred_element_type=jnp.float32)       # (N, L, L)
        s = s - jnp.max(s, axis=-1, keepdims=True)
        p = jnp.exp(s)
        denom = jnp.sum(p, axis=-1, keepdims=True)
        if _SOFTMAX_APPROX_RECIP:
            p = p * pl.reciprocal(denom, approx=True)
        else:
            p = p / denom
        oh = jnp.einsum("nlm,nmd->nld", p.astype(jnp.bfloat16), vh,
                        preferred_element_type=jnp.float32)      # (N, L, D)
        head_outs.append(oh.reshape(Mt, D).astype(jnp.bfloat16))
    # Single K=E output-projection matmul over the concatenated heads (instead
    # of H K=D matmuls accumulated in an f32 slab).
    attn = _mm(jnp.concatenate(head_outs, axis=-1), wo_ref[li], bo_ref[li])
    x = _layer_norm(x + attn, ln1w_ref[li], ln1b_ref[li])

    # ---- feed-forward, chunked over the FF dimension ------------------------
    FF = w1_ref.shape[-1]
    ffc = FF // ff_chunks
    xb = x.astype(jnp.bfloat16)

    def ff_body(c, h2):
        c0 = pl.multiple_of(c * ffc, ffc)
        w1c = w1_ref[li, :, pl.ds(c0, ffc)]         # (E, ffc) bf16
        b1c = b1_ref[li, :, pl.ds(c0, ffc)]         # (1, ffc) f32
        h1 = jax.lax.dot_general(
            xb, w1c, dimension_numbers=(((1,), (0,)), ((), ())),
            preferred_element_type=jnp.float32) + b1c
        # ReLU on the bf16 copy: numerically identical to relu-then-cast and
        # halves VPU element count on bf16-VALU chips (v6e/v7x).
        h1 = jnp.maximum(h1.astype(jnp.bfloat16), 0)
        w2c = w2_ref[li, pl.ds(c0, ffc), :]         # (ffc, E) bf16
        return h2 + jax.lax.dot_general(
            h1, w2c, dimension_numbers=(((1,), (0,)), ((), ())),
            preferred_element_type=jnp.float32)

    h2 = jax.lax.fori_loop(0, ff_chunks, ff_body,
                           jnp.zeros((Mt, E), jnp.float32), unroll=True)
    h2 = h2 + b2_ref[li]
    x = _layer_norm(x + h2, ln2w_ref[li], ln2b_ref[li])

    acc_ref[...] = x                                # carry to next layer

    @pl.when(layer == num_layers - 1)
    def _():
        o_ref[...] = x.astype(o_ref.dtype)          # single gated final store


# ----------------------------------------------------------------------------
# Wrapper: one pallas_call per encoder stack
# ----------------------------------------------------------------------------
def _choose_seqs_per_tile(n_seq, seq_len, target_rows):
    """Largest s with s | n_seq, (s*seq_len) % 8 == 0 and s*seq_len <= target.
    Falls back to the full slab (block == full array is always legal)."""
    candidates = [s for s in range(1, n_seq + 1)
                  if n_seq % s == 0 and (s * seq_len) % 8 == 0
                  and s * seq_len <= max(target_rows, seq_len)]
    return max(candidates) if candidates else n_seq


def _vmem_capacity_bytes():
    try:
        return int(pltpu.get_tpu_info().vmem_capacity_bytes)
    except Exception:
        return 64 << 20            # conservative: v7x per-TensorCore VMEM


def encoder_stack(x, stacked, num_heads, *, target_rows=1024, ff_chunk=512,
                  resident_weight_limit=8 << 20):
    """Apply a whole nn.TransformerEncoder stack with ONE pallas_call.

    x: (N, L, E).  stacked[k]: per-layer params stacked on a leading layer
    axis.  Grid = (M tiles, layers): layers innermost/"arbitrary", M tiles
    "parallel"; the activation tile is resident in f32 VMEM scratch.
    """
    N, L, E = x.shape
    M = N * L
    num_layers = int(stacked["wqkv"].shape[0])
    FF = int(stacked["w1"].shape[-1])
    weights = [stacked[k] for k in _PARAM_ORDER]

    seqs = _choose_seqs_per_tile(N, L, target_rows)
    tile_m = seqs * L
    m_tiles = M // tile_m

    ff_chunks = FF // ff_chunk if (FF > ff_chunk and FF % ff_chunk == 0) else 1
    ffc = FF // ff_chunks

    total_w_bytes = sum(int(w.size) * w.dtype.itemsize for w in weights)
    # Small stacks: DMA once, stay VMEM-resident, index by layer in-kernel.
    # Large stacks: stream one layer per grid step via the BlockSpec.
    resident = total_w_bytes <= resident_weight_limit

    in_specs = [pl.BlockSpec((tile_m, E), lambda m, l: (m, 0))]
    for w in weights:
        if resident:
            in_specs.append(pl.BlockSpec(tuple(w.shape), lambda m, l: (0, 0, 0)))
        else:
            in_specs.append(
                pl.BlockSpec((1,) + tuple(w.shape[1:]), lambda m, l: (l, 0, 0)))

    # Explicit VMEM budget: activation tile + FF-chunk intermediates + weights,
    # with 2x + 8 MiB headroom, clamped to ~80% of physical VMEM.
    out_itemsize = jnp.dtype(x.dtype).itemsize
    act_bytes = tile_m * E * (4 + 4 + out_itemsize) * 2
    inter_bytes = tile_m * (3 * E * 4 + ffc * 6 + 4 * E * 4)
    w_bytes = total_w_bytes if resident else 2 * (total_w_bytes // num_layers)
    est = act_bytes + inter_bytes + w_bytes
    vmem_limit = int(min(max(2 * est + (8 << 20), 32 << 20),
                         int(0.8 * _vmem_capacity_bytes())))

    out = pl.pallas_call(
        functools.partial(_encoder_stack_kernel, num_heads=num_heads,
                          seqs_per_tile=seqs, seq_len=L, ff_chunks=ff_chunks,
                          weights_resident=resident),
        out_shape=jax.ShapeDtypeStruct((M, E), x.dtype),
        grid=(m_tiles, num_layers),
        in_specs=in_specs,
        out_specs=pl.BlockSpec((tile_m, E), lambda m, l: (m, 0)),
        scratch_shapes=[pltpu.VMEM((tile_m, E), jnp.float32)],
        compiler_params=pltpu.CompilerParams(
            dimension_semantics=("parallel", "arbitrary"),
            vmem_limit_bytes=vmem_limit),
    )(x.reshape(M, E), *weights)
    return out.reshape(N, L, E)


def stack_layer_params(layer_params):
    """Stack per-layer params on a leading layer axis; matmul weights -> bf16."""
    stacked = {}
    for key in _PARAM_ORDER:
        arrs = [p[key] for p in layer_params]
        if key in _MATMUL_WEIGHTS:
            arrs = [a.astype(jnp.bfloat16) for a in arrs]   # bf16 MXU operands
        stacked[key] = jnp.stack(arrs, axis=0)
    return stacked


# ----------------------------------------------------------------------------
# Module forward (glue in plain JAX, exactly mirroring the PyTorch reshapes)
# ----------------------------------------------------------------------------
def col_row_segment_attention(x, logits, col_stacked, row_stacked,
                              num_heads, attention_range):
    B, S, E = x.shape
    x = x + logits[:, None, :]            # logits.unsqueeze(1).repeat(1,S,1) + x
    G = S // attention_range
    x4 = x.reshape(B, G, attention_range, E)
    # Plain contiguous reshapes: identical to the PyTorch module's
    # x.reshape(-1, G, E) / x.reshape(-1, R, E) on the (B, G, R, E) tensor.
    x_col = x4.reshape(-1, G, E)                       # (B*R, G, E)
    x_row = x4.reshape(-1, attention_range, E)         # (B*G, R, E)
    # TODO(synk): on v7x the two independent stacks could be split across the
    # two TensorCores (core_map / fused stack axis); here they run as two
    # sequential pallas_calls.
    x_col = encoder_stack(x_col, col_stacked, num_heads)
    x_row = encoder_stack(x_row, row_stacked, num_heads)
    out = (x_col.reshape(B, G, attention_range, E)
           + x_row.reshape(B, G, attention_range, E))
    return out.reshape(B, S, E)


# ----------------------------------------------------------------------------
# Deterministic synthetic parameter init (shapes match nn.TransformerEncoderLayer)
# ----------------------------------------------------------------------------
def init_encoder_layer_params(key, E, FF):
    ks = jax.random.split(key, 6)
    s = 0.05
    return dict(
        wqkv=jax.random.normal(ks[0], (E, 3 * E), jnp.float32) * s,  # in_proj_weight.T
        bqkv=jax.random.normal(ks[1], (1, 3 * E), jnp.float32) * s,  # in_proj_bias
        wo=jax.random.normal(ks[2], (E, E), jnp.float32) * s,        # out_proj.weight.T
        bo=jax.random.normal(ks[3], (1, E), jnp.float32) * s,
        ln1w=jnp.ones((1, E), jnp.float32),
        ln1b=jnp.zeros((1, E), jnp.float32),
        w1=jax.random.normal(ks[4], (E, FF), jnp.float32) * s,       # linear1.weight.T
        b1=jnp.zeros((1, FF), jnp.float32),
        w2=jax.random.normal(ks[5], (FF, E), jnp.float32) * s,       # linear2.weight.T
        b2=jnp.zeros((1, E), jnp.float32),
        ln2w=jnp.ones((1, E), jnp.float32),
        ln2b=jnp.zeros((1, E), jnp.float32),
    )


# ----------------------------------------------------------------------------
# Pure-JAX reference (same bf16-operand / f32-accumulate math) for correctness
# ----------------------------------------------------------------------------
def _encoder_layer_ref(x, p, num_heads):
    N, L, E = x.shape
    H = num_heads
    D = E // H
    scale = 1.0 / (D ** 0.5)

    def mm(a, w, b):
        return jnp.einsum("...k,ko->...o", a.astype(jnp.bfloat16),
                          w.astype(jnp.bfloat16),
                          preferred_element_type=jnp.float32) + b

    qkv = mm(x, p["wqkv"], p["bqkv"])
    q = qkv[..., :E] * scale
    k = qkv[..., E:2 * E]
    v = qkv[..., 2 * E:]
    sp = lambda t: t.reshape(N, L, H, D).astype(jnp.bfloat16)
    qh, kh, vh = sp(q), sp(k), sp(v)
    s = jnp.einsum("nlhd,nmhd->nhlm", qh, kh, preferred_element_type=jnp.float32)
    a = jax.nn.softmax(s, axis=-1)
    o = jnp.einsum("nhlm,nmhd->nlhd", a.astype(jnp.bfloat16), vh,
                   preferred_element_type=jnp.float32).reshape(N, L, E)
    o = mm(o, p["wo"], p["bo"])
    x = _layer_norm(x + o, p["ln1w"], p["ln1b"])
    h = jax.nn.relu(mm(x, p["w1"], p["b1"]))
    h = mm(h, p["w2"], p["b2"])
    return _layer_norm(x + h, p["ln2w"], p["ln2b"])


def _forward_ref(x, logits, col_layers, row_layers, num_heads, attention_range):
    B, S, E = x.shape
    x = x + logits[:, None, :]
    G = S // attention_range
    x4 = x.reshape(B, G, attention_range, E)
    xc = x4.reshape(-1, G, E)
    xr = x4.reshape(-1, attention_range, E)
    for p in col_layers:
        xc = _encoder_layer_ref(xc, p, num_heads)
    for p in row_layers:
        xr = _encoder_layer_ref(xr, p, num_heads)
    out = xc.reshape(B, G, attention_range, E) + xr.reshape(B, G, attention_range, E)
    return out.reshape(B, S, E)


if __name__ == "__main__":
    # Module config
    embedding_dim = 32
    num_heads = 4
    num_layers = 2
    attention_range = 4
    dim_feedforward = 2048        # nn.TransformerEncoderLayer default

    # Input shapes implied by forward(): x (B, S, E), logits (B, E), S % R == 0
    B, S = 2, 8

    root = jax.random.PRNGKey(0)
    kx, kl, kcol, krow = jax.random.split(root, 4)
    x = jax.random.normal(kx, (B, S, embedding_dim), jnp.float32)
    logits = jax.random.normal(kl, (B, embedding_dim), jnp.float32)

    col_layers = [init_encoder_layer_params(k, embedding_dim, dim_feedforward)
                  for k in jax.random.split(kcol, num_layers)]
    row_layers = [init_encoder_layer_params(k, embedding_dim, dim_feedforward)
                  for k in jax.random.split(krow, num_layers)]

    col_stacked = stack_layer_params(col_layers)
    row_stacked = stack_layer_params(row_layers)

    out = col_row_segment_attention(x, logits, col_stacked, row_stacked,
                                    num_heads, attention_range)
    out = jax.block_until_ready(out)

    ref = _forward_ref(x, logits, col_layers, row_layers,
                       num_heads, attention_range)
    assert out.shape == (B, S, embedding_dim)
    max_err = float(jnp.max(jnp.abs(out - ref)))
    assert jnp.allclose(out, ref, atol=2e-2, rtol=2e-2), f"max_abs_err={max_err}"

    print("KERNEL_OK")
</pallas_src>

<mosaic_0001>
module attributes {stable_mosaic.version = 11 : i64} {
  func.func @_encoder_stack_kernel(%arg0: i32, %arg1: i32, %arg2: memref<16x32xf32, #tpu.memory_space<vmem>>, %arg3: memref<2x32x96xbf16, #tpu.memory_space<vmem>>, %arg4: memref<2x1x96xf32, #tpu.memory_space<vmem>>, %arg5: memref<2x32x32xbf16, #tpu.memory_space<vmem>>, %arg6: memref<2x1x32xf32, #tpu.memory_space<vmem>>, %arg7: memref<2x1x32xf32, #tpu.memory_space<vmem>>, %arg8: memref<2x1x32xf32, #tpu.memory_space<vmem>>, %arg9: memref<2x32x2048xbf16, #tpu.memory_space<vmem>>, %arg10: memref<2x1x2048xf32, #tpu.memory_space<vmem>>, %arg11: memref<2x2048x32xbf16, #tpu.memory_space<vmem>>, %arg12: memref<2x1x32xf32, #tpu.memory_space<vmem>>, %arg13: memref<2x1x32xf32, #tpu.memory_space<vmem>>, %arg14: memref<2x1x32xf32, #tpu.memory_space<vmem>>, %arg15: memref<16x32xf32, #tpu.memory_space<vmem>>, %arg16: memref<16x32xf32, #tpu.memory_space<vmem>>) attributes {dimension_semantics = [#tpu.dimension_semantics<parallel>, #tpu.dimension_semantics<arbitrary>], iteration_bounds = array<i64: 1, 2>, scalar_prefetch = 0 : i64, scratch_operands = 1 : i64, tpu.core_type = #tpu.core_type<tc>, window_params = [{transform_indices = @transform_0, window_bounds = array<i64: 16, 32>}, {pipeline_mode = #tpu.pipeline_mode<synchronous>, transform_indices = @transform_1, window_bounds = array<i64: 2, 32, 96>}, {pipeline_mode = #tpu.pipeline_mode<synchronous>, transform_indices = @transform_2, window_bounds = array<i64: 2, 1, 96>}, {pipeline_mode = #tpu.pipeline_mode<synchronous>, transform_indices = @transform_3, window_bounds = array<i64: 2, 32, 32>}, {pipeline_mode = #tpu.pipeline_mode<synchronous>, transform_indices = @transform_4, window_bounds = array<i64: 2, 1, 32>}, {pipeline_mode = #tpu.pipeline_mode<synchronous>, transform_indices = @transform_5, window_bounds = array<i64: 2, 1, 32>}, {pipeline_mode = #tpu.pipeline_mode<synchronous>, transform_indices = @transform_6, window_bounds = array<i64: 2, 1, 32>}, {pipeline_mode = #tpu.pipeline_mode<synchronous>, transform_indices = @transform_7, window_bounds = array<i64: 2, 32, 2048>}, {pipeline_mode = #tpu.pipeline_mode<synchronous>, transform_indices = @transform_8, window_bounds = array<i64: 2, 1, 2048>}, {pipeline_mode = #tpu.pipeline_mode<synchronous>, transform_indices = @transform_9, window_bounds = array<i64: 2, 2048, 32>}, {pipeline_mode = #tpu.pipeline_mode<synchronous>, transform_indices = @transform_10, window_bounds = array<i64: 2, 1, 32>}, {pipeline_mode = #tpu.pipeline_mode<synchronous>, transform_indices = @transform_11, window_bounds = array<i64: 2, 1, 32>}, {pipeline_mode = #tpu.pipeline_mode<synchronous>, transform_indices = @transform_12, window_bounds = array<i64: 2, 1, 32>}, {transform_indices = @transform_13, window_bounds = array<i64: 16, 32>}]} {
    %c0_i32 = arith.constant 0 : i32
    %0 = arith.cmpi eq, %arg1, %c0_i32 : i32
    %1 = arith.extui %0 : i1 to i32
    %c0_i32_0 = arith.constant 0 : i32
    %2 = arith.cmpi ne, %1, %c0_i32_0 : i32
    scf.if %2 {
      %c0_81 = arith.constant 0 : index
      %c0_82 = arith.constant 0 : index
      %273 = vector.load %arg2[%c0_81, %c0_82] : memref<16x32xf32, #tpu.memory_space<vmem>>, vector<16x32xf32>
      %c0_83 = arith.constant 0 : index
      %c0_84 = arith.constant 0 : index
      %274 = vector.load %arg16[%c0_83, %c0_84] : memref<16x32xf32, #tpu.memory_space<vmem>>, vector<16x32xf32>
      tpu.vector_store %arg16[%c0_83, %c0_84], %273 {strides = array<i32>} : memref<16x32xf32, #tpu.memory_space<vmem>>, vector<16x32xf32>,
    } else {
    }
    %c0 = arith.constant 0 : index
    %c0_1 = arith.constant 0 : index
    %3 = vector.load %arg16[%c0, %c0_1] : memref<16x32xf32, #tpu.memory_space<vmem>>, vector<16x32xf32>
    %4 = arith.index_cast %arg1 : i32 to index
    %c0_2 = arith.constant 0 : index
    %c0_3 = arith.constant 0 : index
    %5 = vector.load %arg3[%4, %c0_2, %c0_3] : memref<2x32x96xbf16, #tpu.memory_space<vmem>>, vector<1x32x96xbf16>
    %6 = vector.shape_cast %5 : vector<1x32x96xbf16> to vector<32x96xbf16>
    %7 = arith.index_cast %arg1 : i32 to index
    %c0_4 = arith.constant 0 : index
    %c0_5 = arith.constant 0 : index
    %8 = vector.load %arg4[%7, %c0_4, %c0_5] : memref<2x1x96xf32, #tpu.memory_space<vmem>>, vector<1x1x96xf32>
    %9 = vector.shape_cast %8 : vector<1x1x96xf32> to vector<1x96xf32>
    %10 = arith.truncf %3 : vector<16x32xf32> to vector<16x32xbf16>
    %cst = arith.constant dense<0.000000e+00> : vector<16x96xf32>
    %11 = tpu.matmul %10, %6, %cst {dimension_numbers = #tpu.dot_dimension_numbers<[1], [0], [0], [1], [0, 0, 1, 1], [], []>} : vector<16x32xbf16>, vector<32x96xbf16>, vector<16x96xf32> -> vector<16x96xf32>
    %12 = vector.broadcast %9 : vector<1x96xf32> to vector<16x96xf32>
    %13 = arith.addf %11, %12 : vector<16x96xf32>
    %14 = vector.extract_strided_slice %13 {offsets = [0, 0], sizes = [16, 32], strides = [1, 1]} : vector<16x96xf32> to vector<16x32xf32>
    %cst_6 = arith.constant 0.353553385 : f32
    %15 = vector.broadcast %cst_6 : f32 to vector<16x32xf32>
    %16 = arith.mulf %14, %15 : vector<16x32xf32>
    %17 = arith.truncf %16 : vector<16x32xf32> to vector<16x32xbf16>
    %18 = vector.extract_strided_slice %13 {offsets = [0, 32], sizes = [16, 32], strides = [1, 1]} : vector<16x96xf32> to vector<16x32xf32>
    %19 = arith.truncf %18 : vector<16x32xf32> to vector<16x32xbf16>
    %20 = vector.extract_strided_slice %13 {offsets = [0, 64], sizes = [16, 32], strides = [1, 1]} : vector<16x96xf32> to vector<16x32xf32>
    %21 = arith.truncf %20 : vector<16x32xf32> to vector<16x32xbf16>
    %22 = vector.extract_strided_slice %17 {offsets = [0, 0], sizes = [16, 8], strides = [1, 1]} : vector<16x32xbf16> to vector<16x8xbf16>
    %23 = vector.shape_cast %22 : vector<16x8xbf16> to vector<8x2x8xbf16>
    %24 = vector.extract_strided_slice %19 {offsets = [0, 0], sizes = [16, 8], strides = [1, 1]} : vector<16x32xbf16> to vector<16x8xbf16>
    %25 = vector.shape_cast %24 : vector<16x8xbf16> to vector<8x2x8xbf16>
    %26 = vector.extract_strided_slice %21 {offsets = [0, 0], sizes = [16, 8], strides = [1, 1]} : vector<16x32xbf16> to vector<16x8xbf16>
    %27 = vector.shape_cast %26 : vector<16x8xbf16> to vector<8x2x8xbf16>
    "tpu.trace_start"() <{level = 10 : i32, message = "nld,nmd->nlm"}> : () -> ()
    %cst_7 = arith.constant dense<0.000000e+00> : vector<8x2x2xf32>
    %28 = tpu.matmul %23, %25, %cst_7 {dimension_numbers = #tpu.dot_dimension_numbers<[2], [2], [1], [1], [0, 0, 0, 1, 1, 1], [0], [0]>} : vector<8x2x8xbf16>, vector<8x2x8xbf16>, vector<8x2x2xf32> -> vector<8x2x2xf32>
    "tpu.trace_stop"() : () -> ()
    %cst_8 = arith.constant dense<0xFF800000> : vector<8x2xf32>
    %29 = vector.multi_reduction <maximumf>, %28, %cst_8 [2] : vector<8x2x2xf32> to vector<8x2xf32>
    %30 = vector.shape_cast %29 : vector<8x2xf32> to vector<8x2x1xf32>
    %31 = vector.broadcast %30 : vector<8x2x1xf32> to vector<8x2x2xf32>
    %32 = arith.subf %28, %31 : vector<8x2x2xf32>
    %33 = math.exp %32 : vector<8x2x2xf32>
    %cst_9 = arith.constant dense<0.000000e+00> : vector<8x2xf32>
    %34 = vector.multi_reduction <add>, %33, %cst_9 [2] : vector<8x2x2xf32> to vector<8x2xf32>
    %35 = vector.shape_cast %34 : vector<8x2xf32> to vector<8x2x1xf32>
    %36 = tpu.reciprocal %35 {approx = true} : vector<8x2x1xf32> -> vector<8x2x1xf32>
    %37 = vector.broadcast %36 : vector<8x2x1xf32> to vector<8x2x2xf32>
    %38 = arith.mulf %33, %37 : vector<8x2x2xf32>
    %39 = arith.truncf %38 : vector<8x2x2xf32> to vector<8x2x2xbf16>
    "tpu.trace_start"() <{level = 10 : i32, message = "nlm,nmd->nld"}> : () -> ()
    %cst_10 = arith.constant dense<0.000000e+00> : vector<8x2x8xf32>
    %40 = tpu.matmul %39, %27, %cst_10 {dimension_numbers = #tpu.dot_dimension_numbers<[2], [1], [1], [2], [0, 0, 0, 1, 1, 2], [0], [0]>} : vector<8x2x2xbf16>, vector<8x2x8xbf16>, vector<8x2x8xf32> -> vector<8x2x8xf32>
    "tpu.trace_stop"() : () -> ()
    %41 = vector.shape_cast %40 : vector<8x2x8xf32> to vector<16x8xf32>
    %42 = arith.truncf %41 : vector<16x8xf32> to vector<16x8xbf16>
    %43 = vector.extract_strided_slice %17 {offsets = [0, 8], sizes = [16, 8], strides = [1, 1]} : vector<16x32xbf16> to vector<16x8xbf16>
    %44 = vector.shape_cast %43 : vector<16x8xbf16> to vector<8x2x8xbf16>
    %45 = vector.extract_strided_slice %19 {offsets = [0, 8], sizes = [16, 8], strides = [1, 1]} : vector<16x32xbf16> to vector<16x8xbf16>
    %46 = vector.shape_cast %45 : vector<16x8xbf16> to vector<8x2x8xbf16>
    %47 = vector.extract_strided_slice %21 {offsets = [0, 8], sizes = [16, 8], strides = [1, 1]} : vector<16x32xbf16> to vector<16x8xbf16>
    %48 = vector.shape_cast %47 : vector<16x8xbf16> to vector<8x2x8xbf16>
    "tpu.trace_start"() <{level = 10 : i32, message = "nld,nmd->nlm"}> : () -> ()
    %cst_11 = arith.constant dense<0.000000e+00> : vector<8x2x2xf32>
    %49 = tpu.matmul %44, %46, %cst_11 {dimension_numbers = #tpu.dot_dimension_numbers<[2], [2], [1], [1], [0, 0, 0, 1, 1, 1], [0], [0]>} : vector<8x2x8xbf16>, vector<8x2x8xbf16>, vector<8x2x2xf32> -> vector<8x2x2xf32>
    "tpu.trace_stop"() : () -> ()
    %cst_12 = arith.constant dense<0xFF800000> : vector<8x2xf32>
    %50 = vector.multi_reduction <maximumf>, %49, %cst_12 [2] : vector<8x2x2xf32> to vector<8x2xf32>
    %51 = vector.shape_cast %50 : vector<8x2xf32> to vector<8x2x1xf32>
    %52 = vector.broadcast %51 : vector<8x2x1xf32> to vector<8x2x2xf32>
    %53 = arith.subf %49, %52 : vector<8x2x2xf32>
    %54 = math.exp %53 : vector<8x2x2xf32>
    %cst_13 = arith.constant dense<0.000000e+00> : vector<8x2xf32>
    %55 = vector.multi_reduction <add>, %54, %cst_13 [2] : vector<8x2x2xf32> to vector<8x2xf32>
    %56 = vector.shape_cast %55 : vector<8x2xf32> to vector<8x2x1xf32>
    %57 = tpu.reciprocal %56 {approx = true} : vector<8x2x1xf32> -> vector<8x2x1xf32>
    %58 = vector.broadcast %57 : vector<8x2x1xf32> to vector<8x2x2xf32>
    %59 = arith.mulf %54, %58 : vector<8x2x2xf32>
    %60 = arith.truncf %59 : vector<8x2x2xf32> to vector<8x2x2xbf16>
    "tpu.trace_start"() <{level = 10 : i32, message = "nlm,nmd->nld"}> : () -> ()
    %cst_14 = arith.constant dense<0.000000e+00> : vector<8x2x8xf32>
    %61 = tpu.matmul %60, %48, %cst_14 {dimension_numbers = #tpu.dot_dimension_numbers<[2], [1], [1], [2], [0, 0, 0, 1, 1, 2], [0], [0]>} : vector<8x2x2xbf16>, vector<8x2x8xbf16>, vector<8x2x8xf32> -> vector<8x2x8xf32>
    "tpu.trace_stop"() : () -> ()
    %62 = vector.shape_cast %61 : vector<8x2x8xf32> to vector<16x8xf32>
    %63 = arith.truncf %62 : vector<16x8xf32> to vector<16x8xbf16>
    %64 = vector.extract_strided_slice %17 {offsets = [0, 16], sizes = [16, 8], strides = [1, 1]} : vector<16x32xbf16> to vector<16x8xbf16>
    %65 = vector.shape_cast %64 : vector<16x8xbf16> to vector<8x2x8xbf16>
    %66 = vector.extract_strided_slice %19 {offsets = [0, 16], sizes = [16, 8], strides = [1, 1]} : vector<16x32xbf16> to vector<16x8xbf16>
    %67 = vector.shape_cast %66 : vector<16x8xbf16> to vector<8x2x8xbf16>
    %68 = vector.extract_strided_slice %21 {offsets = [0, 16], sizes = [16, 8], strides = [1, 1]} : vector<16x32xbf16> to vector<16x8xbf16>
    %69 = vector.shape_cast %68 : vector<16x8xbf16> to vector<8x2x8xbf16>
    "tpu.trace_start"() <{level = 10 : i32, message = "nld,nmd->nlm"}> : () -> ()
    %cst_15 = arith.constant dense<0.000000e+00> : vector<8x2x2xf32>
    %70 = tpu.matmul %65, %67, %cst_15 {dimension_numbers = #tpu.dot_dimension_numbers<[2], [2], [1], [1], [0, 0, 0, 1, 1, 1], [0], [0]>} : vector<8x2x8xbf16>, vector<8x2x8xbf16>, vector<8x2x2xf32> -> vector<8x2x2xf32>
    "tpu.trace_stop"() : () -> ()
    %cst_16 = arith.constant dense<0xFF800000> : vector<8x2xf32>
    %71 = vector.multi_reduction <maximumf>, %70, %cst_16 [2] : vector<8x2x2xf32> to vector<8x2xf32>
    %72 = vector.shape_cast %71 : vector<8x2xf32> to vector<8x2x1xf32>
    %73 = vector.broadcast %72 : vector<8x2x1xf32> to vector<8x2x2xf32>
    %74 = arith.subf %70, %73 : vector<8x2x2xf32>
    %75 = math.exp %74 : vector<8x2x2xf32>
    %cst_17 = arith.constant dense<0.000000e+00> : vector<8x2xf32>
    %76 = vector.multi_reduction <add>, %75, %cst_17 [2] : vector<8x2x2xf32> to vector<8x2xf32>
    %77 = vector.shape_cast %76 : vector<8x2xf32> to vector<8x2x1xf32>
    %78 = tpu.reciprocal %77 {approx = true} : vector<8x2x1xf32> -> vector<8x2x1xf32>
    %79 = vector.broadcast %78 : vector<8x2x1xf32> to vector<8x2x2xf32>
    %80 = arith.mulf %75, %79 : vector<8x2x2xf32>
    %81 = arith.truncf %80 : vector<8x2x2xf32> to vector<8x2x2xbf16>
    "tpu.trace_start"() <{level = 10 : i32, message = "nlm,nmd->nld"}> : () -> ()
    %cst_18 = arith.constant dense<0.000000e+00> : vector<8x2x8xf32>
    %82 = tpu.matmul %81, %69, %cst_18 {dimension_numbers = #tpu.dot_dimension_numbers<[2], [1], [1], [2], [0, 0, 0, 1, 1, 2], [0], [0]>} : vector<8x2x2xbf16>, vector<8x2x8xbf16>, vector<8x2x8xf32> -> vector<8x2x8xf32>
    "tpu.trace_stop"() : () -> ()
    %83 = vector.shape_cast %82 : vector<8x2x8xf32> to vector<16x8xf32>
    %84 = arith.truncf %83 : vector<16x8xf32> to vector<16x8xbf16>
    %85 = vector.extract_strided_slice %17 {offsets = [0, 24], sizes = [16, 8], strides = [1, 1]} : vector<16x32xbf16> to vector<16x8xbf16>
    %86 = vector.shape_cast %85 : vector<16x8xbf16> to vector<8x2x8xbf16>
    %87 = vector.extract_strided_slice %19 {offsets = [0, 24], sizes = [16, 8], strides = [1, 1]} : vector<16x32xbf16> to vector<16x8xbf16>
    %88 = vector.shape_cast %87 : vector<16x8xbf16> to vector<8x2x8xbf16>
    %89 = vector.extract_strided_slice %21 {offsets = [0, 24], sizes = [16, 8], strides = [1, 1]} : vector<16x32xbf16> to vector<16x8xbf16>
    %90 = vector.shape_cast %89 : vector<16x8xbf16> to vector<8x2x8xbf16>
    "tpu.trace_start"() <{level = 10 : i32, message = "nld,nmd->nlm"}> : () -> ()
    %cst_19 = arith.constant dense<0.000000e+00> : vector<8x2x2xf32>
    %91 = tpu.matmul %86, %88, %cst_19 {dimension_numbers = #tpu.dot_dimension_numbers<[2], [2], [1], [1], [0, 0, 0, 1, 1, 1], [0], [0]>} : vector<8x2x8xbf16>, vector<8x2x8xbf16>, vector<8x2x2xf32> -> vector<8x2x2xf32>
    "tpu.trace_stop"() : () -> ()
    %cst_20 = arith.constant dense<0xFF800000> : vector<8x2xf32>
    %92 = vector.multi_reduction <maximumf>, %91, %cst_20 [2] : vector<8x2x2xf32> to vector<8x2xf32>
    %93 = vector.shape_cast %92 : vector<8x2xf32> to vector<8x2x1xf32>
    %94 = vector.broadcast %93 : vector<8x2x1xf32> to vector<8x2x2xf32>
    %95 = arith.subf %91, %94 : vector<8x2x2xf32>
    %96 = math.exp %95 : vector<8x2x2xf32>
    %cst_21 = arith.constant dense<0.000000e+00> : vector<8x2xf32>
    %97 = vector.multi_reduction <add>, %96, %cst_21 [2] : vector<8x2x2xf32> to vector<8x2xf32>
    %98 = vector.shape_cast %97 : vector<8x2xf32> to vector<8x2x1xf32>
    %99 = tpu.reciprocal %98 {approx = true} : vector<8x2x1xf32> -> vector<8x2x1xf32>
    %100 = vector.broadcast %99 : vector<8x2x1xf32> to vector<8x2x2xf32>
    %101 = arith.mulf %96, %100 : vector<8x2x2xf32>
    %102 = arith.truncf %101 : vector<8x2x2xf32> to vector<8x2x2xbf16>
    "tpu.trace_start"() <{level = 10 : i32, message = "nlm,nmd->nld"}> : () -> ()
    %cst_22 = arith.constant dense<0.000000e+00> : vector<8x2x8xf32>
    %103 = tpu.matmul %102, %90, %cst_22 {dimension_numbers = #tpu.dot_dimension_numbers<[2], [1], [1], [2], [0, 0, 0, 1, 1, 2], [0], [0]>} : vector<8x2x2xbf16>, vector<8x2x8xbf16>, vector<8x2x8xf32> -> vector<8x2x8xf32>
    "tpu.trace_stop"() : () -> ()
    %104 = vector.shape_cast %103 : vector<8x2x8xf32> to vector<16x8xf32>
    %105 = arith.truncf %104 : vector<16x8xf32> to vector<16x8xbf16>
    %106 = tpu.concatenate %42, %63, %84, %105 in 1 : vector<16x8xbf16>, vector<16x8xbf16>, vector<16x8xbf16>, vector<16x8xbf16> -> vector<16x32xbf16>
    %107 = arith.index_cast %arg1 : i32 to index
    %c0_23 = arith.constant 0 : index
    %c0_24 = arith.constant 0 : index
    %108 = vector.load %arg5[%107, %c0_23, %c0_24] : memref<2x32x32xbf16, #tpu.memory_space<vmem>>, vector<1x32x32xbf16>
    %109 = vector.shape_cast %108 : vector<1x32x32xbf16> to vector<32x32xbf16>
    %110 = arith.index_cast %arg1 : i32 to index
    %c0_25 = arith.constant 0 : index
    %c0_26 = arith.constant 0 : index
    %111 = vector.load %arg6[%110, %c0_25, %c0_26] : memref<2x1x32xf32, #tpu.memory_space<vmem>>, vector<1x1x32xf32>
    %112 = vector.shape_cast %111 : vector<1x1x32xf32> to vector<1x32xf32>
    %cst_27 = arith.constant dense<0.000000e+00> : vector<16x32xf32>
    %113 = tpu.matmul %106, %109, %cst_27 {dimension_numbers = #tpu.dot_dimension_numbers<[1], [0], [0], [1], [0, 0, 1, 1], [], []>} : vector<16x32xbf16>, vector<32x32xbf16>, vector<16x32xf32> -> vector<16x32xf32>
    %114 = vector.broadcast %112 : vector<1x32xf32> to vector<16x32xf32>
    %115 = arith.addf %113, %114 : vector<16x32xf32>
    %116 = arith.addf %3, %115 : vector<16x32xf32>
    %117 = arith.index_cast %arg1 : i32 to index
    %c0_28 = arith.constant 0 : index
    %c0_29 = arith.constant 0 : index
    %118 = vector.load %arg7[%117, %c0_28, %c0_29] : memref<2x1x32xf32, #tpu.memory_space<vmem>>, vector<1x1x32xf32>
    %119 = vector.shape_cast %118 : vector<1x1x32xf32> to vector<1x32xf32>
    %120 = arith.index_cast %arg1 : i32 to index
    %c0_30 = arith.constant 0 : index
    %c0_31 = arith.constant 0 : index
    %121 = vector.load %arg8[%120, %c0_30, %c0_31] : memref<2x1x32xf32, #tpu.memory_space<vmem>>, vector<1x1x32xf32>
    %122 = vector.shape_cast %121 : vector<1x1x32xf32> to vector<1x32xf32>
    %cst_32 = arith.constant dense<0.000000e+00> : vector<16xf32>
    %123 = vector.multi_reduction <add>, %116, %cst_32 [1] : vector<16x32xf32> to vector<16xf32>
    %124 = vector.shape_cast %123 : vector<16xf32> to vector<16x1xf32>
    %cst_33 = arith.constant 3.200000e+01 : f32
    %125 = vector.broadcast %cst_33 : f32 to vector<16x1xf32>
    %126 = arith.divf %124, %125 : vector<16x1xf32>
    %127 = vector.broadcast %126 : vector<16x1xf32> to vector<16x32xf32>
    %128 = arith.subf %116, %127 : vector<16x32xf32>
    %129 = arith.mulf %128, %128 : vector<16x32xf32>
    %cst_34 = arith.constant dense<0.000000e+00> : vector<16xf32>
    %130 = vector.multi_reduction <add>, %129, %cst_34 [1] : vector<16x32xf32> to vector<16xf32>
    %131 = vector.shape_cast %130 : vector<16xf32> to vector<16x1xf32>
    %cst_35 = arith.constant 3.200000e+01 : f32
    %132 = vector.broadcast %cst_35 : f32 to vector<16x1xf32>
    %133 = arith.divf %131, %132 : vector<16x1xf32>
    %134 = vector.broadcast %126 : vector<16x1xf32> to vector<16x32xf32>
    %135 = arith.subf %116, %134 : vector<16x32xf32>
    %cst_36 = arith.constant 9.99999974E-6 : f32
    %136 = vector.broadcast %cst_36 : f32 to vector<16x1xf32>
    %137 = arith.addf %133, %136 : vector<16x1xf32>
    %138 = math.rsqrt %137 : vector<16x1xf32>
    %139 = vector.broadcast %138 : vector<16x1xf32> to vector<16x32xf32>
    %140 = arith.mulf %135, %139 : vector<16x32xf32>
    %141 = vector.broadcast %119 : vector<1x32xf32> to vector<16x32xf32>
    %142 = arith.mulf %140, %141 : vector<16x32xf32>
    %143 = vector.broadcast %122 : vector<1x32xf32> to vector<16x32xf32>
    %144 = arith.addf %142, %143 : vector<16x32xf32>
    %145 = arith.truncf %144 : vector<16x32xf32> to vector<16x32xbf16>
    %cst_37 = arith.constant 0.000000e+00 : f32
    %146 = vector.broadcast %cst_37 : f32 to vector<16x32xf32>
    %c0_i32_38 = arith.constant 0 : i32
    %c512_i32 = arith.constant 512 : i32
    %147 = arith.muli %c0_i32_38, %c512_i32 : i32
    %148 = tpu.assume_multiple %147, 512 : i32
    %149 = arith.index_cast %arg1 : i32 to index
    %c0_39 = arith.constant 0 : index
    %150 = arith.index_cast %148 : i32 to index
    %151 = vector.load %arg9[%149, %c0_39, %150] : memref<2x32x2048xbf16, #tpu.memory_space<vmem>>, vector<1x32x512xbf16>
    %152 = vector.shape_cast %151 : vector<1x32x512xbf16> to vector<32x512xbf16>
    %153 = arith.index_cast %arg1 : i32 to index
    %c0_40 = arith.constant 0 : index
    %154 = arith.index_cast %148 : i32 to index
    %155 = vector.load %arg10[%153, %c0_40, %154] : memref<2x1x2048xf32, #tpu.memory_space<vmem>>, vector<1x1x512xf32>
    %156 = vector.shape_cast %155 : vector<1x1x512xf32> to vector<1x512xf32>
    %cst_41 = arith.constant dense<0.000000e+00> : vector<16x512xf32>
    %157 = tpu.matmul %145, %152, %cst_41 {dimension_numbers = #tpu.dot_dimension_numbers<[1], [0], [0], [1], [0, 0, 1, 1], [], []>} : vector<16x32xbf16>, vector<32x512xbf16>, vector<16x512xf32> -> vector<16x512xf32>
    %158 = vector.broadcast %156 : vector<1x512xf32> to vector<16x512xf32>
    %159 = arith.addf %157, %158 : vector<16x512xf32>
    %160 = arith.truncf %159 : vector<16x512xf32> to vector<16x512xbf16>
    %cst_42 = arith.constant 0.000000e+00 : bf16
    %161 = vector.broadcast %cst_42 : bf16 to vector<16x512xbf16>
    %162 = arith.maximumf %160, %161 : vector<16x512xbf16>
    %163 = arith.index_cast %arg1 : i32 to index
    %164 = arith.index_cast %148 : i32 to index
    %c0_43 = arith.constant 0 : index
    %165 = vector.load %arg11[%163, %164, %c0_43] : memref<2x2048x32xbf16, #tpu.memory_space<vmem>>, vector<1x512x32xbf16>
    %166 = vector.shape_cast %165 : vector<1x512x32xbf16> to vector<512x32xbf16>
    %cst_44 = arith.constant dense<0.000000e+00> : vector<16x32xf32>
    %167 = tpu.matmul %162, %166, %cst_44 {dimension_numbers = #tpu.dot_dimension_numbers<[1], [0], [0], [1], [0, 0, 1, 1], [], []>} : vector<16x512xbf16>, vector<512x32xbf16>, vector<16x32xf32> -> vector<16x32xf32>
    %168 = arith.addf %146, %167 : vector<16x32xf32>
    %c1_i32 = arith.constant 1 : i32
    %c512_i32_45 = arith.constant 512 : i32
    %169 = arith.muli %c1_i32, %c512_i32_45 : i32
    %170 = tpu.assume_multiple %169, 512 : i32
    %171 = arith.index_cast %arg1 : i32 to index
    %c0_46 = arith.constant 0 : index
    %172 = arith.index_cast %170 : i32 to index
    %173 = vector.load %arg9[%171, %c0_46, %172] : memref<2x32x2048xbf16, #tpu.memory_space<vmem>>, vector<1x32x512xbf16>
    %174 = vector.shape_cast %173 : vector<1x32x512xbf16> to vector<32x512xbf16>
    %175 = arith.index_cast %arg1 : i32 to index
    %c0_47 = arith.constant 0 : index
    %176 = arith.index_cast %170 : i32 to index
    %177 = vector.load %arg10[%175, %c0_47, %176] : memref<2x1x2048xf32, #tpu.memory_space<vmem>>, vector<1x1x512xf32>
    %178 = vector.shape_cast %177 : vector<1x1x512xf32> to vector<1x512xf32>
    %cst_48 = arith.constant dense<0.000000e+00> : vector<16x512xf32>
    %179 = tpu.matmul %145, %174, %cst_48 {dimension_numbers = #tpu.dot_dimension_numbers<[1], [0], [0], [1], [0, 0, 1, 1], [], []>} : vector<16x32xbf16>, vector<32x512xbf16>, vector<16x512xf32> -> vector<16x512xf32>
    %180 = vector.broadcast %178 : vector<1x512xf32> to vector<16x512xf32>
    %181 = arith.addf %179, %180 : vector<16x512xf32>
    %182 = arith.truncf %181 : vector<16x512xf32> to vector<16x512xbf16>
    %cst_49 = arith.constant 0.000000e+00 : bf16
    %183 = vector.broadcast %cst_49 : bf16 to vector<16x512xbf16>
    %184 = arith.maximumf %182, %183 : vector<16x512xbf16>
    %185 = arith.index_cast %arg1 : i32 to index
    %186 = arith.index_cast %170 : i32 to index
    %c0_50 = arith.constant 0 : index
    %187 = vector.load %arg11[%185, %186, %c0_50] : memref<2x2048x32xbf16, #tpu.memory_space<vmem>>, vector<1x512x32xbf16>
    %188 = vector.shape_cast %187 : vector<1x512x32xbf16> to vector<512x32xbf16>
    %cst_51 = arith.constant dense<0.000000e+00> : vector<16x32xf32>
    %189 = tpu.matmul %184, %188, %cst_51 {dimension_numbers = #tpu.dot_dimension_numbers<[1], [0], [0], [1], [0, 0, 1, 1], [], []>} : vector<16x512xbf16>, vector<512x32xbf16>, vector<16x32xf32> -> vector<16x32xf32>
    %190 = arith.addf %168, %189 : vector<16x32xf32>
    %c2_i32 = arith.constant 2 : i32
    %c512_i32_52 = arith.constant 512 : i32
    %191 = arith.muli %c2_i32, %c512_i32_52 : i32
    %192 = tpu.assume_multiple %191, 512 : i32
    %193 = arith.index_cast %arg1 : i32 to index
    %c0_53 = arith.constant 0 : index
    %194 = arith.index_cast %192 : i32 to index
    %195 = vector.load %arg9[%193, %c0_53, %194] : memref<2x32x2048xbf16, #tpu.memory_space<vmem>>, vector<1x32x512xbf16>
    %196 = vector.shape_cast %195 : vector<1x32x512xbf16> to vector<32x512xbf16>
    %197 = arith.index_cast %arg1 : i32 to index
    %c0_54 = arith.constant 0 : index
    %198 = arith.index_cast %192 : i32 to index
    %199 = vector.load %arg10[%197, %c0_54, %198] : memref<2x1x2048xf32, #tpu.memory_space<vmem>>, vector<1x1x512xf32>
    %200 = vector.shape_cast %199 : vector<1x1x512xf32> to vector<1x512xf32>
    %cst_55 = arith.constant dense<0.000000e+00> : vector<16x512xf32>
    %201 = tpu.matmul %145, %196, %cst_55 {dimension_numbers = #tpu.dot_dimension_numbers<[1], [0], [0], [1], [0, 0, 1, 1], [], []>} : vector<16x32xbf16>, vector<32x512xbf16>, vector<16x512xf32> -> vector<16x512xf32>
    %202 = vector.broadcast %200 : vector<1x512xf32> to vector<16x512xf32>
    %203 = arith.addf %201, %202 : vector<16x512xf32>
    %204 = arith.truncf %203 : vector<16x512xf32> to vector<16x512xbf16>
    %cst_56 = arith.constant 0.000000e+00 : bf16
    %205 = vector.broadcast %cst_56 : bf16 to vector<16x512xbf16>
    %206 = arith.maximumf %204, %205 : vector<16x512xbf16>
    %207 = arith.index_cast %arg1 : i32 to index
    %208 = arith.index_cast %192 : i32 to index
    %c0_57 = arith.constant 0 : index
    %209 = vector.load %arg11[%207, %208, %c0_57] : memref<2x2048x32xbf16, #tpu.memory_space<vmem>>, vector<1x512x32xbf16>
    %210 = vector.shape_cast %209 : vector<1x512x32xbf16> to vector<512x32xbf16>
    %cst_58 = arith.constant dense<0.000000e+00> : vector<16x32xf32>
    %211 = tpu.matmul %206, %210, %cst_58 {dimension_numbers = #tpu.dot_dimension_numbers<[1], [0], [0], [1], [0, 0, 1, 1], [], []>} : vector<16x512xbf16>, vector<512x32xbf16>, vector<16x32xf32> -> vector<16x32xf32>
    %212 = arith.addf %190, %211 : vector<16x32xf32>
    %c3_i32 = arith.constant 3 : i32
    %c512_i32_59 = arith.constant 512 : i32
    %213 = arith.muli %c3_i32, %c512_i32_59 : i32
    %214 = tpu.assume_multiple %213, 512 : i32
    %215 = arith.index_cast %arg1 : i32 to index
    %c0_60 = arith.constant 0 : index
    %216 = arith.index_cast %214 : i32 to index
    %217 = vector.load %arg9[%215, %c0_60, %216] : memref<2x32x2048xbf16, #tpu.memory_space<vmem>>, vector<1x32x512xbf16>
    %218 = vector.shape_cast %217 : vector<1x32x512xbf16> to vector<32x512xbf16>
    %219 = arith.index_cast %arg1 : i32 to index
    %c0_61 = arith.constant 0 : index
    %220 = arith.index_cast %214 : i32 to index
    %221 = vector.load %arg10[%219, %c0_61, %220] : memref<2x1x2048xf32, #tpu.memory_space<vmem>>, vector<1x1x512xf32>
    %222 = vector.shape_cast %221 : vector<1x1x512xf32> to vector<1x512xf32>
    %cst_62 = arith.constant dense<0.000000e+00> : vector<16x512xf32>
    %223 = tpu.matmul %145, %218, %cst_62 {dimension_numbers = #tpu.dot_dimension_numbers<[1], [0], [0], [1], [0, 0, 1, 1], [], []>} : vector<16x32xbf16>, vector<32x512xbf16>, vector<16x512xf32> -> vector<16x512xf32>
    %224 = vector.broadcast %222 : vector<1x512xf32> to vector<16x512xf32>
    %225 = arith.addf %223, %224 : vector<16x512xf32>
    %226 = arith.truncf %225 : vector<16x512xf32> to vector<16x512xbf16>
    %cst_63 = arith.constant 0.000000e+00 : bf16
    %227 = vector.broadcast %cst_63 : bf16 to vector<16x512xbf16>
    %228 = arith.maximumf %226, %227 : vector<16x512xbf16>
    %229 = arith.index_cast %arg1 : i32 to index
    %230 = arith.index_cast %214 : i32 to index
    %c0_64 = arith.constant 0 : index
    %231 = vector.load %arg11[%229, %230, %c0_64] : memref<2x2048x32xbf16, #tpu.memory_space<vmem>>, vector<1x512x32xbf16>
    %232 = vector.shape_cast %231 : vector<1x512x32xbf16> to vector<512x32xbf16>
    %cst_65 = arith.constant dense<0.000000e+00> : vector<16x32xf32>
    %233 = tpu.matmul %228, %232, %cst_65 {dimension_numbers = #tpu.dot_dimension_numbers<[1], [0], [0], [1], [0, 0, 1, 1], [], []>} : vector<16x512xbf16>, vector<512x32xbf16>, vector<16x32xf32> -> vector<16x32xf32>
    %234 = arith.addf %212, %233 : vector<16x32xf32>
    %c4_i32 = arith.constant 4 : i32
    %235 = arith.index_cast %arg1 : i32 to index
    %c0_66 = arith.constant 0 : index
    %c0_67 = arith.constant 0 : index
    %236 = vector.load %arg12[%235, %c0_66, %c0_67] : memref<2x1x32xf32, #tpu.memory_space<vmem>>, vector<1x1x32xf32>
    %237 = vector.shape_cast %236 : vector<1x1x32xf32> to vector<1x32xf32>
    %238 = vector.broadcast %237 : vector<1x32xf32> to vector<16x32xf32>
    %239 = arith.addf %234, %238 : vector<16x32xf32>
    %240 = arith.addf %144, %239 : vector<16x32xf32>
    %241 = arith.index_cast %arg1 : i32 to index
    %c0_68 = arith.constant 0 : index
    %c0_69 = arith.constant 0 : index
    %242 = vector.load %arg13[%241, %c0_68, %c0_69] : memref<2x1x32xf32, #tpu.memory_space<vmem>>, vector<1x1x32xf32>
    %243 = vector.shape_cast %242 : vector<1x1x32xf32> to vector<1x32xf32>
    %244 = arith.index_cast %arg1 : i32 to index
    %c0_70 = arith.constant 0 : index
    %c0_71 = arith.constant 0 : index
    %245 = vector.load %arg14[%244, %c0_70, %c0_71] : memref<2x1x32xf32, #tpu.memory_space<vmem>>, vector<1x1x32xf32>
    %246 = vector.shape_cast %245 : vector<1x1x32xf32> to vector<1x32xf32>
    %cst_72 = arith.constant dense<0.000000e+00> : vector<16xf32>
    %247 = vector.multi_reduction <add>, %240, %cst_72 [1] : vector<16x32xf32> to vector<16xf32>
    %248 = vector.shape_cast %247 : vector<16xf32> to vector<16x1xf32>
    %cst_73 = arith.constant 3.200000e+01 : f32
    %249 = vector.broadcast %cst_73 : f32 to vector<16x1xf32>
    %250 = arith.divf %248, %249 : vector<16x1xf32>
    %251 = vector.broadcast %250 : vector<16x1xf32> to vector<16x32xf32>
    %252 = arith.subf %240, %251 : vector<16x32xf32>
    %253 = arith.mulf %252, %252 : vector<16x32xf32>
    %cst_74 = arith.constant dense<0.000000e+00> : vector<16xf32>
    %254 = vector.multi_reduction <add>, %253, %cst_74 [1] : vector<16x32xf32> to vector<16xf32>
    %255 = vector.shape_cast %254 : vector<16xf32> to vector<16x1xf32>
    %cst_75 = arith.constant 3.200000e+01 : f32
    %256 = vector.broadcast %cst_75 : f32 to vector<16x1xf32>
    %257 = arith.divf %255, %256 : vector<16x1xf32>
    %258 = vector.broadcast %250 : vector<16x1xf32> to vector<16x32xf32>
    %259 = arith.subf %240, %258 : vector<16x32xf32>
    %cst_76 = arith.constant 9.99999974E-6 : f32
    %260 = vector.broadcast %cst_76 : f32 to vector<16x1xf32>
    %261 = arith.addf %257, %260 : vector<16x1xf32>
    %262 = math.rsqrt %261 : vector<16x1xf32>
    %263 = vector.broadcast %262 : vector<16x1xf32> to vector<16x32xf32>
    %264 = arith.mulf %259, %263 : vector<16x32xf32>
    %265 = vector.broadcast %243 : vector<1x32xf32> to vector<16x32xf32>
    %266 = arith.mulf %264, %265 : vector<16x32xf32>
    %267 = vector.broadcast %246 : vector<1x32xf32> to vector<16x32xf32>
    %268 = arith.addf %266, %267 : vector<16x32xf32>
    %c0_77 = arith.constant 0 : index
    %c0_78 = arith.constant 0 : index
    %269 = vector.load %arg16[%c0_77, %c0_78] : memref<16x32xf32, #tpu.memory_space<vmem>>, vector<16x32xf32>
    tpu.vector_store %arg16[%c0_77, %c0_78], %268 {strides = array<i32>} : memref<16x32xf32, #tpu.memory_space<vmem>>, vector<16x32xf32>,
    %c1_i32_79 = arith.constant 1 : i32
    %270 = arith.cmpi eq, %arg1, %c1_i32_79 : i32
    %271 = arith.extui %270 : i1 to i32
    %c0_i32_80 = arith.constant 0 : i32
    %272 = arith.cmpi ne, %271, %c0_i32_80 : i32
    scf.if %272 {
      %c0_81 = arith.constant 0 : index
      %c0_82 = arith.constant 0 : index
      %273 = vector.load %arg15[%c0_81, %c0_82] : memref<16x32xf32, #tpu.memory_space<vmem>>, vector<16x32xf32>
      tpu.vector_store %arg15[%c0_81, %c0_82], %268 {strides = array<i32>} : memref<16x32xf32, #tpu.memory_space<vmem>>, vector<16x32xf32>,
    } else {
    }
    return
  }
  func.func @transform_0(%arg0: i32, %arg1: i32) -> (i32, i32) {
    %c0_i32 = arith.constant 0 : i32
    %c0_i32_0 = arith.constant 0 : i32
    return %arg0, %c0_i32 : i32, i32
  }
  func.func @transform_1(%arg0: i32, %arg1: i32) -> (i32, i32, i32) {
    %c0_i32 = arith.constant 0 : i32
    %c0_i32_0 = arith.constant 0 : i32
    %c0_i32_1 = arith.constant 0 : i32
    %c0_i32_2 = arith.constant 0 : i32
    return %c0_i32, %c0_i32_0, %c0_i32_1 : i32, i32, i32
  }
  func.func @transform_2(%arg0: i32, %arg1: i32) -> (i32, i32, i32) {
    %c0_i32 = arith.constant 0 : i32
    %c0_i32_0 = arith.constant 0 : i32
    %c0_i32_1 = arith.constant 0 : i32
    %c0_i32_2 = arith.constant 0 : i32
    return %c0_i32, %c0_i32_0, %c0_i32_1 : i32, i32, i32
  }
  func.func @transform_3(%arg0: i32, %arg1: i32) -> (i32, i32, i32) {
    %c0_i32 = arith.constant 0 : i32
    %c0_i32_0 = arith.constant 0 : i32
    %c0_i32_1 = arith.constant 0 : i32
    %c0_i32_2 = arith.constant 0 : i32
    return %c0_i32, %c0_i32_0, %c0_i32_1 : i32, i32, i32
  }
  func.func @transform_4(%arg0: i32, %arg1: i32) -> (i32, i32, i32) {
    %c0_i32 = arith.constant 0 : i32
    %c0_i32_0 = arith.constant 0 : i32
    %c0_i32_1 = arith.constant 0 : i32
    %c0_i32_2 = arith.constant 0 : i32
    return %c0_i32, %c0_i32_0, %c0_i32_1 : i32, i32, i32
  }
  func.func @transform_5(%arg0: i32, %arg1: i32) -> (i32, i32, i32) {
    %c0_i32 = arith.constant 0 : i32
    %c0_i32_0 = arith.constant 0 : i32
    %c0_i32_1 = arith.constant 0 : i32
    %c0_i32_2 = arith.constant 0 : i32
    return %c0_i32, %c0_i32_0, %c0_i32_1 : i32, i32, i32
  }
  func.func @transform_6(%arg0: i32, %arg1: i32) -> (i32, i32, i32) {
    %c0_i32 = arith.constant 0 : i32
    %c0_i32_0 = arith.constant 0 : i32
    %c0_i32_1 = arith.constant 0 : i32
    %c0_i32_2 = arith.constant 0 : i32
    return %c0_i32, %c0_i32_0, %c0_i32_1 : i32, i32, i32
  }
  func.func @transform_7(%arg0: i32, %arg1: i32) -> (i32, i32, i32) {
    %c0_i32 = arith.constant 0 : i32
    %c0_i32_0 = arith.constant 0 : i32
    %c0_i32_1 = arith.constant 0 : i32
    %c0_i32_2 = arith.constant 0 : i32
    return %c0_i32, %c0_i32_0, %c0_i32_1 : i32, i32, i32
  }
  func.func @transform_8(%arg0: i32, %arg1: i32) -> (i32, i32, i32) {
    %c0_i32 = arith.constant 0 : i32
    %c0_i32_0 = arith.constant 0 : i32
    %c0_i32_1 = arith.constant 0 : i32
    %c0_i32_2 = arith.constant 0 : i32
    return %c0_i32, %c0_i32_0, %c0_i32_1 : i32, i32, i32
  }
  func.func @transform_9(%arg0: i32, %arg1: i32) -> (i32, i32, i32) {
    %c0_i32 = arith.constant 0 : i32
    %c0_i32_0 = arith.constant 0 : i32
    %c0_i32_1 = arith.constant 0 : i32
    %c0_i32_2 = arith.constant 0 : i32
    return %c0_i32, %c0_i32_0, %c0_i32_1 : i32, i32, i32
  }
  func.func @transform_10(%arg0: i32, %arg1: i32) -> (i32, i32, i32) {
    %c0_i32 = arith.constant 0 : i32
    %c0_i32_0 = arith.constant 0 : i32
    %c0_i32_1 = arith.constant 0 : i32
    %c0_i32_2 = arith.constant 0 : i32
    return %c0_i32, %c0_i32_0, %c0_i32_1 : i32, i32, i32
  }
  func.func @transform_11(%arg0: i32, %arg1: i32) -> (i32, i32, i32) {
    %c0_i32 = arith.constant 0 : i32
    %c0_i32_0 = arith.constant 0 : i32
    %c0_i32_1 = arith.constant 0 : i32
    %c0_i32_2 = arith.constant 0 : i32
    return %c0_i32, %c0_i32_0, %c0_i32_1 : i32, i32, i32
  }
  func.func @transform_12(%arg0: i32, %arg1: i32) -> (i32, i32, i32) {
    %c0_i32 = arith.constant 0 : i32
    %c0_i32_0 = arith.constant 0 : i32
    %c0_i32_1 = arith.constant 0 : i32
    %c0_i32_2 = arith.constant 0 : i32
    return %c0_i32, %c0_i32_0, %c0_i32_1 : i32, i32, i32
  }
  func.func @transform_13(%arg0: i32, %arg1: i32) -> (i32, i32) {
    %c0_i32 = arith.constant 0 : i32
    %c0_i32_0 = arith.constant 0 : i32
    return %arg0, %c0_i32 : i32, i32
  }
}

</mosaic_0001>

<bundles_post_ra>
// kernel: tpu_custom_call.1
= control target key start
LH: loop header
LB: loop body
LE: loop exit
PB: predicated region body
PF: predicated region fallthrough
CT: control target
= control target key end

     0   :  { %18 = vsyncpa [#allocation4], 0  ;;  %s6410_s25 = smov 0   ;;  %s6412_s26 = smov 0   ;;  %s7463_s0 = inlined_call_operand.vmem [shape: f32[16,32], index: 0, kind: input, shape index: {}]   ;;  %s7464_s1 = inlined_call_operand.vmem [shape: bf16[2,32,96], index: 1, kind: input, shape index: {}]   ;;  %s7465_s2 = inlined_call_operand.vmem [shape: f32[2,1,96], index: 2, kind: input, shape index: {}]   ;;  %s7466_s3 = inlined_call_operand.vmem [shape: bf16[2,32,32], index: 3, kind: input, shape index: {}]   ;;  %s7467_s4 = inlined_call_operand.vmem [shape: f32[2,1,32], index: 4, kind: input, shape index: {}]   ;;  %s7468_s5 = inlined_call_operand.vmem [shape: f32[2,1,32], index: 5, kind: input, shape index: {}]   ;;  %s7469_s6 = inlined_call_operand.vmem [shape: f32[2,1,32], index: 6, kind: input, shape index: {}]   ;;  %s7470_s7 = inlined_call_operand.vmem [shape: bf16[2,32,2048], index: 7, kind: input, shape index: {}]   ;;  %s7471_s8 = inlined_call_operand.vmem [shape: f32[2,1,2048], index: 8, kind: input, shape index: {}]   ;;  %s7472_s9 = inlined_call_operand.vmem [shape: bf16[2,2048,32], index: 9, kind: input, shape index: {}]   ;;  %s7473_s10 = inlined_call_operand.vmem [shape: f32[2,1,32], index: 10, kind: input, shape index: {}]   ;;  %s7474_s11 = inlined_call_operand.vmem [shape: f32[2,1,32], index: 11, kind: input, shape index: {}]   ;;  %s7475_s12 = inlined_call_operand.vmem [shape: f32[2,1,32], index: 12, kind: input, shape index: {}]   ;;  %s7476_s13 = inlined_call_operand.hbm [shape: f32[16,32], index: 13, kind: output, shape index: {}]  }
   0x1   :  { %s6414_s27 = smov 0  }
   0x2 LB: > { %s4909_s28 = sadd.s32 4294967295, %s6321_s27   ;;  %s33_s29 = sadd.s32 1, %s6317_s26  ;;  %s6321_s27 = sphi %s6414_s27, %s24_s27   ;;  %s6317_s26 = sphi %s6412_s26, %s7478_s26   ;;  %s6313_s25 = sphi %s6410_s25, %s7477_s25  }
   0x3   : > { %p34_p0 = scmp.ge.s32.totalorder %s33_s29, 2  ;;  %p4912_p1 = scmp.ge.s32.totalorder %s6321_s27, 1 }
   0x4   : > { %p401_p2 = scmp.lt.s32.totalorder %s6321_s27, 3 }
   0x5   : > { %s7480_s29 = smov (%p34_p0, %s33_s29), 0 }
   0x6   : > { %p402_p3 = pnand %p4912_p1, %p401_p2 }
   0x7   : > { %p4913_p4 = scmp.ne.s32.totalorder (!%p402_p3), %s6313_s25, 0 }
   0x8   : > { %405 = sbr.rel (%p402_p3) target bundleno = 4812 (0x12cc), region = 72 }
   0xd   : > { %451 = sbr.rel (%p4913_p4) target bundleno = 21 (0x15), region = 76 }
  0x12   : > { %v452_v0 = vld [vmem:[%s7463_s0] sm:$0xff]  ;;  %vm454_vm0 = vcmask 261120   ;;  %v453_v1 = vld [vmem:[%s7463_s0 + $0x8] sm:$0xff] }
  0x13   : > { %455 = vst.msk [vmem:[#allocation2] sm:$0xff] %vm454_vm0, %v452_v0 }
  0x14   : > { %456 = vst.msk [vmem:[#allocation2 + $0x8] sm:$0xff] %vm454_vm0, %v453_v1 }
  0x15 PF: > { %s6439_s17 = sshll.u32 %s6313_s25, 4  ;;  %s466_s20 = scalar_lea.vmem %s7465_s2, %s6313_s25  ;;  %vm484_vm1 = vcmask 261120   ;;  %vm512_vm2 = vcmask 1040384   ;;  %vm516_vm3 = vcmask 1041409   ;;  %vm520_vm4 = vcmask 1042434  }
  0x16   : > { %s461_s23 = scalar_lea.vmem %s7464_s1, %s6439_s17  ;;  %v6120_v7 = vld [vmem:[%s466_s20] ss:$0 sm:$0xff]  ;;  %vm524_vm5 = vcmask 1043459   ;;  %s6323_s24 = smov 96   ;;  %vm573_vm6 = vcmask 64512   ;;  %vm765_vm7 = vcmask 9216  }
  0x17   : > { %v5901_v2 = vld [vmem:[%s461_s23 + $0x8] sm:$0xff]  ;;  %v5900_v3 = vld [vmem:[%s461_s23] sm:$0xff]  ;;  %s6324_s30 = smov 64   ;;  %vm867_vm8 = vcmask 15360   ;;  %s6325_s14 = smov 120   ;;  %vm2760_vm9 = vcmask 130048  }
  0x18   : > { %494 = vmatpush.bf16.msra.mxu0 %v5901_v2  ;;  %s6326_s15 = smov 88   ;;  %s6327_s16 = smov 56   ;;  %vm2763_vm10 = vcmask 195584  }
  0x19   : > { %s6328_s18 = smov 112   ;;  %s6329_s19 = smov 80  }
  0x1a   : > { %v457_v4 = vld [vmem:[#allocation2] sm:$0xff]  ;;  %s6330_s20 = smov 48   ;;  %s6331_s21 = smov 104  }
  0x1b   : > { %v458_v5 = vld [vmem:[#allocation2 + $0x8] sm:$0xff]  ;;  %s6332_s22 = smov 72   ;;  %s6333_s23 = smov 40  }
  0x1c   : > { %v468_v6 = vpack.c.bf16 %v458_v5, %v457_v4  ;;  %495 = vmatpush.bf16.msra.mxu0 %v5900_v3  ;;  %p5894_p5 = scmp.ne.s32.totalorder %s6313_s25, 1 }
  0x1f   : > { %4924 = vmatmul.msk.bf16.vlgmr.msra.gmra.mxu0 %vm484_vm1, %v468_v6 }
  0x9c   : > { %v497_v8 = vpop.f32.mrf.mxu0 }
  0x9d   : > { %v498_v9 = vadd.f32 %v6120_v7, %v497_v8 }
  0x9f   : > { %v502_v10 = vmul.f32 0.35355338, %v498_v9  ;;  %v506_v11 = vpack.c.bf16 %v498_v9, %v498_v9 }
  0xa1   : > { %v6450_v12 = vpack.c.bf16 %v502_v10, %v502_v10  ;;  %v542_v13 = vrot.slane %v506_v11, 3 }
  0xa3   : > { %v6453_v14 = vsel %vm512_vm2, %v506_v11, %v542_v13  ;;  %v6457_v16 = vrot.slane %v6450_v12, 3  ;;  %v547_v21 = vsel %vm516_vm3, %v506_v11, %v542_v13  ;;  %v550_v30 = vsel %vm520_vm4, %v506_v11, %v542_v13 }
  0xa4   : > { %568 = vst [vmem:[#allocation1] ss:$9 sm:$0xff] %v6453_v14  ;;  %v499_v15 = vpop.f32.mrf.mxu0  ;;  %v6477_v24 = vrot.slane %v547_v21, 1  ;;  %v6500_v31 = vrot.slane %v550_v30, 2  ;;  %v553_v33 = vsel %vm524_vm5, %v506_v11, %v542_v13 }
  0xa5   : > { %v500_v17 = vadd.f32 %v6120_v7, %v499_v15  ;;  %v6462_v18 = vsel %vm516_vm3, %v6450_v12, %v6457_v16  ;;  %v6467_v19 = vsel %vm520_vm4, %v6450_v12, %v6457_v16  ;;  %v6472_v20 = vsel %vm524_vm5, %v6450_v12, %v6457_v16 }
  0xa6   : > { %v6505_v34 = vrot.slane %v553_v33, 3  ;;  %v6553_v60 = vsel %vm512_vm2, %v6450_v12, %v6457_v16  ;;  %v6559_v62 = vrot.slane %v6462_v18, 1  ;;  %v6566_v3 = vrot.slane %v6467_v19, 2 }
  0xa7   : > { %v503_v22 = vmul.f32 0.35355338, %v500_v17  ;;  %v507_v36 = vpack.c.bf16 %v500_v17, %v500_v17  ;;  %v6573_v8 = vrot.slane %v6472_v20, 3 }
  0xa9   : > { %v6475_v23 = vpack.c.bf16 %v503_v22, %v503_v22  ;;  %v543_v37 = vrot.slane %v507_v36, 3 }
  0xab   : > { %v569_v25 = vld [vmem:[#allocation1] sm:$0xff]  ;;  %v6482_v26 = vrot.slane %v6475_v23, 3  ;;  %v6510_v38 = vsel %vm512_vm2, %v507_v36, %v543_v37  ;;  %v559_v40 = vsel %vm516_vm3, %v507_v36, %v543_v37  ;;  %v562_v43 = vsel %vm520_vm4, %v507_v36, %v543_v37 }
  0xac   : > { %593 = vst [vmem:[#allocation1] ss:$9 sm:$0xff] %v6477_v24  ;;  %571 = vrot.lane.b32.xlu1 %v569_v25, %s6323_s24  ;;  %v6515_v41 = vrot.slane %v559_v40, 1  ;;  %v6520_v44 = vrot.slane %v562_v43, 2  ;;  %v565_v46 = vsel %vm524_vm5, %v507_v36, %v543_v37 }
  0xad   : > { %v6487_v27 = vsel %vm516_vm3, %v6475_v23, %v6482_v26  ;;  %v6492_v28 = vsel %vm520_vm4, %v6475_v23, %v6482_v26  ;;  %v6497_v29 = vsel %vm524_vm5, %v6475_v23, %v6482_v26  ;;  %v6525_v47 = vrot.slane %v565_v46, 3 }
  0xae   : > { %v6576_v9 = vrot.slane %v6487_v27, 1  ;;  %v6584_v12 = vrot.slane %v6492_v28, 2  ;;  %v6589_v13 = vsel %vm512_vm2, %v6475_v23, %v6482_v26  ;;  %v6598_v19 = vrot.slane %v6497_v29, 3 }
  0xb3   : > { %v594_v32 = vld [vmem:[#allocation1] sm:$0xff] }
  0xb4   : > { %618 = vst [vmem:[#allocation1] ss:$9 sm:$0xff] %v6500_v31  ;;  %596 = vrot.lane.b32.xlu0 %v594_v32, %s6323_s24 }
  0xbb   : > { %v619_v35 = vld [vmem:[#allocation1] sm:$0xff] }
  0xbc   : > { %643 = vst [vmem:[#allocation1] ss:$9 sm:$0xff] %v6505_v34  ;;  %621 = vrot.lane.b32.xlu0 %v619_v35, %s6323_s24 }
  0xc3   : > { %v644_v39 = vld [vmem:[#allocation1] sm:$0xff] }
  0xc4   : > { %667 = vst [vmem:[#allocation1] ss:$9 sm:$0xff] %v6510_v38  ;;  %646 = vrot.lane.b32.xlu1 %v644_v39, %s6323_s24 }
  0xcb   : > { %v668_v42 = vld [vmem:[#allocation1] sm:$0xff] }
  0xcc   : > { %691 = vst [vmem:[#allocation1] ss:$9 sm:$0xff] %v6515_v41  ;;  %670 = vrot.lane.b32.xlu0 %v668_v42, %s6323_s24 }
  0xd3   : > { %v692_v45 = vld [vmem:[#allocation1] sm:$0xff] }
  0xd4   : > { %716 = vst [vmem:[#allocation1] ss:$9 sm:$0xff] %v6520_v44  ;;  %694 = vrot.lane.b32.xlu2 %v692_v45, %s6323_s24 }
  0xdb   : > { %v717_v48 = vld [vmem:[#allocation1] sm:$0xff] }
  0xdc   : > { %741 = vst [vmem:[#allocation1] ss:$9 sm:$0xff] %v6525_v47  ;;  %719 = vrot.lane.b32.xlu2 %v717_v48, %s6323_s24 }
  0xe3   : > { %v742_v49 = vld [vmem:[#allocation1] sm:$0xff] }
  0xe4   : > { %862 = vst [vmem:[#allocation1] ss:$9 sm:$0xff] %v6453_v14  ;;  %744 = vrot.lane.b32.xlu1 %v742_v49, %s6323_s24  ;;  %s6334_s24 = smov 8  }
  0xeb   : > { %v863_v50 = vld [vmem:[#allocation1] sm:$0xff] }
  0xec   : > { %887 = vst [vmem:[#allocation1] ss:$9 sm:$0xff] %v6477_v24  ;;  %865 = vrot.lane.b32.xlu0 %v863_v50, %s6324_s30 }
  0xf3   : > { %v888_v51 = vld [vmem:[#allocation1] sm:$0xff] }
  0xf4   : > { %911 = vst [vmem:[#allocation1] ss:$9 sm:$0xff] %v6500_v31  ;;  %890 = vrot.lane.b32.xlu1 %v888_v51, %s6324_s30 }
  0xfb   : > { %v912_v52 = vld [vmem:[#allocation1] sm:$0xff] }
  0xfc   : > { %935 = vst [vmem:[#allocation1] ss:$9 sm:$0xff] %v6505_v34  ;;  %914 = vrot.lane.b32.xlu2 %v912_v52, %s6324_s30 }
 0x103   : > { %v6537_v53 = vld [vmem:[#allocation1] sm:$0xff] }
 0x104   : > { %959 = vst [vmem:[#allocation1] ss:$9 sm:$0xff] %v6510_v38 }
 0x10b   : > { %v6540_v54 = vld [vmem:[#allocation1] sm:$0xff] }
 0x10c   : > { %983 = vst [vmem:[#allocation1] ss:$9 sm:$0xff] %v6515_v41 }
 0x113   : > { %v6543_v55 = vld [vmem:[#allocation1] sm:$0xff] }
 0x114   : > { %1007 = vst [vmem:[#allocation1] ss:$9 sm:$0xff] %v6520_v44 }
 0x11b   : > { %v6546_v56 = vld [vmem:[#allocation1] sm:$0xff] }
 0x11c   : > { %1031 = vst [vmem:[#allocation1] ss:$9 sm:$0xff] %v6525_v47 }
 0x11e   : > { %v572_v57 = vpop.permute.xlu1 %571 }
 0x11f   : > { %v577_v58 = vsel %vm573_vm6, %v572_v57, 0 }
 0x120   : > { %586 = vmatpush.bf16.xpose.msra.mxu1 %v577_v58 }
 0x126   : > { %v597_v59 = vpop.permute.xlu0 %596 }
 0x127   : > { %4925 = vmatmul.msk.bf16.vlgmr.msra.gmra.mxu1 %vm573_vm6, %v6553_v60  ;;  %v602_v61 = vsel %vm573_vm6, %v597_v59, 0 }
 0x128   : > { %611 = vmatpush.bf16.xpose.msra.mxu2 %v602_v61 }
 0x12e   : > { %v622_v63 = vpop.permute.xlu0 %621  ;;  %v695_v0 = vpop.permute.xlu2 %694 }
 0x12f   : > { %4926 = vmatmul.msk.bf16.vlgmr.msra.gmra.mxu2 %vm573_vm6, %v6559_v62  ;;  %v627_v1 = vsel %vm573_vm6, %v622_v63, 0  ;;  %v700_v2 = vsel %vm573_vm6, %v695_v0, 0 }
 0x130   : > { %636 = vmatpush.bf16.xpose.msra.mxu3 %v627_v1  ;;  %709 = vmatpush.bf16.xpose.msrb.mxu2 %v700_v2 }
 0x136   : > { %v647_v4 = vpop.permute.xlu1 %646  ;;  %v720_v5 = vpop.permute.xlu2 %719 }
 0x137   : > { %4927 = vmatmul.msk.bf16.vlgmr.msra.gmra.mxu3 %vm573_vm6, %v6566_v3  ;;  %v652_v6 = vsel %vm573_vm6, %v647_v4, 0  ;;  %v725_v7 = vsel %vm573_vm6, %v720_v5, 0 }
 0x138   : > { %661 = vmatpush.bf16.xpose.msrb.mxu0 %v652_v6  ;;  %734 = vmatpush.bf16.xpose.msrb.mxu3 %v725_v7 }
 0x13e   : > { %v671_v10 = vpop.permute.xlu0 %670 }
 0x13f   : > { %4928 = vmatmul.msk.bf16.vlgmr.msrb.gmra.mxu0 %vm573_vm6, %v6573_v8  ;;  %4930 = vmatmul.msk.bf16.vlgmr.msrb.gmra.mxu2 %vm573_vm6, %v6576_v9  ;;  %v675_v11 = vsel %vm573_vm6, %v671_v10, 0 }
 0x140   : > { %684 = vmatpush.bf16.xpose.msrb.mxu1 %v675_v11 }
 0x147   : > { %4929 = vmatmul.msk.bf16.vlgmr.msrb.gmra.mxu1 %vm573_vm6, %v6589_v13  ;;  %4931 = vmatmul.msk.bf16.vlgmr.msrb.gmra.mxu3 %vm573_vm6, %v6584_v12 }
 0x156   : > { %v745_v15 = vpop.permute.xlu1 %744  ;;  %v915_v16 = vpop.permute.xlu2 %914 }
 0x157   : > { %v750_v17 = vsel %vm573_vm6, %v745_v15, 0  ;;  %v920_v18 = vsel %vm512_vm2, %v915_v16, 0 }
 0x158   : > { %759 = vmatpush.bf16.xpose.msra.mxu0 %v750_v17  ;;  %929 = vmatpush.bf16.msra.mxu3 %v920_v18 }
 0x15e   : > { %v866_v20 = vpop.permute.xlu0 %865 }
 0x15f   : > { %v872_v21 = vsel %vm512_vm2, %v866_v20, 0  ;;  %4932 = vmatmul.msk.bf16.vlgmr.msra.gmra.mxu0 %vm573_vm6, %v6598_v19 }
 0x160   : > { %881 = vmatpush.bf16.msra.mxu1 %v872_v21 }
 0x166   : > { %v891_v22 = vpop.permute.xlu1 %890 }
 0x167   : > { %v896_v23 = vsel %vm512_vm2, %v891_v22, 0 }
 0x168   : > { %905 = vmatpush.bf16.msra.mxu2 %v896_v23 }
 0x1a4   : > { %v588_v25 = vpop.f32.mrf.mxu1 }
 0x1a5   : > { %v766_v26 = vsel %vm765_vm7, %v588_v25, -inf }
 0x1a6   : > { %767 = vmax.xlane.f32.xlu1 %v766_v26 }
 0x1ac   : > { %v590_v27 = vpop.f32.mrf.mxu1 }
 0x1b2   : > { %v613_v28 = vpop.f32.mrf.mxu2 }
 0x1b3   : > { %v769_v29 = vsel %vm765_vm7, %v613_v28, -inf }
 0x1b4   : > { %770 = vmax.xlane.f32.xlu2 %v769_v29 }
 0x1ba   : > { %v615_v30 = vpop.f32.mrf.mxu2  ;;  %v638_v32 = vpop.f32.mrf.mxu3 }
 0x1bb   : > { %v772_v33 = vsel %vm765_vm7, %v638_v32, -inf }
 0x1bc   : > { %v663_v35 = vpop.f32.mrf.mxu0  ;;  %773 = vmax.xlane.f32.xlu0 %v772_v33 }
 0x1bd   : > { %v775_v36 = vsel %vm765_vm7, %v663_v35, -inf }
 0x1be   : > { %776 = vmax.xlane.f32.xlu2 %v775_v36 }
 0x1bf   : > { %938 = vrot.lane.b32.xlu1 %v6537_v53, %s6324_s30 }
 0x1c2   : > { %v640_v37 = vpop.f32.mrf.mxu3  ;;  %v711_v39 = vpop.f32.mrf.mxu2 }
 0x1c3   : > { %v781_v43 = vsel %vm765_vm7, %v711_v39, -inf }
 0x1c4   : > { %v665_v40 = vpop.f32.mrf.mxu0  ;;  %v6610_v42 = vpop.f32.mrf.mxu1 }
 0x1c5   : > { %v778_v57 = vsel %vm765_vm7, %v6610_v42, -inf }
 0x1c6   : > { %782 = vmax.xlane.f32.xlu2 %v781_v43 }
 0x1ca   : > { %v713_v45 = vpop.f32.mrf.mxu2  ;;  %v736_v46 = vpop.f32.mrf.mxu3 }
 0x1cb   : > { %v784_v48 = vsel %vm765_vm7, %v736_v46, -inf }
 0x1cc   : > { %785 = vmax.xlane.f32.xlu0 %v784_v48  ;;  %v688_v49 = vpop.f32.mrf.mxu1 }
 0x1d2   : > { %v738_v50 = vpop.f32.mrf.mxu3 }
 0x1dc   : > { %v761_v51 = vpop.f32.mrf.mxu0 }
 0x1dd   : > { %v787_v52 = vsel %vm765_vm7, %v761_v51, -inf }
 0x1de   : > { %788 = vmax.xlane.f32.xlu2 %v787_v52 }
 0x1e4   : > { %v763_v53 = vpop.f32.mrf.mxu0 }
 0x1e5   : > { %v1032_v53 = vld [vmem:[#allocation1] sm:$0xff] }
 0x1e9   : > { %779 = vmax.xlane.f32.xlu1 %v778_v57 }
 0x1f6   : > { %986 = vrot.lane.b32.xlu2 %v6543_v55, %s6324_s30 }
 0x219   : > { %v768_v58 = vpop.xlane.xlu1 %767 }
 0x21a   : > { %v790_v59 = vsub.f32 %v588_v25, %v768_v58 }
 0x21c   : > { %v798_v61 = vmul.f32 1.442695, %v790_v59 }
 0x21e   : > { %6127 = vpow2.f32 %v798_v61 }
 0x224   : > { %v6619_v63 = vpop.eup %6127 }
 0x225   : > { %v814_v0 = vsel %vm765_vm7, %v6619_v63, 0.0 }
 0x226   : > { %815 = vadd.xlane.f32.xlu2 %v814_v0 }
 0x227   : > { %v771_v1 = vpop.xlane.xlu2 %770 }
 0x228   : > { %v791_v2 = vsub.f32 %v613_v28, %v771_v1 }
 0x22a   : > { %v800_v4 = vmul.f32 1.442695, %v791_v2 }
 0x22c   : > { %6129 = vpow2.f32 %v800_v4 }
 0x22f   : > { %v774_v5 = vpop.xlane.xlu0 %773 }
 0x230   : > { %v792_v6 = vsub.f32 %v638_v32, %v774_v5 }
 0x231   : > { %v777_v7 = vpop.xlane.xlu2 %776  ;;  %v939_v10 = vpop.permute.xlu1 %938 }
 0x232   : > { %v6130_v11 = vpop.eup %6129  ;;  %v802_v55 = vmul.f32 1.442695, %v792_v6  ;;  %v793_v15 = vsub.f32 %v663_v35, %v777_v7  ;;  %v944_v16 = vsel %vm512_vm2, %v939_v10, 0 }
 0x233   : > { %953 = vmatpush.bf16.msrb.mxu0 %v944_v16  ;;  %v817_v17 = vsel %vm765_vm7, %v6130_v11, 0.0 }
 0x234   : > { %6131 = vpow2.f32 %v802_v55  ;;  %v804_v18 = vmul.f32 1.442695, %v793_v15  ;;  %818 = vadd.xlane.f32.xlu0 %v817_v17 }
 0x236   : > { %6133 = vpow2.f32 %v804_v18 }
 0x239   : > { %v783_v20 = vpop.xlane.xlu2 %782 }
 0x23a   : > { %v6132_v21 = vpop.eup %6131  ;;  %v795_v22 = vsub.f32 %v711_v39, %v783_v20 }
 0x23b   : > { %v820_v23 = vsel %vm765_vm7, %v6132_v21, 0.0 }
 0x23c   : > { %v6134_v25 = vpop.eup %6133  ;;  %v808_v26 = vmul.f32 1.442695, %v795_v22  ;;  %821 = vadd.xlane.f32.xlu1 %v820_v23 }
 0x23d   : > { %v823_v27 = vsel %vm765_vm7, %v6134_v25, 0.0 }
 0x23e   : > { %6135 = vpow2.f32 %v808_v26  ;;  %824 = vadd.xlane.f32.xlu0 %v823_v27 }
 0x23f   : > { %v786_v28 = vpop.xlane.xlu0 %785 }
 0x240   : > { %v796_v29 = vsub.f32 %v736_v46, %v786_v28 }
 0x242   : > { %v810_v30 = vmul.f32 1.442695, %v796_v29 }
 0x244   : > { %v6136_v32 = vpop.eup %6135  ;;  %6137 = vpow2.f32 %v810_v30 }
 0x245   : > { %v829_v33 = vsel %vm765_vm7, %v6136_v32, 0.0 }
 0x246   : > { %830 = vadd.xlane.f32.xlu0 %v829_v33 }
 0x24a   : > { %v6628_v35 = vpop.eup %6137 }
 0x24b   : > { %v832_v36 = vsel %vm765_vm7, %v6628_v35, 0.0 }
 0x24c   : > { %833 = vadd.xlane.f32.xlu2 %v832_v36 }
 0x251   : > { %v789_v37 = vpop.xlane.xlu2 %788 }
 0x252   : > { %v797_v39 = vsub.f32 %v761_v51, %v789_v37 }
 0x254   : > { %v812_v40 = vmul.f32 1.442695, %v797_v39 }
 0x256   : > { %6139 = vpow2.f32 %v812_v40 }
 0x259   : > { %v987_v43 = vpop.permute.xlu2 %986 }
 0x25a   : > { %v992_v45 = vsel %vm512_vm2, %v987_v43, 0 }
 0x25b   : > { %1001 = vmatpush.bf16.msrb.mxu2 %v992_v45 }
 0x25c   : > { %v6140_v46 = vpop.eup %6139  ;;  %v780_v48 = vpop.xlane.xlu1 %779 }
 0x25d   : > { %v794_v49 = vsub.f32 %v6610_v42, %v780_v48  ;;  %v835_v50 = vsel %vm765_vm7, %v6140_v46, 0.0 }
 0x25e   : > { %836 = vadd.xlane.f32.xlu0 %v835_v50 }
 0x25f   : > { %v806_v52 = vmul.f32 1.442695, %v794_v49 }
 0x261   : > { %6141 = vpow2.f32 %v806_v52 }
 0x264   : > { %1034 = vrot.lane.b32.xlu2 %v1032_v53, %s6324_s30 }
 0x267   : > { %v6142_v57 = vpop.eup %6141 }
 0x268   : > { %v826_v51 = vsel %vm765_vm7, %v6142_v57, 0.0 }
 0x269   : > { %827 = vadd.xlane.f32.xlu1 %v826_v51 }
 0x272   : > { %962 = vrot.lane.b32.xlu0 %v6540_v54, %s6324_s30 }
 0x282   : > { %1010 = vrot.lane.b32.xlu1 %v6546_v56, %s6324_s30  ;;  %s6335_s30 = smov 16  }
 0x299   : > { %v816_v58 = vpop.xlane.xlu2 %815 }
 0x29a   : > { %6143 = vrcp.f32 %v816_v58 }
 0x2a0   : > { %v6144_v42 = vpop.eup %6143 }
 0x2a1   : > { %v846_v59 = vmul.f32 %v6144_v42, %v6619_v63 }
 0x2a3   : > { %v854_v61 = vpack.c.bf16 %v846_v59, %v846_v59 }
 0x2a5   : > { %4933 = vmatmul.msk.bf16.vlgmr.msra.gmra.mxu1 %vm867_vm8, %v854_v61 }
 0x2a7   : > { %v819_v0 = vpop.xlane.xlu0 %818 }
 0x2a8   : > { %6145 = vrcp.f32 %v819_v0 }
 0x2ae   : > { %v6146_v1 = vpop.eup %6145 }
 0x2af   : > { %v847_v2 = vmul.f32 %v6146_v1, %v6130_v11  ;;  %v822_v4 = vpop.xlane.xlu1 %821 }
 0x2b0   : > { %6147 = vrcp.f32 %v822_v4 }
 0x2b1   : > { %v855_v5 = vpack.c.bf16 %v847_v2, %v847_v2  ;;  %v825_v54 = vpop.xlane.xlu0 %824 }
 0x2b2   : > { %6149 = vrcp.f32 %v825_v54 }
 0x2b3   : > { %4934 = vmatmul.msk.bf16.vlgmr.msra.gmra.mxu2 %vm867_vm8, %v855_v5 }
 0x2b6   : > { %v6148_v56 = vpop.eup %6147 }
 0x2b7   : > { %v848_v6 = vmul.f32 %v6148_v56, %v6132_v21 }
 0x2b8   : > { %v6150_v7 = vpop.eup %6149 }
 0x2b9   : > { %v856_v10 = vpack.c.bf16 %v848_v6, %v848_v6  ;;  %v849_v63 = vmul.f32 %v6150_v7, %v6134_v25  ;;  %v831_v55 = vpop.xlane.xlu0 %830 }
 0x2ba   : > { %6151 = vrcp.f32 %v831_v55 }
 0x2bb   : > { %v857_v15 = vpack.c.bf16 %v849_v63, %v849_v63  ;;  %4935 = vmatmul.msk.bf16.vlgmr.msra.gmra.mxu3 %vm867_vm8, %v856_v10 }
 0x2bd   : > { %4936 = vmatmul.msk.bf16.vlgmr.msrb.gmra.mxu0 %vm867_vm8, %v857_v15 }
 0x2bf   : > { %v834_v11 = vpop.xlane.xlu2 %833 }
 0x2c0   : > { %v6152_v16 = vpop.eup %6151 }
 0x2c1   : > { %v851_v17 = vmul.f32 %v6152_v16, %v6136_v32 }
 0x2c3   : > { %v859_v18 = vpack.c.bf16 %v851_v17, %v851_v17 }
 0x2c5   : > { %4938 = vmatmul.msk.bf16.vlgmr.msrb.gmra.mxu2 %vm867_vm8, %v859_v18 }
 0x2c7   : > { %v1035_v20 = vpop.permute.xlu2 %1034 }
 0x2c8   : > { %v1040_v22 = vsel %vm512_vm2, %v1035_v20, 0 }
 0x2c9   : > { %1049 = vmatpush.bf16.msra.mxu0 %v1040_v22 }
 0x2d1   : > { %v837_v21 = vpop.xlane.xlu0 %836 }
 0x2d2   : > { %6153 = vrcp.f32 %v837_v21 }
 0x2d8   : > { %v6154_v23 = vpop.eup %6153 }
 0x2d9   : > { %v853_v25 = vmul.f32 %v6154_v23, %v6140_v46 }
 0x2db   : > { %v861_v26 = vpack.c.bf16 %v853_v25, %v853_v25 }
 0x2dc   : > { %v828_v27 = vpop.xlane.xlu1 %827 }
 0x2dd   : > { %6155 = vrcp.f32 %v828_v27  ;;  %4940 = vmatmul.msk.bf16.vlgmr.msra.gmra.mxu0 %vm867_vm8, %v861_v26 }
 0x2de   : > { %6157 = vrcp.f32 %v834_v11 }
 0x2e3   : > { %v6156_v28 = vpop.eup %6155 }
 0x2e4   : > { %v850_v29 = vmul.f32 %v6156_v28, %v6142_v57  ;;  %v963_v30 = vpop.permute.xlu0 %962  ;;  %v6158_v36 = vpop.eup %6157 }
 0x2e5   : > { %v968_v32 = vsel %vm512_vm2, %v963_v30, 0  ;;  %v852_v37 = vmul.f32 %v6158_v36, %v6628_v35 }
 0x2e6   : > { %v858_v33 = vpack.c.bf16 %v850_v29, %v850_v29  ;;  %977 = vmatpush.bf16.msrb.mxu1 %v968_v32 }
 0x2e7   : > { %v860_v43 = vpack.c.bf16 %v852_v37, %v852_v37 }
 0x2e9   : > { %4937 = vmatmul.msk.bf16.vlgmr.msrb.gmra.mxu1 %vm867_vm8, %v858_v33 }
 0x2f4   : > { %v1011_v39 = vpop.permute.xlu1 %1010 }
 0x2f5   : > { %v1016_v40 = vsel %vm512_vm2, %v1011_v39, 0 }
 0x2f6   : > { %1025 = vmatpush.bf16.msrb.mxu3 %v1016_v40 }
 0x2f9   : > { %4939 = vmatmul.msk.bf16.vlgmr.msrb.gmra.mxu3 %vm867_vm8, %v860_v43 }
 0x322   : > { %v883_v45 = vpop.f32.mrf.mxu1 }
 0x323   : > { %1063 = vst [vmem:[#allocation1] ss:$4 sm:$0xff] %v883_v45 }
 0x32a   : > { %v885_v46 = vpop.f32.mrf.mxu1 }
 0x336   : > { %v907_v48 = vpop.f32.mrf.mxu2 }
 0x337   : > { %1065 = vst [vmem:[#allocation1 + $0x1] ss:$4 sm:$0xff] %v907_v48 }
 0x33a   : > { %v955_v49 = vpop.f32.mrf.mxu0 }
 0x33b   : > { %1069 = vst [vmem:[#allocation1 + $0x3] ss:$4 sm:$0xff] %v955_v49 }
 0x33e   : > { %v909_v50 = vpop.f32.mrf.mxu2  ;;  %v931_v52 = vpop.f32.mrf.mxu3 }
 0x33f   : > { %1067 = vst [vmem:[#allocation1 + $0x2] ss:$4 sm:$0xff] %v931_v52 }
 0x342   : > { %v957_v53 = vpop.f32.mrf.mxu0 }
 0x346   : > { %v933_v57 = vpop.f32.mrf.mxu3  ;;  %v6654_v1 = vld.sshfl [vmem:[#allocation1] sm:$0xff pattern:$0x73625140] }
 0x348   : > { %v1003_v35 = vpop.f32.mrf.mxu2 }
 0x349   : > { %1073 = vst [vmem:[#allocation1 + $0x21] ss:$4 sm:$0xff] %v1003_v35 }
 0x350   : > { %v1005_v51 = vpop.f32.mrf.mxu2 }
 0x35a   : > { %v1051_v58 = vpop.f32.mrf.mxu0 }
 0x35b   : > { %1077 = vst [vmem:[#allocation1 + $0x23] ss:$4 sm:$0xff] %v1051_v58 }
 0x362   : > { %v1053_v42 = vpop.f32.mrf.mxu0 }
 0x366   : > { %v979_v59 = vpop.f32.mrf.mxu1 }
 0x367   : > { %1071 = vst [vmem:[#allocation1 + $0x20] ss:$4 sm:$0xff] %v979_v59 }
 0x36e   : > { %v981_v61 = vpop.f32.mrf.mxu1 }
 0x37c   : > { %v1027_v0 = vpop.f32.mrf.mxu3 }
 0x37d   : > { %1075 = vst [vmem:[#allocation1 + $0x22] ss:$4 sm:$0xff] %v1027_v0 }
 0x384   : > { %v6656_v2 = vld.sshfl [vmem:[#allocation1 + $0x20] sm:$0xff pattern:$0x73625140]  ;;  %v1029_v4 = vpop.f32.mrf.mxu3 }
 0x385   : > { %1084 = vst [vmem:[#allocation1] ss:$9 sm:$0xff] %v6553_v60 }
 0x38c   : > { %v1085_v5 = vld [vmem:[#allocation1] sm:$0xff] }
 0x38d   : > { %1089 = vst [vmem:[#allocation1] ss:$9 sm:$0xff] %v6453_v14 }
 0x394   : > { %v1090_v54 = vld [vmem:[#allocation1] sm:$0xff] }
 0x395   : > { %1113 = vst [vmem:[#allocation1] ss:$9 sm:$0xff] %v6559_v62 }
 0x39c   : > { %v1114_v56 = vld [vmem:[#allocation1] sm:$0xff] }
 0x39d   : > { %1118 = vst [vmem:[#allocation1] ss:$9 sm:$0xff] %v6477_v24  ;;  %1116 = vrot.lane.b32.xlu2 %v1114_v56, %s6325_s14 }
 0x3a4   : > { %v1119_v6 = vld [vmem:[#allocation1] sm:$0xff] }
 0x3a5   : > { %1142 = vst [vmem:[#allocation1] ss:$9 sm:$0xff] %v6566_v3  ;;  %1121 = vrot.lane.b32.xlu0 %v1119_v6, %s6326_s15 }
 0x3ac   : > { %v1143_v7 = vld [vmem:[#allocation1] sm:$0xff] }
 0x3ad   : > { %1147 = vst [vmem:[#allocation1] ss:$9 sm:$0xff] %v6500_v31  ;;  %1145 = vrot.lane.b32.xlu0 %v1143_v7, %s6325_s14 }
 0x3b4   : > { %v1148_v10 = vld [vmem:[#allocation1] sm:$0xff] }
 0x3b5   : > { %1171 = vst [vmem:[#allocation1] ss:$9 sm:$0xff] %v6573_v8  ;;  %1150 = vrot.lane.b32.xlu1 %v1148_v10, %s6326_s15 }
 0x3bc   : > { %v1172_v63 = vld [vmem:[#allocation1] sm:$0xff] }
 0x3bd   : > { %1176 = vst [vmem:[#allocation1] ss:$9 sm:$0xff] %v6505_v34  ;;  %1092 = vrot.lane.b32.xlu1 %v1090_v54, %s6326_s15 }
 0x3c4   : > { %v1177_v55 = vld [vmem:[#allocation1] sm:$0xff] }
 0x3c5   : > { %1200 = vst [vmem:[#allocation1] ss:$9 sm:$0xff] %v6589_v13  ;;  %1179 = vrot.lane.b32.xlu2 %v1177_v55, %s6326_s15 }
 0x3cc   : > { %v1201_v15 = vld [vmem:[#allocation1] sm:$0xff] }
 0x3cd   : > { %1205 = vst [vmem:[#allocation1] ss:$9 sm:$0xff] %v6510_v38  ;;  %1087 = vrot.lane.b32.xlu2 %v1085_v5, %s6325_s14 }
 0x3d4   : > { %v1206_v11 = vld [vmem:[#allocation1] sm:$0xff] }
 0x3d5   : > { %1229 = vst [vmem:[#allocation1] ss:$9 sm:$0xff] %v6576_v9 }
 0x3dc   : > { %v1230_v16 = vld [vmem:[#allocation1] sm:$0xff] }
 0x3dd   : > { %1234 = vst [vmem:[#allocation1] ss:$9 sm:$0xff] %v6515_v41 }
 0x3e4   : > { %v1235_v17 = vld [vmem:[#allocation1] sm:$0xff] }
 0x3e5   : > { %1237 = vrot.lane.b32.xlu0 %v1235_v17, %s6326_s15  ;;  %1258 = vst [vmem:[#allocation1] ss:$9 sm:$0xff] %v6584_v12 }
 0x3ec   : > { %v1259_v18 = vld [vmem:[#allocation1] sm:$0xff] }
 0x3ed   : > { %1174 = vrot.lane.b32.xlu0 %v1172_v63, %s6325_s14  ;;  %1261 = vrot.lane.b32.xlu2 %v1259_v18, %s6325_s14  ;;  %1263 = vst [vmem:[#allocation1] ss:$9 sm:$0xff] %v6520_v44 }
 0x3f4   : > { %v1264_v20 = vld [vmem:[#allocation1] sm:$0xff] }
 0x3f5   : > { %1208 = vrot.lane.b32.xlu0 %v1206_v11, %s6326_s15  ;;  %1203 = vrot.lane.b32.xlu2 %v1201_v15, %s6325_s14  ;;  %1287 = vst [vmem:[#allocation1] ss:$9 sm:$0xff] %v6598_v19 }
 0x3f6   : > { %1266 = vrot.lane.b32.xlu1 %v1264_v20, %s6326_s15 }
 0x3f7   : > { %v1117_v26 = vpop.permute.xlu2 %1116 }
 0x3fc   : > { %v1288_v22 = vld [vmem:[#allocation1] sm:$0xff] }
 0x3fd   : > { %1290 = vrot.lane.b32.xlu0 %v1288_v22, %s6325_s14  ;;  %1292 = vst [vmem:[#allocation1] ss:$9 sm:$0xff] %v6525_v47 }
 0x3fe   : > { %1232 = vrot.lane.b32.xlu1 %v1230_v16, %s6325_s14  ;;  %s4715_s14 = scalar_lea.vmem %s7473_s10, %s6313_s25 }
 0x404   : > { %v1293_v21 = vld [vmem:[#allocation1] sm:$0xff] }
 0x405   : > { %1412 = vst [vmem:[#allocation1] ss:$9 sm:$0xff] %v6453_v14 }
 0x406   : > { %1295 = vrot.lane.b32.xlu1 %v1293_v21, %s6326_s15 }
 0x40c   : > { %v1413_v23 = vld [vmem:[#allocation1] sm:$0xff] }
 0x40d   : > { %1415 = vrot.lane.b32.xlu0 %v1413_v23, %s6327_s16  ;;  %1436 = vst [vmem:[#allocation1] ss:$9 sm:$0xff] %v6477_v24 }
 0x414   : > { %v1437_v25 = vld [vmem:[#allocation1] sm:$0xff] }
 0x415   : > { %1439 = vrot.lane.b32.xlu1 %v1437_v25, %s6327_s16  ;;  %1460 = vst [vmem:[#allocation1] ss:$9 sm:$0xff] %v6500_v31 }
 0x417   : > { %v1122_v27 = vpop.permute.xlu0 %1121 }
 0x418   : > { %v1127_v28 = vsel %vm573_vm6, %v1122_v27, 0 }
 0x419   : > { %1136 = vmatpush.bf16.xpose.msra.mxu2 %v1127_v28 }
 0x41c   : > { %v1461_v29 = vld [vmem:[#allocation1] sm:$0xff] }
 0x41d   : > { %1463 = vrot.lane.b32.xlu2 %v1461_v29, %s6327_s16  ;;  %1484 = vst [vmem:[#allocation1] ss:$9 sm:$0xff] %v6505_v34 }
 0x41f   : > { %v1180_v30 = vpop.permute.xlu2 %1179  ;;  %v1146_v40 = vpop.permute.xlu0 %1145 }
 0x420   : > { %v1185_v32 = vsel %vm573_vm6, %v1180_v30, 0  ;;  %4942 = vmatmul.msk.bf16.vlgmr.msra.gmra.mxu2 %vm573_vm6, %v1117_v26 }
 0x421   : > { %1194 = vmatpush.bf16.xpose.msrb.mxu0 %v1185_v32 }
 0x424   : > { %v6700_v33 = vld [vmem:[#allocation1] sm:$0xff] }
 0x425   : > { %1508 = vst [vmem:[#allocation1] ss:$9 sm:$0xff] %v6510_v38 }
 0x427   : > { %v1151_v36 = vpop.permute.xlu1 %1150  ;;  %v1088_v48 = vpop.permute.xlu2 %1087 }
 0x428   : > { %v1156_v37 = vsel %vm573_vm6, %v1151_v36, 0 }
 0x429   : > { %1165 = vmatpush.bf16.xpose.msra.mxu3 %v1156_v37 }
 0x42c   : > { %v6704_v39 = vld [vmem:[#allocation1] sm:$0xff] }
 0x42d   : > { %1532 = vst [vmem:[#allocation1] ss:$9 sm:$0xff] %v6515_v41 }
 0x42f   : > { %v1093_v43 = vpop.permute.xlu1 %1092 }
 0x430   : > { %v1098_v45 = vsel %vm573_vm6, %v1093_v43, 0  ;;  %4943 = vmatmul.msk.bf16.vlgmr.msra.gmra.mxu3 %vm573_vm6, %v1146_v40 }
 0x431   : > { %1107 = vmatpush.bf16.xpose.msra.mxu1 %v1098_v45 }
 0x434   : > { %v6709_v46 = vld [vmem:[#allocation1] sm:$0xff] }
 0x435   : > { %1556 = vst [vmem:[#allocation1] ss:$9 sm:$0xff] %v6520_v44 }
 0x438   : > { %4941 = vmatmul.msk.bf16.vlgmr.msra.gmra.mxu1 %vm573_vm6, %v1088_v48 }
 0x43c   : > { %v6713_v49 = vld [vmem:[#allocation1] sm:$0xff] }
 0x43d   : > { %1580 = vst [vmem:[#allocation1] ss:$9 sm:$0xff] %v6525_v47 }
 0x447   : > { %v1262_v57 = vpop.permute.xlu2 %1261 }
 0x44f   : > { %v1204_v59 = vpop.permute.xlu2 %1203 }
 0x457   : > { %v1238_v50 = vpop.permute.xlu0 %1237 }
 0x458   : > { %v1243_v52 = vsel %vm573_vm6, %v1238_v50, 0 }
 0x459   : > { %1252 = vmatpush.bf16.xpose.msrb.mxu2 %v1243_v52 }
 0x45f   : > { %v1175_v53 = vpop.permute.xlu0 %1174 }
 0x460   : > { %4944 = vmatmul.msk.bf16.vlgmr.msrb.gmra.mxu0 %vm573_vm6, %v1175_v53 }
 0x467   : > { %v1209_v35 = vpop.permute.xlu0 %1208 }
 0x468   : > { %v1214_v51 = vsel %vm573_vm6, %v1209_v35, 0  ;;  %v1267_v58 = vpop.permute.xlu1 %1266 }
 0x469   : > { %v1272_v42 = vsel %vm573_vm6, %v1267_v58, 0  ;;  %1223 = vmatpush.bf16.xpose.msrb.mxu1 %v1214_v51 }
 0x46a   : > { %1281 = vmatpush.bf16.xpose.msrb.mxu3 %v1272_v42 }
 0x46f   : > { %v1291_v0 = vpop.permute.xlu0 %1290 }
 0x470   : > { %v1233_v61 = vpop.permute.xlu1 %1232  ;;  %4945 = vmatmul.msk.bf16.vlgmr.msrb.gmra.mxu1 %vm573_vm6, %v1204_v59 }
 0x471   : > { %4946 = vmatmul.msk.bf16.vlgmr.msrb.gmra.mxu2 %vm573_vm6, %v1233_v61  ;;  %4947 = vmatmul.msk.bf16.vlgmr.msrb.gmra.mxu3 %vm573_vm6, %v1262_v57 }
 0x477   : > { %v1464_v4 = vpop.permute.xlu2 %1463 }
 0x478   : > { %v1296_v5 = vpop.permute.xlu1 %1295  ;;  %v1469_v54 = vsel %vm512_vm2, %v1464_v4, 0 }
 0x479   : > { %v1301_v56 = vsel %vm573_vm6, %v1296_v5, 0  ;;  %1478 = vmatpush.bf16.msra.mxu3 %v1469_v54 }
 0x47a   : > { %1310 = vmatpush.bf16.xpose.msra.mxu0 %v1301_v56 }
 0x47f   : > { %v1416_v6 = vpop.permute.xlu0 %1415 }
 0x480   : > { %v1421_v7 = vsel %vm512_vm2, %v1416_v6, 0 }
 0x481   : > { %4948 = vmatmul.msk.bf16.vlgmr.msra.gmra.mxu0 %vm573_vm6, %v1291_v0  ;;  %1430 = vmatpush.bf16.msra.mxu1 %v1421_v7 }
 0x487   : > { %v1440_v10 = vpop.permute.xlu1 %1439 }
 0x488   : > { %v1445_v63 = vsel %vm512_vm2, %v1440_v10, 0 }
 0x489   : > { %1454 = vmatpush.bf16.msra.mxu2 %v1445_v63 }
 0x4a3   : > { %v1138_v55 = vpop.f32.mrf.mxu2 }
 0x4a4   : > { %v1319_v15 = vsel %vm765_vm7, %v1138_v55, -inf }
 0x4a5   : > { %1320 = vmax.xlane.f32.xlu1 %v1319_v15 }
 0x4ab   : > { %v1140_v11 = vpop.f32.mrf.mxu2 }
 0x4b3   : > { %v1167_v16 = vpop.f32.mrf.mxu3 }
 0x4b4   : > { %v1322_v17 = vsel %vm765_vm7, %v1167_v16, -inf }
 0x4b5   : > { %1323 = vmax.xlane.f32.xlu2 %v1322_v17  ;;  %v1109_v18 = vpop.f32.mrf.mxu1 }
 0x4b6   : > { %v1316_v20 = vsel %vm765_vm7, %v1109_v18, -inf }
 0x4b7   : > { %1317 = vmax.xlane.f32.xlu0 %v1316_v20 }
 0x4bb   : > { %v1169_v22 = vpop.f32.mrf.mxu3 }
 0x4bd   : > { %v1111_v21 = vpop.f32.mrf.mxu1 }
 0x4dd   : > { %v1196_v23 = vpop.f32.mrf.mxu0 }
 0x4de   : > { %v1325_v25 = vsel %vm765_vm7, %v1196_v23, -inf }
 0x4df   : > { %1326 = vmax.xlane.f32.xlu1 %v1325_v25 }
 0x4e5   : > { %v1198_v26 = vpop.f32.mrf.mxu0 }
 0x4ed   : > { %v6732_v27 = vpop.f32.mrf.mxu1 }
 0x4ee   : > { %v1328_v57 = vsel %vm765_vm7, %v6732_v27, -inf }
 0x4f4   : > { %v1254_v28 = vpop.f32.mrf.mxu2  ;;  %v1283_v29 = vpop.f32.mrf.mxu3 }
 0x4f5   : > { %v1331_v30 = vsel %vm765_vm7, %v1254_v28, -inf  ;;  %v1334_v32 = vsel %vm765_vm7, %v1283_v29, -inf  ;;  %v1227_v36 = vpop.f32.mrf.mxu1 }
 0x4f6   : > { %1332 = vmax.xlane.f32.xlu2 %v1331_v30  ;;  %1335 = vmax.xlane.f32.xlu0 %v1334_v32 }
 0x4f8   : > { %1487 = vrot.lane.b32.xlu1 %v6700_v33, %s6327_s16 }
 0x4fc   : > { %v1256_v37 = vpop.f32.mrf.mxu2  ;;  %v1285_v40 = vpop.f32.mrf.mxu3 }
 0x4fe   : > { %v1312_v43 = vpop.f32.mrf.mxu0 }
 0x4ff   : > { %v1337_v45 = vsel %vm765_vm7, %v1312_v43, -inf }
 0x500   : > { %1338 = vmax.xlane.f32.xlu2 %v1337_v45 }
 0x506   : > { %v1314_v48 = vpop.f32.mrf.mxu0 }
 0x518   : > { %1535 = vrot.lane.b32.xlu2 %v6709_v46, %s6327_s16  ;;  %v1321_v50 = vpop.xlane.xlu1 %1320 }
 0x519   : > { %v1341_v52 = vsub.f32 %v1138_v55, %v1321_v50 }
 0x51b   : > { %v1350_v53 = vmul.f32 1.442695, %v1341_v52 }
 0x51d   : > { %6159 = vpow2.f32 %v1350_v53 }
 0x522   : > { %1329 = vmax.xlane.f32.xlu1 %v1328_v57 }
 0x523   : > { %v6160_v35 = vpop.eup %6159 }
 0x524   : > { %v1367_v33 = vsel %vm765_vm7, %v6160_v35, 0.0 }
 0x525   : > { %1368 = vadd.xlane.f32.xlu0 %v1367_v33 }
 0x528   : > { %v1324_v51 = vpop.xlane.xlu2 %1323 }
 0x529   : > { %v1342_v58 = vsub.f32 %v1167_v16, %v1324_v51 }
 0x52a   : > { %v1318_v59 = vpop.xlane.xlu0 %1317 }
 0x52b   : > { %v1352_v42 = vmul.f32 1.442695, %v1342_v58  ;;  %v1340_v61 = vsub.f32 %v1109_v18, %v1318_v59 }
 0x52d   : > { %6161 = vpow2.f32 %v1352_v42  ;;  %v1348_v46 = vmul.f32 1.442695, %v1340_v61 }
 0x52f   : > { %6163 = vpow2.f32 %v1348_v46 }
 0x533   : > { %v6162_v0 = vpop.eup %6161 }
 0x534   : > { %v1370_v4 = vsel %vm765_vm7, %v6162_v0, 0.0 }
 0x535   : > { %1371 = vadd.xlane.f32.xlu1 %v1370_v4  ;;  %v6745_v5 = vpop.eup %6163 }
 0x536   : > { %v1364_v54 = vsel %vm765_vm7, %v6745_v5, 0.0 }
 0x541   : > { %1365 = vadd.xlane.f32.xlu2 %v1364_v54 }
 0x552   : > { %v1327_v56 = vpop.xlane.xlu1 %1326 }
 0x553   : > { %v1343_v6 = vsub.f32 %v1196_v23, %v1327_v56 }
 0x555   : > { %v1354_v7 = vmul.f32 1.442695, %v1343_v6 }
 0x557   : > { %6165 = vpow2.f32 %v1354_v7 }
 0x55d   : > { %v6166_v10 = vpop.eup %6165 }
 0x55e   : > { %v1373_v63 = vsel %vm765_vm7, %v6166_v10, 0.0 }
 0x55f   : > { %1374 = vadd.xlane.f32.xlu0 %v1373_v63 }
 0x569   : > { %v1333_v55 = vpop.xlane.xlu2 %1332  ;;  %v1336_v15 = vpop.xlane.xlu0 %1335 }
 0x56a   : > { %v1345_v11 = vsub.f32 %v1254_v28, %v1333_v55  ;;  %v1346_v16 = vsub.f32 %v1283_v29, %v1336_v15  ;;  %v1488_v17 = vpop.permute.xlu1 %1487 }
 0x56b   : > { %v1493_v18 = vsel %vm512_vm2, %v1488_v17, 0 }
 0x56c   : > { %v1358_v20 = vmul.f32 1.442695, %v1345_v11  ;;  %v1360_v22 = vmul.f32 1.442695, %v1346_v16  ;;  %1502 = vmatpush.bf16.msrb.mxu0 %v1493_v18 }
 0x56e   : > { %6167 = vpow2.f32 %v1358_v20 }
 0x56f   : > { %6169 = vpow2.f32 %v1360_v22 }
 0x573   : > { %v1339_v21 = vpop.xlane.xlu2 %1338 }
 0x574   : > { %v6168_v23 = vpop.eup %6167  ;;  %v1347_v25 = vsub.f32 %v1312_v43, %v1339_v21  ;;  %v1581_v43 = vld [vmem:[#allocation1] sm:$0xff] }
 0x575   : > { %v6751_v26 = vpop.eup %6169  ;;  %v1379_v30 = vsel %vm765_vm7, %v6168_v23, 0.0 }
 0x576   : > { %v1362_v32 = vmul.f32 1.442695, %v1347_v25  ;;  %1380 = vadd.xlane.f32.xlu0 %v1379_v30  ;;  %v1382_v28 = vsel %vm765_vm7, %v6751_v26, 0.0 }
 0x577   : > { %1383 = vadd.xlane.f32.xlu2 %v1382_v28 }
 0x578   : > { %6171 = vpow2.f32 %v1362_v32 }
 0x57b   : > { %v1536_v29 = vpop.permute.xlu2 %1535 }
 0x57c   : > { %v1541_v36 = vsel %vm512_vm2, %v1536_v29, 0 }
 0x57d   : > { %1550 = vmatpush.bf16.msrb.mxu2 %v1541_v36 }
 0x57e   : > { %v6172_v37 = vpop.eup %6171 }
 0x57f   : > { %v1385_v40 = vsel %vm765_vm7, %v6172_v37, 0.0 }
 0x580   : > { %1386 = vadd.xlane.f32.xlu0 %v1385_v40 }
 0x58f   : > { %1583 = vrot.lane.b32.xlu2 %v1581_v43, %s6327_s16 }
 0x594   : > { %1511 = vrot.lane.b32.xlu0 %v6704_v39, %s6327_s16 }
 0x595   : > { %v1330_v45 = vpop.xlane.xlu1 %1329 }
 0x596   : > { %v1344_v48 = vsub.f32 %v6732_v27, %v1330_v45 }
 0x598   : > { %v1356_v50 = vmul.f32 1.442695, %v1344_v48  ;;  %v1369_v52 = vpop.xlane.xlu0 %1368 }
 0x599   : > { %6173 = vrcp.f32 %v1369_v52 }
 0x59a   : > { %6175 = vpow2.f32 %v1356_v50 }
 0x59f   : > { %v6174_v53 = vpop.eup %6173 }
 0x5a0   : > { %v6176_v57 = vpop.eup %6175  ;;  %v1397_v33 = vmul.f32 %v6174_v53, %v6160_v35 }
 0x5a1   : > { %v1376_v51 = vsel %vm765_vm7, %v6176_v57, 0.0 }
 0x5a2   : > { %v1405_v58 = vpack.c.bf16 %v1397_v33, %v1397_v33  ;;  %1377 = vadd.xlane.f32.xlu1 %v1376_v51 }
 0x5a4   : > { %4950 = vmatmul.msk.bf16.vlgmr.msra.gmra.mxu2 %vm867_vm8, %v1405_v58 }
 0x5a8   : > { %v1372_v42 = vpop.xlane.xlu1 %1371 }
 0x5a9   : > { %6177 = vrcp.f32 %v1372_v42 }
 0x5af   : > { %v6178_v59 = vpop.eup %6177 }
 0x5b0   : > { %v1398_v39 = vmul.f32 %v6178_v59, %v6162_v0 }
 0x5b2   : > { %v1406_v61 = vpack.c.bf16 %v1398_v39, %v1398_v39 }
 0x5b4   : > { %v1366_v46 = vpop.xlane.xlu2 %1365  ;;  %4951 = vmatmul.msk.bf16.vlgmr.msra.gmra.mxu3 %vm867_vm8, %v1406_v61 }
 0x5b5   : > { %6179 = vrcp.f32 %v1366_v46 }
 0x5bb   : > { %v6180_v27 = vpop.eup %6179  ;;  %1559 = vrot.lane.b32.xlu1 %v6713_v49, %s6327_s16  ;;  %s2767_s16 = scalar_lea.vmem %s7466_s3, %s6439_s17 }
 0x5bc   : > { %v1396_v35 = vmul.f32 %v6180_v27, %v6745_v5 }
 0x5be   : > { %v1404_v4 = vpack.c.bf16 %v1396_v35, %v1396_v35 }
 0x5c0   : > { %4949 = vmatmul.msk.bf16.vlgmr.msra.gmra.mxu1 %vm867_vm8, %v1404_v4 }
 0x5d2   : > { %v1375_v54 = vpop.xlane.xlu0 %1374 }
 0x5d3   : > { %6181 = vrcp.f32 %v1375_v54 }
 0x5d9   : > { %v6182_v56 = vpop.eup %6181 }
 0x5da   : > { %v1399_v6 = vmul.f32 %v6182_v56, %v6166_v10 }
 0x5dc   : > { %v1407_v7 = vpack.c.bf16 %v1399_v6, %v1399_v6 }
 0x5de   : > { %4952 = vmatmul.msk.bf16.vlgmr.msrb.gmra.mxu0 %vm867_vm8, %v1407_v7 }
 0x5e9   : > { %v1381_v0 = vpop.xlane.xlu0 %1380 }
 0x5ea   : > { %v1384_v63 = vpop.xlane.xlu2 %1383  ;;  %6183 = vrcp.f32 %v1381_v0 }
 0x5f0   : > { %v6184_v55 = vpop.eup %6183 }
 0x5f1   : > { %v1401_v15 = vmul.f32 %v6184_v55, %v6168_v23 }
 0x5f2   : > { %v1584_v11 = vpop.permute.xlu2 %1583 }
 0x5f3   : > { %v1409_v16 = vpack.c.bf16 %v1401_v15, %v1401_v15  ;;  %v1589_v49 = vsel %vm512_vm2, %v1584_v11, 0  ;;  %v1387_v5 = vpop.xlane.xlu0 %1386 }
 0x5f4   : > { %1598 = vmatpush.bf16.msra.mxu0 %v1589_v49  ;;  %6185 = vrcp.f32 %v1387_v5 }
 0x5f5   : > { %4954 = vmatmul.msk.bf16.vlgmr.msrb.gmra.mxu2 %vm867_vm8, %v1409_v16 }
 0x5fa   : > { %v6186_v17 = vpop.eup %6185 }
 0x5fb   : > { %v1403_v18 = vmul.f32 %v6186_v17, %v6172_v37 }
 0x5fd   : > { %v1411_v10 = vpack.c.bf16 %v1403_v18, %v1403_v18 }
 0x5ff   : > { %4956 = vmatmul.msk.bf16.vlgmr.msra.gmra.mxu0 %vm867_vm8, %v1411_v10 }
 0x606   : > { %v1512_v20 = vpop.permute.xlu0 %1511 }
 0x607   : > { %v1517_v22 = vsel %vm512_vm2, %v1512_v20, 0 }
 0x608   : > { %1526 = vmatpush.bf16.msrb.mxu1 %v1517_v22 }
 0x615   : > { %v1378_v21 = vpop.xlane.xlu1 %1377 }
 0x616   : > { %6187 = vrcp.f32 %v1378_v21 }
 0x617   : > { %6189 = vrcp.f32 %v1384_v63 }
 0x61c   : > { %v6188_v23 = vpop.eup %6187 }
 0x61d   : > { %v1400_v25 = vmul.f32 %v6188_v23, %v6176_v57  ;;  %v6190_v28 = vpop.eup %6189 }
 0x61e   : > { %v1402_v29 = vmul.f32 %v6190_v28, %v6751_v26 }
 0x61f   : > { %v1408_v30 = vpack.c.bf16 %v1400_v25, %v1400_v25 }
 0x620   : > { %v1410_v43 = vpack.c.bf16 %v1402_v29, %v1402_v29 }
 0x621   : > { %4953 = vmatmul.msk.bf16.vlgmr.msrb.gmra.mxu1 %vm867_vm8, %v1408_v30 }
 0x627   : > { %v1456_v32 = vpop.f32.mrf.mxu2 }
 0x628   : > { %1614 = vst [vmem:[#allocation1 + $0x1] ss:$4 sm:$0xff] %v1456_v32 }
 0x62d   : > { %v1560_v36 = vpop.permute.xlu1 %1559 }
 0x62e   : > { %v1565_v37 = vsel %vm512_vm2, %v1560_v36, 0 }
 0x62f   : > { %v1458_v40 = vpop.f32.mrf.mxu2  ;;  %1574 = vmatpush.bf16.msrb.mxu3 %v1565_v37 }
 0x632   : > { %4955 = vmatmul.msk.bf16.vlgmr.msrb.gmra.mxu3 %vm867_vm8, %v1410_v43 }
 0x637   : > { %v1480_v45 = vpop.f32.mrf.mxu3 }
 0x638   : > { %1616 = vst [vmem:[#allocation1 + $0x2] ss:$4 sm:$0xff] %v1480_v45 }
 0x63d   : > { %v1432_v48 = vpop.f32.mrf.mxu1 }
 0x63e   : > { %1612 = vst [vmem:[#allocation1] ss:$4 sm:$0xff] %v1432_v48 }
 0x63f   : > { %v1482_v50 = vpop.f32.mrf.mxu3 }
 0x645   : > { %v1434_v52 = vpop.f32.mrf.mxu1 }
 0x65b   : > { %v1504_v53 = vpop.f32.mrf.mxu0 }
 0x65c   : > { %1618 = vst [vmem:[#allocation1 + $0x3] ss:$4 sm:$0xff] %v1504_v53 }
 0x663   : > { %v1506_v57 = vpop.f32.mrf.mxu0  ;;  %v6778_v61 = vld.sshfl [vmem:[#allocation1] sm:$0xff pattern:$0x73625140] }
 0x678   : > { %v1552_v33 = vpop.f32.mrf.mxu2 }
 0x679   : > { %1622 = vst [vmem:[#allocation1 + $0x21] ss:$4 sm:$0xff] %v1552_v33 }
 0x67c   : > { %v1600_v26 = vpop.f32.mrf.mxu0 }
 0x67d   : > { %1626 = vst [vmem:[#allocation1 + $0x23] ss:$4 sm:$0xff] %v1600_v26 }
 0x680   : > { %v1554_v51 = vpop.f32.mrf.mxu2 }
 0x684   : > { %v1602_v58 = vpop.f32.mrf.mxu0 }
 0x69e   : > { %v1528_v42 = vpop.f32.mrf.mxu1 }
 0x69f   : > { %1620 = vst [vmem:[#allocation1 + $0x20] ss:$4 sm:$0xff] %v1528_v42 }
 0x6a6   : > { %v1530_v59 = vpop.f32.mrf.mxu1 }
 0x6b5   : > { %v1576_v39 = vpop.f32.mrf.mxu3 }
 0x6b6   : > { %1624 = vst [vmem:[#allocation1 + $0x22] ss:$4 sm:$0xff] %v1576_v39 }
 0x6bd   : > { %v6780_v46 = vld.sshfl [vmem:[#allocation1 + $0x20] sm:$0xff pattern:$0x73625140]  ;;  %v1578_v27 = vpop.f32.mrf.mxu3 }
 0x6be   : > { %1633 = vst [vmem:[#allocation1] ss:$9 sm:$0xff] %v6553_v60 }
 0x6c5   : > { %v1634_v35 = vld [vmem:[#allocation1] sm:$0xff] }
 0x6c6   : > { %1638 = vst [vmem:[#allocation1] ss:$9 sm:$0xff] %v6453_v14 }
 0x6cd   : > { %v1639_v4 = vld [vmem:[#allocation1] sm:$0xff] }
 0x6ce   : > { %1662 = vst [vmem:[#allocation1] ss:$9 sm:$0xff] %v6559_v62 }
 0x6d5   : > { %v1663_v54 = vld [vmem:[#allocation1] sm:$0xff] }
 0x6d6   : > { %1665 = vrot.lane.b32.xlu2 %v1663_v54, %s6328_s18  ;;  %1667 = vst [vmem:[#allocation1] ss:$9 sm:$0xff] %v6477_v24 }
 0x6dd   : > { %v1668_v56 = vld [vmem:[#allocation1] sm:$0xff] }
 0x6de   : > { %1670 = vrot.lane.b32.xlu0 %v1668_v56, %s6329_s19  ;;  %1691 = vst [vmem:[#allocation1] ss:$9 sm:$0xff] %v6566_v3 }
 0x6e5   : > { %v1692_v6 = vld [vmem:[#allocation1] sm:$0xff] }
 0x6e6   : > { %1694 = vrot.lane.b32.xlu0 %v1692_v6, %s6328_s18  ;;  %1696 = vst [vmem:[#allocation1] ss:$9 sm:$0xff] %v6500_v31 }
 0x6ed   : > { %v1697_v7 = vld [vmem:[#allocation1] sm:$0xff] }
 0x6ee   : > { %1699 = vrot.lane.b32.xlu1 %v1697_v7, %s6329_s19  ;;  %1720 = vst [vmem:[#allocation1] ss:$9 sm:$0xff] %v6573_v8 }
 0x6f5   : > { %v1721_v0 = vld [vmem:[#allocation1] sm:$0xff] }
 0x6f6   : > { %1641 = vrot.lane.b32.xlu1 %v1639_v4, %s6329_s19  ;;  %1725 = vst [vmem:[#allocation1] ss:$9 sm:$0xff] %v6505_v34 }
 0x6fd   : > { %v1726_v63 = vld [vmem:[#allocation1] sm:$0xff] }
 0x6fe   : > { %1728 = vrot.lane.b32.xlu2 %v1726_v63, %s6329_s19  ;;  %1749 = vst [vmem:[#allocation1] ss:$9 sm:$0xff] %v6589_v13 }
 0x705   : > { %v1750_v55 = vld [vmem:[#allocation1] sm:$0xff] }
 0x706   : > { %1636 = vrot.lane.b32.xlu2 %v1634_v35, %s6328_s18  ;;  %1754 = vst [vmem:[#allocation1] ss:$9 sm:$0xff] %v6510_v38 }
 0x70d   : > { %v1755_v15 = vld [vmem:[#allocation1] sm:$0xff] }
 0x70e   : > { %1778 = vst [vmem:[#allocation1] ss:$9 sm:$0xff] %v6576_v9 }
 0x715   : > { %v1779_v11 = vld [vmem:[#allocation1] sm:$0xff] }
 0x716   : > { %1783 = vst [vmem:[#allocation1] ss:$9 sm:$0xff] %v6515_v41 }
 0x71d   : > { %v1784_v16 = vld [vmem:[#allocation1] sm:$0xff] }
 0x71e   : > { %1786 = vrot.lane.b32.xlu0 %v1784_v16, %s6329_s19  ;;  %1807 = vst [vmem:[#allocation1] ss:$9 sm:$0xff] %v6584_v12 }
 0x725   : > { %v1808_v49 = vld [vmem:[#allocation1] sm:$0xff] }
 0x726   : > { %1723 = vrot.lane.b32.xlu0 %v1721_v0, %s6328_s18  ;;  %1810 = vrot.lane.b32.xlu2 %v1808_v49, %s6328_s18  ;;  %1812 = vst [vmem:[#allocation1] ss:$9 sm:$0xff] %v6520_v44 }
 0x72d   : > { %v1813_v5 = vld [vmem:[#allocation1] sm:$0xff] }
 0x72e   : > { %1757 = vrot.lane.b32.xlu0 %v1755_v15, %s6329_s19  ;;  %1752 = vrot.lane.b32.xlu2 %v1750_v55, %s6328_s18  ;;  %1836 = vst [vmem:[#allocation1] ss:$9 sm:$0xff] %v6598_v19 }
 0x72f   : > { %1815 = vrot.lane.b32.xlu1 %v1813_v5, %s6329_s19 }
 0x730   : > { %v1666_v22 = vpop.permute.xlu2 %1665 }
 0x735   : > { %v1837_v17 = vld [vmem:[#allocation1] sm:$0xff] }
 0x736   : > { %1839 = vrot.lane.b32.xlu0 %v1837_v17, %s6328_s18  ;;  %1841 = vst [vmem:[#allocation1] ss:$9 sm:$0xff] %v6525_v47 }
 0x737   : > { %1781 = vrot.lane.b32.xlu1 %v1779_v11, %s6328_s18  ;;  %s5905_s18 = sshll.u32 %s6313_s25, 8 }
 0x73d   : > { %v1842_v18 = vld [vmem:[#allocation1] sm:$0xff] }
 0x73e   : > { %1961 = vst [vmem:[#allocation1] ss:$9 sm:$0xff] %v6453_v14 }
 0x73f   : > { %1844 = vrot.lane.b32.xlu1 %v1842_v18, %s6329_s19  ;;  %s4724_s19 = scalar_lea.vmem %s7474_s11, %s6313_s25 }
 0x745   : > { %v1962_v10 = vld [vmem:[#allocation1] sm:$0xff] }
 0x746   : > { %1964 = vrot.lane.b32.xlu0 %v1962_v10, %s6330_s20  ;;  %1985 = vst [vmem:[#allocation1] ss:$9 sm:$0xff] %v6477_v24 }
 0x74d   : > { %v1986_v20 = vld [vmem:[#allocation1] sm:$0xff] }
 0x74e   : > { %1988 = vrot.lane.b32.xlu2 %v1986_v20, %s6330_s20  ;;  %2009 = vst [vmem:[#allocation1] ss:$9 sm:$0xff] %v6500_v31 }
 0x750   : > { %v1671_v21 = vpop.permute.xlu0 %1670 }
 0x751   : > { %v1676_v23 = vsel %vm573_vm6, %v1671_v21, 0 }
 0x752   : > { %1685 = vmatpush.bf16.xpose.msra.mxu2 %v1676_v23 }
 0x755   : > { %v2010_v25 = vld [vmem:[#allocation1] sm:$0xff] }
 0x756   : > { %2012 = vrot.lane.b32.xlu1 %v2010_v25, %s6330_s20  ;;  %2033 = vst [vmem:[#allocation1] ss:$9 sm:$0xff] %v6505_v34 }
 0x758   : > { %v1729_v30 = vpop.permute.xlu2 %1728  ;;  %v1695_v40 = vpop.permute.xlu0 %1694 }
 0x759   : > { %v1734_v32 = vsel %vm573_vm6, %v1729_v30, 0  ;;  %4958 = vmatmul.msk.bf16.vlgmr.msra.gmra.mxu2 %vm573_vm6, %v1666_v22 }
 0x75a   : > { %1743 = vmatpush.bf16.xpose.msrb.mxu0 %v1734_v32 }
 0x75d   : > { %v6824_v28 = vld [vmem:[#allocation1] sm:$0xff] }
 0x75e   : > { %2057 = vst [vmem:[#allocation1] ss:$9 sm:$0xff] %v6510_v38 }
 0x760   : > { %v1700_v29 = vpop.permute.xlu1 %1699  ;;  %v1637_v50 = vpop.permute.xlu2 %1636 }
 0x761   : > { %v1705_v36 = vsel %vm573_vm6, %v1700_v29, 0 }
 0x762   : > { %1714 = vmatpush.bf16.xpose.msra.mxu3 %v1705_v36 }
 0x765   : > { %v6828_v37 = vld [vmem:[#allocation1] sm:$0xff] }
 0x766   : > { %2081 = vst [vmem:[#allocation1] ss:$9 sm:$0xff] %v6515_v41 }
 0x768   : > { %v1642_v43 = vpop.permute.xlu1 %1641 }
 0x769   : > { %v1647_v45 = vsel %vm573_vm6, %v1642_v43, 0  ;;  %4959 = vmatmul.msk.bf16.vlgmr.msra.gmra.mxu3 %vm573_vm6, %v1695_v40 }
 0x76a   : > { %1656 = vmatpush.bf16.xpose.msra.mxu1 %v1647_v45 }
 0x76d   : > { %v6833_v48 = vld [vmem:[#allocation1] sm:$0xff] }
 0x76e   : > { %2105 = vst [vmem:[#allocation1] ss:$9 sm:$0xff] %v6520_v44 }
 0x771   : > { %4957 = vmatmul.msk.bf16.vlgmr.msra.gmra.mxu1 %vm573_vm6, %v1637_v50 }
 0x775   : > { %v6837_v52 = vld [vmem:[#allocation1] sm:$0xff] }
 0x776   : > { %2129 = vst [vmem:[#allocation1] ss:$9 sm:$0xff] %v6525_v47 }
 0x780   : > { %v1811_v33 = vpop.permute.xlu2 %1810 }
 0x788   : > { %v1753_v51 = vpop.permute.xlu2 %1752 }
 0x790   : > { %v1787_v53 = vpop.permute.xlu0 %1786 }
 0x791   : > { %v1792_v57 = vsel %vm573_vm6, %v1787_v53, 0 }
 0x792   : > { %1801 = vmatpush.bf16.xpose.msrb.mxu2 %v1792_v57 }
 0x798   : > { %v1724_v26 = vpop.permute.xlu0 %1723 }
 0x799   : > { %4960 = vmatmul.msk.bf16.vlgmr.msrb.gmra.mxu0 %vm573_vm6, %v1724_v26 }
 0x7a0   : > { %v1758_v58 = vpop.permute.xlu0 %1757 }
 0x7a1   : > { %v1763_v42 = vsel %vm573_vm6, %v1758_v58, 0  ;;  %v1816_v59 = vpop.permute.xlu1 %1815 }
 0x7a2   : > { %v1821_v39 = vsel %vm573_vm6, %v1816_v59, 0  ;;  %1772 = vmatpush.bf16.xpose.msrb.mxu1 %v1763_v42 }
 0x7a3   : > { %1830 = vmatpush.bf16.xpose.msrb.mxu3 %v1821_v39 }
 0x7a8   : > { %v1989_v27 = vpop.permute.xlu2 %1988  ;;  %v1840_v54 = vpop.permute.xlu0 %1839 }
 0x7a9   : > { %v1782_v35 = vpop.permute.xlu1 %1781  ;;  %v1994_v4 = vsel %vm512_vm2, %v1989_v27, 0  ;;  %4961 = vmatmul.msk.bf16.vlgmr.msrb.gmra.mxu1 %vm573_vm6, %v1753_v51 }
 0x7aa   : > { %4962 = vmatmul.msk.bf16.vlgmr.msrb.gmra.mxu2 %vm573_vm6, %v1782_v35  ;;  %4963 = vmatmul.msk.bf16.vlgmr.msrb.gmra.mxu3 %vm573_vm6, %v1811_v33 }
 0x7ab   : > { %2003 = vmatpush.bf16.msra.mxu2 %v1994_v4 }
 0x7b1   : > { %v1845_v56 = vpop.permute.xlu1 %1844 }
 0x7b2   : > { %v1850_v6 = vsel %vm573_vm6, %v1845_v56, 0 }
 0x7b3   : > { %1859 = vmatpush.bf16.xpose.msra.mxu0 %v1850_v6 }
 0x7b8   : > { %v1965_v7 = vpop.permute.xlu0 %1964 }
 0x7b9   : > { %v1970_v0 = vsel %vm512_vm2, %v1965_v7, 0 }
 0x7ba   : > { %4964 = vmatmul.msk.bf16.vlgmr.msra.gmra.mxu0 %vm573_vm6, %v1840_v54  ;;  %1979 = vmatpush.bf16.msra.mxu1 %v1970_v0 }
 0x7c8   : > { %v2013_v63 = vpop.permute.xlu1 %2012 }
 0x7c9   : > { %v2018_v55 = vsel %vm512_vm2, %v2013_v63, 0 }
 0x7ca   : > { %2027 = vmatpush.bf16.msra.mxu3 %v2018_v55 }
 0x7dc   : > { %v1687_v15 = vpop.f32.mrf.mxu2 }
 0x7dd   : > { %v1868_v11 = vsel %vm765_vm7, %v1687_v15, -inf }
 0x7de   : > { %1869 = vmax.xlane.f32.xlu1 %v1868_v11 }
 0x7e4   : > { %v1689_v16 = vpop.f32.mrf.mxu2 }
 0x7ec   : > { %v1716_v49 = vpop.f32.mrf.mxu3 }
 0x7ed   : > { %v1871_v5 = vsel %vm765_vm7, %v1716_v49, -inf }
 0x7ee   : > { %1872 = vmax.xlane.f32.xlu2 %v1871_v5  ;;  %v1658_v17 = vpop.f32.mrf.mxu1 }
 0x7ef   : > { %v1865_v18 = vsel %vm765_vm7, %v1658_v17, -inf }
 0x7f0   : > { %1866 = vmax.xlane.f32.xlu0 %v1865_v18 }
 0x7f4   : > { %v1718_v10 = vpop.f32.mrf.mxu3 }
 0x7f6   : > { %v1660_v20 = vpop.f32.mrf.mxu1 }
 0x816   : > { %v1745_v22 = vpop.f32.mrf.mxu0 }
 0x817   : > { %v1874_v21 = vsel %vm765_vm7, %v1745_v22, -inf }
 0x818   : > { %1875 = vmax.xlane.f32.xlu2 %v1874_v21 }
 0x81e   : > { %v1747_v23 = vpop.f32.mrf.mxu0 }
 0x826   : > { %v6856_v25 = vpop.f32.mrf.mxu1 }
 0x827   : > { %v1877_v58 = vsel %vm765_vm7, %v6856_v25, -inf }
 0x82d   : > { %v1803_v30 = vpop.f32.mrf.mxu2  ;;  %v1832_v32 = vpop.f32.mrf.mxu3 }
 0x82e   : > { %v1880_v29 = vsel %vm765_vm7, %v1803_v30, -inf  ;;  %v1883_v36 = vsel %vm765_vm7, %v1832_v32, -inf  ;;  %v1776_v40 = vpop.f32.mrf.mxu1 }
 0x82f   : > { %1881 = vmax.xlane.f32.xlu1 %v1880_v29  ;;  %1884 = vmax.xlane.f32.xlu0 %v1883_v36 }
 0x830   : > { %2036 = vrot.lane.b32.xlu2 %v6824_v28, %s6330_s20 }
 0x835   : > { %v1805_v43 = vpop.f32.mrf.mxu2  ;;  %v1834_v45 = vpop.f32.mrf.mxu3 }
 0x837   : > { %v1861_v50 = vpop.f32.mrf.mxu0 }
 0x838   : > { %v1886_v53 = vsel %vm765_vm7, %v1861_v50, -inf }
 0x839   : > { %1887 = vmax.xlane.f32.xlu1 %v1886_v53 }
 0x83f   : > { %v1863_v57 = vpop.f32.mrf.mxu0 }
 0x851   : > { %v1870_v33 = vpop.xlane.xlu1 %1869 }
 0x852   : > { %v1890_v26 = vsub.f32 %v1687_v15, %v1870_v33  ;;  %2084 = vrot.lane.b32.xlu1 %v6833_v48, %s6330_s20 }
 0x854   : > { %v1899_v51 = vmul.f32 1.442695, %v1890_v26 }
 0x856   : > { %6191 = vpow2.f32 %v1899_v51 }
 0x859   : > { %1878 = vmax.xlane.f32.xlu2 %v1877_v58 }
 0x85c   : > { %v6867_v42 = vpop.eup %6191 }
 0x85d   : > { %v1916_v28 = vsel %vm765_vm7, %v6867_v42, 0.0 }
 0x85e   : > { %1917 = vadd.xlane.f32.xlu0 %v1916_v28 }
 0x861   : > { %v1873_v59 = vpop.xlane.xlu2 %1872 }
 0x862   : > { %v1891_v39 = vsub.f32 %v1716_v49, %v1873_v59 }
 0x863   : > { %v1867_v35 = vpop.xlane.xlu0 %1866 }
 0x864   : > { %v1901_v27 = vmul.f32 1.442695, %v1891_v39  ;;  %v1889_v4 = vsub.f32 %v1658_v17, %v1867_v35 }
 0x866   : > { %6193 = vpow2.f32 %v1901_v27  ;;  %v1897_v56 = vmul.f32 1.442695, %v1889_v4 }
 0x868   : > { %6195 = vpow2.f32 %v1897_v56 }
 0x86c   : > { %v6194_v54 = vpop.eup %6193 }
 0x86d   : > { %v1919_v48 = vsel %vm765_vm7, %v6194_v54, 0.0 }
 0x86e   : > { %1920 = vadd.xlane.f32.xlu2 %v1919_v48  ;;  %v6872_v6 = vpop.eup %6195 }
 0x86f   : > { %v1913_v7 = vsel %vm765_vm7, %v6872_v6, 0.0 }
 0x87c   : > { %1914 = vadd.xlane.f32.xlu1 %v1913_v7 }
 0x88b   : > { %v1876_v0 = vpop.xlane.xlu2 %1875 }
 0x88c   : > { %v1892_v63 = vsub.f32 %v1745_v22, %v1876_v0 }
 0x88e   : > { %v1903_v55 = vmul.f32 1.442695, %v1892_v63 }
 0x890   : > { %6197 = vpow2.f32 %v1903_v55 }
 0x893   : > { %v2037_v15 = vpop.permute.xlu2 %2036 }
 0x894   : > { %v2042_v11 = vsel %vm512_vm2, %v2037_v15, 0 }
 0x895   : > { %2051 = vmatpush.bf16.msrb.mxu0 %v2042_v11 }
 0x896   : > { %v6198_v16 = vpop.eup %6197 }
 0x897   : > { %v1922_v49 = vsel %vm765_vm7, %v6198_v16, 0.0 }
 0x898   : > { %1923 = vadd.xlane.f32.xlu0 %v1922_v49 }
 0x8a2   : > { %v1882_v5 = vpop.xlane.xlu1 %1881  ;;  %v1885_v17 = vpop.xlane.xlu0 %1884 }
 0x8a3   : > { %v1894_v18 = vsub.f32 %v1803_v30, %v1882_v5  ;;  %v1895_v10 = vsub.f32 %v1832_v32, %v1885_v17 }
 0x8a5   : > { %v1907_v20 = vmul.f32 1.442695, %v1894_v18  ;;  %v1909_v21 = vmul.f32 1.442695, %v1895_v10 }
 0x8a7   : > { %6199 = vpow2.f32 %v1907_v20 }
 0x8a8   : > { %6201 = vpow2.f32 %v1909_v21 }
 0x8ac   : > { %v1888_v23 = vpop.xlane.xlu1 %1887 }
 0x8ad   : > { %v6200_v22 = vpop.eup %6199  ;;  %v1896_v29 = vsub.f32 %v1861_v50, %v1888_v23  ;;  %v2130_v50 = vld [vmem:[#allocation1] sm:$0xff] }
 0x8ae   : > { %v6878_v36 = vpop.eup %6201  ;;  %v1928_v40 = vsel %vm765_vm7, %v6200_v22, 0.0 }
 0x8af   : > { %v1911_v43 = vmul.f32 1.442695, %v1896_v29  ;;  %1929 = vadd.xlane.f32.xlu0 %v1928_v40  ;;  %v1931_v45 = vsel %vm765_vm7, %v6878_v36, 0.0 }
 0x8b0   : > { %1932 = vadd.xlane.f32.xlu1 %v1931_v45 }
 0x8b1   : > { %6203 = vpow2.f32 %v1911_v43 }
 0x8b7   : > { %v6204_v30 = vpop.eup %6203 }
 0x8b8   : > { %v1934_v32 = vsel %vm765_vm7, %v6204_v30, 0.0 }
 0x8b9   : > { %1935 = vadd.xlane.f32.xlu0 %v1934_v32 }
 0x8c4   : > { %v2085_v53 = vpop.permute.xlu1 %2084 }
 0x8c5   : > { %v2090_v57 = vsel %vm512_vm2, %v2085_v53, 0 }
 0x8c6   : > { %2099 = vmatpush.bf16.msrb.mxu2 %v2090_v57 }
 0x8c9   : > { %2132 = vrot.lane.b32.xlu1 %v2130_v50, %s6330_s20 }
 0x8cc   : > { %v1879_v33 = vpop.xlane.xlu2 %1878 }
 0x8cd   : > { %2060 = vrot.lane.b32.xlu0 %v6828_v37, %s6330_s20  ;;  %v1893_v26 = vsub.f32 %v6856_v25, %v1879_v33 }
 0x8cf   : > { %v1905_v51 = vmul.f32 1.442695, %v1893_v26 }
 0x8d1   : > { %6205 = vpow2.f32 %v1905_v51  ;;  %v1918_v58 = vpop.xlane.xlu0 %1917 }
 0x8d2   : > { %6207 = vrcp.f32 %v1918_v58 }
 0x8d7   : > { %v6206_v28 = vpop.eup %6205 }
 0x8d8   : > { %v6208_v59 = vpop.eup %6207  ;;  %v1925_v39 = vsel %vm765_vm7, %v6206_v28, 0.0 }
 0x8d9   : > { %v1946_v27 = vmul.f32 %v6208_v59, %v6867_v42  ;;  %1926 = vadd.xlane.f32.xlu2 %v1925_v39 }
 0x8db   : > { %v1954_v35 = vpack.c.bf16 %v1946_v27, %v1946_v27 }
 0x8dd   : > { %4966 = vmatmul.msk.bf16.vlgmr.msra.gmra.mxu2 %vm867_vm8, %v1954_v35 }
 0x8e1   : > { %v1921_v4 = vpop.xlane.xlu2 %1920 }
 0x8e2   : > { %6209 = vrcp.f32 %v1921_v4 }
 0x8e8   : > { %v6210_v48 = vpop.eup %6209 }
 0x8e9   : > { %v1947_v37 = vmul.f32 %v6210_v48, %v6194_v54 }
 0x8eb   : > { %v1955_v56 = vpack.c.bf16 %v1947_v37, %v1947_v37 }
 0x8ed   : > { %4967 = vmatmul.msk.bf16.vlgmr.msra.gmra.mxu3 %vm867_vm8, %v1955_v56 }
 0x8ef   : > { %v1915_v25 = vpop.xlane.xlu1 %1914 }
 0x8f0   : > { %6211 = vrcp.f32 %v1915_v25 }
 0x8f1   : > { %2108 = vrot.lane.b32.xlu2 %v6837_v52, %s6330_s20  ;;  %s2772_s20 = scalar_lea.vmem %s7467_s4, %s6313_s25 }
 0x8f6   : > { %v6212_v7 = vpop.eup %6211 }
 0x8f7   : > { %v1945_v0 = vmul.f32 %v6212_v7, %v6872_v6 }
 0x8f9   : > { %v1953_v42 = vpack.c.bf16 %v1945_v0, %v1945_v0 }
 0x8fb   : > { %4965 = vmatmul.msk.bf16.vlgmr.msra.gmra.mxu1 %vm867_vm8, %v1953_v42 }
 0x90b   : > { %v1924_v63 = vpop.xlane.xlu0 %1923 }
 0x90c   : > { %6213 = vrcp.f32 %v1924_v63 }
 0x912   : > { %v6214_v55 = vpop.eup %6213 }
 0x913   : > { %v1948_v15 = vmul.f32 %v6214_v55, %v6198_v16 }
 0x915   : > { %v1956_v11 = vpack.c.bf16 %v1948_v15, %v1948_v15 }
 0x917   : > { %4968 = vmatmul.msk.bf16.vlgmr.msrb.gmra.mxu0 %vm867_vm8, %v1956_v11 }
 0x922   : > { %v1930_v54 = vpop.xlane.xlu0 %1929 }
 0x923   : > { %6215 = vrcp.f32 %v1930_v54  ;;  %v1933_v52 = vpop.xlane.xlu1 %1932 }
 0x929   : > { %v6216_v49 = vpop.eup %6215 }
 0x92a   : > { %v1950_v5 = vmul.f32 %v6216_v49, %v6200_v22 }
 0x92c   : > { %v1958_v17 = vpack.c.bf16 %v1950_v5, %v1950_v5  ;;  %v1936_v18 = vpop.xlane.xlu0 %1935 }
 0x92d   : > { %6217 = vrcp.f32 %v1936_v18 }
 0x92e   : > { %4970 = vmatmul.msk.bf16.vlgmr.msrb.gmra.mxu2 %vm867_vm8, %v1958_v17  ;;  %6219 = vrcp.f32 %v1933_v52 }
 0x933   : > { %v6218_v6 = vpop.eup %6217 }
 0x934   : > { %v1952_v10 = vmul.f32 %v6218_v6, %v6204_v30  ;;  %v6220_v40 = vpop.eup %6219 }
 0x935   : > { %v1951_v45 = vmul.f32 %v6220_v40, %v6878_v36 }
 0x936   : > { %v1960_v16 = vpack.c.bf16 %v1952_v10, %v1952_v10 }
 0x937   : > { %v1959_v50 = vpack.c.bf16 %v1951_v45, %v1951_v45 }
 0x93b   : > { %v2133_v20 = vpop.permute.xlu1 %2132 }
 0x93c   : > { %v2138_v21 = vsel %vm512_vm2, %v2133_v20, 0 }
 0x93d   : > { %2147 = vmatpush.bf16.msra.mxu0 %v2138_v21 }
 0x93f   : > { %v2061_v23 = vpop.permute.xlu0 %2060 }
 0x940   : > { %4972 = vmatmul.msk.bf16.vlgmr.msra.gmra.mxu0 %vm867_vm8, %v1960_v16  ;;  %v2066_v29 = vsel %vm512_vm2, %v2061_v23, 0 }
 0x941   : > { %2075 = vmatpush.bf16.msrb.mxu1 %v2066_v29 }
 0x94c   : > { %v1927_v22 = vpop.xlane.xlu2 %1926 }
 0x94d   : > { %6221 = vrcp.f32 %v1927_v22 }
 0x953   : > { %v6222_v43 = vpop.eup %6221 }
 0x954   : > { %v1949_v32 = vmul.f32 %v6222_v43, %v6206_v28  ;;  %v2109_v30 = vpop.permute.xlu2 %2108 }
 0x955   : > { %v2114_v53 = vsel %vm512_vm2, %v2109_v30, 0 }
 0x956   : > { %v1957_v57 = vpack.c.bf16 %v1949_v32, %v1949_v32  ;;  %2123 = vmatpush.bf16.msrb.mxu3 %v2114_v53 }
 0x958   : > { %4969 = vmatmul.msk.bf16.vlgmr.msrb.gmra.mxu1 %vm867_vm8, %v1957_v57 }
 0x959   : > { %4971 = vmatmul.msk.bf16.vlgmr.msrb.gmra.mxu3 %vm867_vm8, %v1959_v50 }
 0x960   : > { %v2005_v33 = vpop.f32.mrf.mxu2 }
 0x961   : > { %2163 = vst [vmem:[#allocation1 + $0x1] ss:$4 sm:$0xff] %v2005_v33 }
 0x968   : > { %v2007_v26 = vpop.f32.mrf.mxu2 }
 0x970   : > { %v2029_v51 = vpop.f32.mrf.mxu3 }
 0x971   : > { %2165 = vst [vmem:[#allocation1 + $0x2] ss:$4 sm:$0xff] %v2029_v51 }
 0x978   : > { %v1981_v58 = vpop.f32.mrf.mxu1  ;;  %v2031_v59 = vpop.f32.mrf.mxu3 }
 0x979   : > { %2161 = vst [vmem:[#allocation1] ss:$4 sm:$0xff] %v1981_v58 }
 0x980   : > { %v1983_v36 = vpop.f32.mrf.mxu1 }
 0x994   : > { %v2053_v28 = vpop.f32.mrf.mxu0 }
 0x995   : > { %2167 = vst [vmem:[#allocation1 + $0x3] ss:$4 sm:$0xff] %v2053_v28 }
 0x99c   : > { %v2055_v39 = vpop.f32.mrf.mxu0  ;;  %v6908_v42 = vld.sshfl [vmem:[#allocation1] sm:$0xff pattern:$0x73625140] }
 0x9b1   : > { %v2101_v27 = vpop.f32.mrf.mxu2 }
 0x9b2   : > { %2171 = vst [vmem:[#allocation1 + $0x21] ss:$4 sm:$0xff] %v2101_v27 }
 0x9b9   : > { %v2103_v35 = vpop.f32.mrf.mxu2 }
 0x9bd   : > { %v2149_v4 = vpop.f32.mrf.mxu0 }
 0x9be   : > { %2175 = vst [vmem:[#allocation1 + $0x23] ss:$4 sm:$0xff] %v2149_v4 }
 0x9c5   : > { %v2151_v48 = vpop.f32.mrf.mxu0 }
 0x9d5   : > { %v2077_v37 = vpop.f32.mrf.mxu1 }
 0x9d6   : > { %2169 = vst [vmem:[#allocation1 + $0x20] ss:$4 sm:$0xff] %v2077_v37 }
 0x9dc   : > { %v2125_v56 = vpop.f32.mrf.mxu3 }
 0x9dd   : > { %2173 = vst [vmem:[#allocation1 + $0x22] ss:$4 sm:$0xff] %v2125_v56  ;;  %v2079_v25 = vpop.f32.mrf.mxu1 }
 0x9e4   : > { %v6906_v7 = vld.sshfl [vmem:[#allocation1 + $0x20] sm:$0xff pattern:$0x73625140]  ;;  %v2127_v0 = vpop.f32.mrf.mxu3 }
 0x9e5   : > { %2182 = vst [vmem:[#allocation1] ss:$9 sm:$0xff] %v6553_v60 }
 0x9ec   : > { %v2183_v63 = vld [vmem:[#allocation1] sm:$0xff] }
 0x9ed   : > { %2187 = vst [vmem:[#allocation1] ss:$9 sm:$0xff] %v6453_v14 }
 0x9f4   : > { %v2188_v55 = vld [vmem:[#allocation1] sm:$0xff] }
 0x9f5   : > { %2211 = vst [vmem:[#allocation1] ss:$9 sm:$0xff] %v6559_v62 }
 0x9fc   : > { %v2212_v15 = vld [vmem:[#allocation1] sm:$0xff] }
 0x9fd   : > { %2214 = vrot.lane.b32.xlu1 %v2212_v15, %s6331_s21  ;;  %2216 = vst [vmem:[#allocation1] ss:$9 sm:$0xff] %v6477_v24 }
 0xa04   : > { %v2217_v11 = vld [vmem:[#allocation1] sm:$0xff] }
 0xa05   : > { %2219 = vrot.lane.b32.xlu0 %v2217_v11, %s6332_s22  ;;  %2240 = vst [vmem:[#allocation1] ss:$9 sm:$0xff] %v6566_v3 }
 0xa0c   : > { %v2241_v54 = vld [vmem:[#allocation1] sm:$0xff] }
 0xa0d   : > { %2243 = vrot.lane.b32.xlu0 %v2241_v54, %s6331_s21  ;;  %2245 = vst [vmem:[#allocation1] ss:$9 sm:$0xff] %v6500_v31 }
 0xa14   : > { %v2246_v60 = vld [vmem:[#allocation1] sm:$0xff] }
 0xa15   : > { %2248 = vrot.lane.b32.xlu2 %v2246_v60, %s6332_s22  ;;  %2269 = vst [vmem:[#allocation1] ss:$9 sm:$0xff] %v6573_v8 }
 0xa1c   : > { %v2270_v62 = vld [vmem:[#allocation1] sm:$0xff] }
 0xa1d   : > { %2274 = vst [vmem:[#allocation1] ss:$9 sm:$0xff] %v6505_v34  ;;  %2190 = vrot.lane.b32.xlu2 %v2188_v55, %s6332_s22 }
 0xa24   : > { %v2275_v49 = vld [vmem:[#allocation1] sm:$0xff] }
 0xa25   : > { %2277 = vrot.lane.b32.xlu1 %v2275_v49, %s6332_s22  ;;  %2298 = vst [vmem:[#allocation1] ss:$9 sm:$0xff] %v6589_v13 }
 0xa2c   : > { %v2299_v3 = vld [vmem:[#allocation1] sm:$0xff] }
 0xa2d   : > { %2303 = vst [vmem:[#allocation1] ss:$9 sm:$0xff] %v6510_v38  ;;  %2185 = vrot.lane.b32.xlu1 %v2183_v63, %s6331_s21 }
 0xa34   : > { %v2304_v5 = vld [vmem:[#allocation1] sm:$0xff] }
 0xa35   : > { %2327 = vst [vmem:[#allocation1] ss:$9 sm:$0xff] %v6576_v9 }
 0xa3c   : > { %v2328_v17 = vld [vmem:[#allocation1] sm:$0xff] }
 0xa3d   : > { %2332 = vst [vmem:[#allocation1] ss:$9 sm:$0xff] %v6515_v41 }
 0xa44   : > { %v2333_v8 = vld [vmem:[#allocation1] sm:$0xff] }
 0xa45   : > { %2335 = vrot.lane.b32.xlu0 %v2333_v8, %s6332_s22  ;;  %2356 = vst [vmem:[#allocation1] ss:$9 sm:$0xff] %v6584_v12 }
 0xa4c   : > { %v2357_v18 = vld [vmem:[#allocation1] sm:$0xff] }
 0xa4d   : > { %2272 = vrot.lane.b32.xlu0 %v2270_v62, %s6331_s21  ;;  %2359 = vrot.lane.b32.xlu1 %v2357_v18, %s6331_s21  ;;  %2361 = vst [vmem:[#allocation1] ss:$9 sm:$0xff] %v6520_v44 }
 0xa54   : > { %v2362_v13 = vld [vmem:[#allocation1] sm:$0xff] }
 0xa55   : > { %2306 = vrot.lane.b32.xlu0 %v2304_v5, %s6332_s22  ;;  %2301 = vrot.lane.b32.xlu1 %v2299_v3, %s6331_s21  ;;  %2385 = vst [vmem:[#allocation1] ss:$9 sm:$0xff] %v6598_v19 }
 0xa56   : > { %2364 = vrot.lane.b32.xlu2 %v2362_v13, %s6332_s22 }
 0xa5c   : > { %v2386_v9 = vld [vmem:[#allocation1] sm:$0xff] }
 0xa5d   : > { %2388 = vrot.lane.b32.xlu0 %v2386_v9, %s6331_s21  ;;  %2390 = vst [vmem:[#allocation1] ss:$9 sm:$0xff] %v6525_v47 }
 0xa5e   : > { %2330 = vrot.lane.b32.xlu2 %v2328_v17, %s6331_s21  ;;  %s6336_s21 = smov 24  }
 0xa64   : > { %v2391_v12 = vld [vmem:[#allocation1] sm:$0xff] }
 0xa65   : > { %2510 = vst [vmem:[#allocation1] ss:$9 sm:$0xff] %v6453_v14 }
 0xa66   : > { %2393 = vrot.lane.b32.xlu2 %v2391_v12, %s6332_s22 }
 0xa6c   : > { %v6943_v52 = vld [vmem:[#allocation1] sm:$0xff] }
 0xa6d   : > { %2534 = vst [vmem:[#allocation1] ss:$9 sm:$0xff] %v6477_v24 }
 0xa6f   : > { %v2249_v6 = vpop.permute.xlu2 %2248  ;;  %v2215_v24 = vpop.permute.xlu1 %2214 }
 0xa70   : > { %v2254_v19 = vsel %vm573_vm6, %v2249_v6, 0 }
 0xa71   : > { %2263 = vmatpush.bf16.xpose.msra.mxu3 %v2254_v19 }
 0xa74   : > { %v2535_v10 = vld [vmem:[#allocation1] sm:$0xff] }
 0xa75   : > { %2537 = vrot.lane.b32.xlu2 %v2535_v10, %s6333_s23  ;;  %2558 = vst [vmem:[#allocation1] ss:$9 sm:$0xff] %v6500_v31 }
 0xa77   : > { %v2220_v20 = vpop.permute.xlu0 %2219  ;;  %v2191_v21 = vpop.permute.xlu2 %2190 }
 0xa78   : > { %v2225_v14 = vsel %vm573_vm6, %v2220_v20, 0  ;;  %v2196_v16 = vsel %vm573_vm6, %v2191_v21, 0 }
 0xa79   : > { %2205 = vmatpush.bf16.xpose.msra.mxu1 %v2196_v16  ;;  %2234 = vmatpush.bf16.xpose.msra.mxu2 %v2225_v14 }
 0xa7c   : > { %v2559_v23 = vld [vmem:[#allocation1] sm:$0xff] }
 0xa7d   : > { %2582 = vst [vmem:[#allocation1] ss:$9 sm:$0xff] %v6505_v34 }
 0xa7f   : > { %v2244_v29 = vpop.permute.xlu0 %2243 }
 0xa80   : > { %4974 = vmatmul.msk.bf16.vlgmr.msra.gmra.mxu2 %vm573_vm6, %v2215_v24  ;;  %4975 = vmatmul.msk.bf16.vlgmr.msra.gmra.mxu3 %vm573_vm6, %v2244_v29 }
 0xa84   : > { %v6954_v22 = vld [vmem:[#allocation1] sm:$0xff] }
 0xa85   : > { %2606 = vst [vmem:[#allocation1] ss:$9 sm:$0xff] %v6510_v38 }
 0xa8c   : > { %v6957_v31 = vld [vmem:[#allocation1] sm:$0xff] }
 0xa8d   : > { %2630 = vst [vmem:[#allocation1] ss:$9 sm:$0xff] %v6515_v41 }
 0xa94   : > { %v6960_v40 = vld [vmem:[#allocation1] sm:$0xff] }
 0xa95   : > { %2654 = vst [vmem:[#allocation1] ss:$9 sm:$0xff] %v6520_v44 }
 0xa97   : > { %v2278_v43 = vpop.permute.xlu1 %2277 }
 0xa98   : > { %v2283_v34 = vsel %vm573_vm6, %v2278_v43, 0 }
 0xa99   : > { %2292 = vmatpush.bf16.xpose.msrb.mxu0 %v2283_v34 }
 0xa9c   : > { %v6964_v45 = vld [vmem:[#allocation1] sm:$0xff] }
 0xa9d   : > { %2678 = vst [vmem:[#allocation1] ss:$9 sm:$0xff] %v6525_v47 }
 0xa9f   : > { %v2186_v32 = vpop.permute.xlu1 %2185 }
 0xaa0   : > { %4973 = vmatmul.msk.bf16.vlgmr.msra.gmra.mxu1 %vm573_vm6, %v2186_v32 }
 0xab0   : > { %v2365_v38 = vpop.permute.xlu2 %2364 }
 0xab1   : > { %v2370_v30 = vsel %vm573_vm6, %v2365_v38, 0 }
 0xab2   : > { %2379 = vmatpush.bf16.xpose.msrb.mxu3 %v2370_v30 }
 0xab7   : > { %v2336_v41 = vpop.permute.xlu0 %2335 }
 0xab8   : > { %v2341_v53 = vsel %vm573_vm6, %v2336_v41, 0  ;;  %v2331_v57 = vpop.permute.xlu2 %2330 }
 0xab9   : > { %2350 = vmatpush.bf16.xpose.msrb.mxu2 %v2341_v53 }
 0xabf   : > { %v2273_v44 = vpop.permute.xlu0 %2272  ;;  %v2360_v50 = vpop.permute.xlu1 %2359 }
 0xac0   : > { %v2394_v33 = vpop.permute.xlu2 %2393  ;;  %4976 = vmatmul.msk.bf16.vlgmr.msrb.gmra.mxu0 %vm573_vm6, %v2273_v44  ;;  %4978 = vmatmul.msk.bf16.vlgmr.msrb.gmra.mxu2 %vm573_vm6, %v2331_v57 }
 0xac1   : > { %v2399_v47 = vsel %vm573_vm6, %v2394_v33, 0  ;;  %4979 = vmatmul.msk.bf16.vlgmr.msrb.gmra.mxu3 %vm573_vm6, %v2360_v50 }
 0xac2   : > { %2408 = vmatpush.bf16.xpose.msra.mxu0 %v2399_v47 }
 0xac7   : > { %v2307_v26 = vpop.permute.xlu0 %2306  ;;  %v2302_v58 = vpop.permute.xlu1 %2301 }
 0xac8   : > { %v2312_v51 = vsel %vm573_vm6, %v2307_v26, 0 }
 0xac9   : > { %2321 = vmatpush.bf16.xpose.msrb.mxu1 %v2312_v51 }
 0xacf   : > { %v2389_v59 = vpop.permute.xlu0 %2388  ;;  %v2538_v36 = vpop.permute.xlu2 %2537 }
 0xad0   : > { %v2543_v28 = vsel %vm512_vm2, %v2538_v36, 0  ;;  %4977 = vmatmul.msk.bf16.vlgmr.msrb.gmra.mxu1 %vm573_vm6, %v2302_v58  ;;  %4980 = vmatmul.msk.bf16.vlgmr.msra.gmra.mxu0 %vm573_vm6, %v2389_v59 }
 0xad1   : > { %2552 = vmatpush.bf16.msra.mxu2 %v2543_v28 }
 0xb03   : > { %v2236_v39 = vpop.f32.mrf.mxu2  ;;  %v2265_v27 = vpop.f32.mrf.mxu3 }
 0xb04   : > { %v2420_v35 = vsel %vm765_vm7, %v2265_v27, -inf  ;;  %v2417_v4 = vsel %vm765_vm7, %v2236_v39, -inf }
 0xb05   : > { %2421 = vmax.xlane.f32.xlu1 %v2420_v35  ;;  %2418 = vmax.xlane.f32.xlu2 %v2417_v4 }
 0xb0b   : > { %v2238_v48 = vpop.f32.mrf.mxu2  ;;  %v2267_v37 = vpop.f32.mrf.mxu3 }
 0xb1d   : > { %v2207_v56 = vpop.f32.mrf.mxu1 }
 0xb1e   : > { %2561 = vrot.lane.b32.xlu1 %v2559_v23, %s6333_s23  ;;  %v2414_v25 = vsel %vm765_vm7, %v2207_v56, -inf }
 0xb1f   : > { %2415 = vmax.xlane.f32.xlu0 %v2414_v25 }
 0xb25   : > { %v2209_v0 = vpop.f32.mrf.mxu1 }
 0xb33   : > { %2513 = vrot.lane.b32.xlu0 %v6943_v52, %s6333_s23 }
 0xb3d   : > { %v2294_v63 = vpop.f32.mrf.mxu0 }
 0xb3e   : > { %v2423_v55 = vsel %vm765_vm7, %v2294_v63, -inf }
 0xb3f   : > { %2424 = vmax.xlane.f32.xlu2 %v2423_v55 }
 0xb43   : > { %v2352_v15 = vpop.f32.mrf.mxu2 }
 0xb44   : > { %v6985_v11 = vpop.f32.mrf.mxu3  ;;  %v2429_v60 = vsel %vm765_vm7, %v2352_v15, -inf }
 0xb45   : > { %v2296_v54 = vpop.f32.mrf.mxu0  ;;  %v2432_v13 = vsel %vm765_vm7, %v6985_v11, -inf }
 0xb48   : > { %2430 = vmax.xlane.f32.xlu1 %v2429_v60 }
 0xb4b   : > { %v2354_v62 = vpop.f32.mrf.mxu2 }
 0xb4c   : > { %v2383_v49 = vpop.f32.mrf.mxu3 }
 0xb4d   : > { %v6988_v3 = vpop.f32.mrf.mxu1  ;;  %v6990_v5 = vpop.f32.mrf.mxu0 }
 0xb4e   : > { %v2435_v17 = vsel %vm765_vm7, %v6990_v5, -inf  ;;  %v2426_v20 = vsel %vm765_vm7, %v6988_v3, -inf }
 0xb50   : > { %2436 = vmax.xlane.f32.xlu1 %v2435_v17 }
 0xb55   : > { %v2325_v8 = vpop.f32.mrf.mxu1  ;;  %v2412_v18 = vpop.f32.mrf.mxu0 }
 0xb57   : > { %2585 = vrot.lane.b32.xlu2 %v6954_v22, %s6333_s23 }
 0xb5d   : > { %2433 = vmax.xlane.f32.xlu0 %v2432_v13 }
 0xb78   : > { %v2422_v9 = vpop.xlane.xlu1 %2421  ;;  %v2419_v12 = vpop.xlane.xlu2 %2418 }
 0xb79   : > { %v2440_v52 = vsub.f32 %v2265_v27, %v2422_v9  ;;  %v2439_v6 = vsub.f32 %v2236_v39, %v2419_v12 }
 0xb7b   : > { %v2450_v19 = vmul.f32 1.442695, %v2440_v52  ;;  %v2448_v10 = vmul.f32 1.442695, %v2439_v6  ;;  %v2181_v52 = vpack.c.bf16 %v6906_v7, %v6906_v7  ;;  %v2180_v6 = vpack.c.bf16 %v6908_v42, %v6908_v42 }
 0xb7d   : > { %6223 = vpow2.f32 %v2450_v19 }
 0xb7e   : > { %6225 = vpow2.f32 %v2448_v10  ;;  %v2679_v10 = vld [vmem:[#allocation1] sm:$0xff] }
 0xb80   : > { %2427 = vmax.xlane.f32.xlu2 %v2426_v20 }
 0xb83   : > { %v7000_v21 = vpop.eup %6223 }
 0xb84   : > { %v7002_v14 = vpop.eup %6225  ;;  %v2468_v23 = vsel %vm765_vm7, %v7000_v21, 0.0 }
 0xb85   : > { %v2465_v16 = vsel %vm765_vm7, %v7002_v14, 0.0 }
 0xb86   : > { %2466 = vadd.xlane.f32.xlu0 %v2465_v16  ;;  %v2745_v16 = vunpack.c.l.b16 %v2180_v6  ;;  %v1082_v6 = vpack.c.bf16 %v6654_v1, %v6654_v1  ;;  %v6265_v1 = vld [vmem:[#allocation2] sm:$0xff] }
 0xb88   : > { %2469 = vadd.xlane.f32.xlu2 %v2468_v23 }
 0xb90   : > { %v2562_v24 = vpop.permute.xlu1 %2561 }
 0xb91   : > { %v2567_v29 = vsel %vm512_vm2, %v2562_v24, 0 }
 0xb92   : > { %2576 = vmatpush.bf16.msra.mxu3 %v2567_v29  ;;  %v2416_v22 = vpop.xlane.xlu0 %2415 }
 0xb93   : > { %v2438_v43 = vsub.f32 %v2207_v56, %v2416_v22 }
 0xb95   : > { %v2446_v34 = vmul.f32 1.442695, %v2438_v43 }
 0xb97   : > { %6227 = vpow2.f32 %v2446_v34 }
 0xb9d   : > { %v7009_v32 = vpop.eup %6227 }
 0xb9e   : > { %v2462_v38 = vsel %vm765_vm7, %v7009_v32, 0.0 }
 0xb9f   : > { %2463 = vadd.xlane.f32.xlu1 %v2462_v38 }
 0xba5   : > { %v2514_v30 = vpop.permute.xlu0 %2513 }
 0xba6   : > { %v2519_v41 = vsel %vm512_vm2, %v2514_v30, 0 }
 0xba7   : > { %2528 = vmatpush.bf16.msra.mxu1 %v2519_v41 }
 0xbb2   : > { %v2425_v53 = vpop.xlane.xlu2 %2424 }
 0xbb3   : > { %v2441_v57 = vsub.f32 %v2294_v63, %v2425_v53  ;;  %v1632_v63 = vpack.c.bf16 %v6780_v46, %v6780_v46 }
 0xbb5   : > { %v2452_v44 = vmul.f32 1.442695, %v2441_v57 }
 0xbb7   : > { %6229 = vpow2.f32 %v2452_v44 }
 0xbba   : > { %v2586_v50 = vpop.permute.xlu2 %2585 }
 0xbbb   : > { %v2591_v33 = vsel %vm512_vm2, %v2586_v50, 0  ;;  %v2431_v47 = vpop.xlane.xlu1 %2430 }
 0xbbc   : > { %v2443_v26 = vsub.f32 %v2352_v15, %v2431_v47  ;;  %2600 = vmatpush.bf16.msrb.mxu0 %v2591_v33 }
 0xbbd   : > { %v7015_v51 = vpop.eup %6229 }
 0xbbe   : > { %v2456_v58 = vmul.f32 1.442695, %v2443_v26  ;;  %v2471_v59 = vsel %vm765_vm7, %v7015_v51, 0.0 }
 0xbbf   : > { %2472 = vadd.xlane.f32.xlu0 %v2471_v59 }
 0xbc0   : > { %6231 = vpow2.f32 %v2456_v58 }
 0xbc3   : > { %v2437_v37 = vpop.xlane.xlu1 %2436 }
 0xbc4   : > { %v2445_v56 = vsub.f32 %v6990_v5, %v2437_v37 }
 0xbc6   : > { %v7019_v36 = vpop.eup %6231  ;;  %v2460_v15 = vmul.f32 1.442695, %v2445_v56 }
 0xbc7   : > { %v2477_v28 = vsel %vm765_vm7, %v7019_v36, 0.0 }
 0xbc8   : > { %2478 = vadd.xlane.f32.xlu0 %v2477_v28 }
 0xbd0   : > { %v2434_v39 = vpop.xlane.xlu0 %2433 }
 0xbd1   : > { %v2444_v27 = vsub.f32 %v6985_v11, %v2434_v39  ;;  %v2739_v11 = vunpack.c.l.b16 %v1632_v63 }
 0xbd3   : > { %v2458_v35 = vmul.f32 1.442695, %v2444_v27 }
 0xbd5   : > { %6233 = vpow2.f32 %v2458_v35 }
 0xbdb   : > { %v7024_v4 = vpop.eup %6233 }
 0xbdc   : > { %2609 = vrot.lane.b32.xlu0 %v6957_v31, %s6333_s23  ;;  %v2480_v48 = vsel %vm765_vm7, %v7024_v4, 0.0  ;;  %v1631_v31 = vpack.c.bf16 %v6778_v61, %v6778_v61 }
 0xbdd   : > { %2481 = vadd.xlane.f32.xlu1 %v2480_v48 }
 0xbde   : > { %v2738_v60 = vunpack.c.l.b16 %v1631_v31 }
 0xbe0   : > { %v2740_v49 = vpack.c.b16 %v2739_v11, %v2738_v60  ;;  %v5904_v60 = vld [vmem:[%s2767_s16 + $0x8] sm:$0xff] }
 0xbf3   : > { %v2428_v25 = vpop.xlane.xlu2 %2427 }
 0xbf4   : > { %v2442_v0 = vsub.f32 %v6988_v3, %v2428_v25 }
 0xbf6   : > { %v2454_v55 = vmul.f32 1.442695, %v2442_v0  ;;  %2633 = vrot.lane.b32.xlu1 %v6960_v40, %s6333_s23 }
 0xbf8   : > { %6235 = vpow2.f32 %v2454_v55 }
 0xbf9   : > { %v2467_v54 = vpop.xlane.xlu0 %2466 }
 0xbfa   : > { %6237 = vrcp.f32 %v2467_v54 }
 0xbfb   : > { %6239 = vpow2.f32 %v2460_v15  ;;  %v2470_v62 = vpop.xlane.xlu2 %2469 }
 0xbfc   : > { %6241 = vrcp.f32 %v2470_v62  ;;  %v5903_v62 = vld [vmem:[%s2767_s16] sm:$0xff]  ;;  %s2809_s16 = scalar_lea.vmem %s7469_s6, %s6313_s25 }
 0xbfe   : > { %v6236_v3 = vpop.eup %6235  ;;  %2741 = vrot.lane.b32.xlu1 %v2740_v49, %s6334_s24 }
 0xbff   : > { %v2474_v46 = vsel %vm765_vm7, %v6236_v3, 0.0 }
 0xc00   : > { %v6238_v40 = vpop.eup %6237  ;;  %2475 = vadd.xlane.f32.xlu2 %v2474_v46 }
 0xc01   : > { %v7040_v5 = vpop.eup %6239  ;;  %v2495_v61 = vmul.f32 %v6238_v40, %v7002_v14 }
 0xc02   : > { %v6242_v17 = vpop.eup %6241  ;;  %v2483_v9 = vsel %vm765_vm7, %v7040_v5, 0.0 }
 0xc03   : > { %v2503_v8 = vpack.c.bf16 %v2495_v61, %v2495_v61  ;;  %v2496_v18 = vmul.f32 %v6242_v17, %v7000_v21  ;;  %v2746_v21 = vunpack.c.l.b16 %v2181_v52  ;;  %v1083_v52 = vpack.c.bf16 %v6656_v2, %v6656_v2  ;;  %v6121_v2 = vld [vmem:[%s2772_s20] ss:$0 sm:$0xff] }
 0xc05   : > { %v2504_v13 = vpack.c.bf16 %v2496_v18, %v2496_v18  ;;  %4982 = vmatmul.msk.bf16.vlgmr.msra.gmra.mxu2 %vm867_vm8, %v2503_v8  ;;  %v2747_v23 = vpack.c.b16 %v2746_v21, %v2745_v16 }
 0xc06   : > { %2484 = vadd.xlane.f32.xlu0 %v2483_v9 }
 0xc07   : > { %4983 = vmatmul.msk.bf16.vlgmr.msra.gmra.mxu3 %vm867_vm8, %v2504_v13 }
 0xc12   : > { %v2464_v12 = vpop.xlane.xlu1 %2463 }
 0xc13   : > { %6243 = vrcp.f32 %v2464_v12 }
 0xc18   : > { %2657 = vrot.lane.b32.xlu2 %v6964_v45, %s6333_s23 }
 0xc19   : > { %v6244_v19 = vpop.eup %6243 }
 0xc1a   : > { %v2494_v20 = vmul.f32 %v6244_v19, %v7009_v32  ;;  %2681 = vrot.lane.b32.xlu0 %v2679_v10, %s6333_s23  ;;  %v2734_v19 = vunpack.c.l.b16 %v1083_v52  ;;  %v2733_v10 = vunpack.c.l.b16 %v1082_v6  ;;  %s7277_s23 = scalar_lea.vmem %s7471_s8, %s6439_s17 }
 0xc1c   : > { %v2502_v14 = vpack.c.bf16 %v2494_v20, %v2494_v20  ;;  %v2735_v21 = vpack.c.b16 %v2734_v19, %v2733_v10 }
 0xc1e   : > { %4981 = vmatmul.msk.bf16.vlgmr.msra.gmra.mxu1 %vm867_vm8, %v2502_v14 }
 0xc20   : > { %2748 = vrot.lane.b32.xlu2 %v2747_v23, %s6335_s30  ;;  %s2807_s30 = scalar_lea.vmem %s7468_s5, %s6313_s25 }
 0xc32   : > { %v2473_v7 = vpop.xlane.xlu0 %2472 }
 0xc33   : > { %6245 = vrcp.f32 %v2473_v7 }
 0xc39   : > { %v6246_v45 = vpop.eup %6245 }
 0xc3a   : > { %v2497_v24 = vmul.f32 %v6246_v45, %v7015_v51 }
 0xc3b   : > { %v2479_v29 = vpop.xlane.xlu0 %2478 }
 0xc3c   : > { %v2505_v42 = vpack.c.bf16 %v2497_v24, %v2497_v24  ;;  %6247 = vrcp.f32 %v2479_v29 }
 0xc3e   : > { %4984 = vmatmul.msk.bf16.vlgmr.msrb.gmra.mxu0 %vm867_vm8, %v2505_v42 }
 0xc42   : > { %v6248_v32 = vpop.eup %6247 }
 0xc43   : > { %v2499_v38 = vmul.f32 %v6248_v32, %v7019_v36  ;;  %v6266_v32 = vld [vmem:[#allocation2 + $0x8] sm:$0xff] }
 0xc45   : > { %v2507_v53 = vpack.c.bf16 %v2499_v38, %v2499_v38 }
 0xc4e   : > { %v2610_v22 = vpop.permute.xlu0 %2609 }
 0xc4f   : > { %v2615_v43 = vsel %vm512_vm2, %v2610_v22, 0 }
 0xc50   : > { %2624 = vmatpush.bf16.msrb.mxu1 %v2615_v43  ;;  %v2482_v34 = vpop.xlane.xlu1 %2481 }
 0xc51   : > { %6249 = vrcp.f32 %v2482_v34 }
 0xc54   : > { %2797 = vmatpush.bf16.msra.mxu1 %v5904_v60 }
 0xc57   : > { %v6250_v44 = vpop.eup %6249 }
 0xc58   : > { %v2500_v33 = vmul.f32 %v6250_v44, %v7024_v4  ;;  %2798 = vmatpush.bf16.msra.mxu1 %v5903_v62 }
 0xc5a   : > { %v2508_v59 = vpack.c.bf16 %v2500_v33, %v2500_v33 }
 0xc68   : > { %v2634_v30 = vpop.permute.xlu1 %2633 }
 0xc69   : > { %v2639_v41 = vsel %vm512_vm2, %v2634_v30, 0 }
 0xc6a   : > { %2648 = vmatpush.bf16.msrb.mxu2 %v2639_v41  ;;  %v6337_v41 = vmov 32.0  }
 0xc6d   : > { %4986 = vmatmul.msk.bf16.vlgmr.msrb.gmra.mxu2 %vm867_vm8, %v2507_v53 }
 0xc70   : > { %v2742_v20 = vpop.permute.xlu1 %2741 }
 0xc71   : > { %v2759_v16 = vsel %vm573_vm6, %v2735_v21, %v2742_v20 }
 0xc73   : > { %v2476_v57 = vpop.xlane.xlu2 %2475 }
 0xc74   : > { %6251 = vrcp.f32 %v2476_v57 }
 0xc79   : > { %v2485_v36 = vpop.xlane.xlu0 %2484 }
 0xc7a   : > { %v6252_v50 = vpop.eup %6251  ;;  %6253 = vrcp.f32 %v2485_v36 }
 0xc7b   : > { %v2498_v47 = vmul.f32 %v6252_v50, %v6236_v3  ;;  %v2658_v26 = vpop.permute.xlu2 %2657  ;;  %6255 = vrcp.f32 %v6337_v41 }
 0xc7c   : > { %v2663_v51 = vsel %vm512_vm2, %v2658_v26, 0 }
 0xc7d   : > { %v2506_v58 = vpack.c.bf16 %v2498_v47, %v2498_v47  ;;  %2672 = vmatpush.bf16.msrb.mxu3 %v2663_v51 }
 0xc7f   : > { %4985 = vmatmul.msk.bf16.vlgmr.msrb.gmra.mxu1 %vm867_vm8, %v2506_v58 }
 0xc80   : > { %4987 = vmatmul.msk.bf16.vlgmr.msrb.gmra.mxu3 %vm867_vm8, %v2508_v59  ;;  %v6254_v28 = vpop.eup %6253 }
 0xc81   : > { %v2501_v35 = vmul.f32 %v6254_v28, %v7040_v5  ;;  %v6256_v53 = vpop.eup %6255 }
 0xc82   : > { %v2818_v57 = vmul.f32 32.0, %v6256_v53  ;;  %vm2822_vm11 = vweird.f32 %v6256_v53 }
 0xc83   : > { %v2509_v37 = vpack.c.bf16 %v2501_v35, %v2501_v35  ;;  %v2749_v14 = vpop.permute.xlu2 %2748 }
 0xc84   : > { %v2762_v23 = vsel %vm2760_vm9, %v2759_v16, %v2749_v14  ;;  %v2819_v44 = vsub.f32 1.0, %v2818_v57 }
 0xc86   : > { %v2820_v50 = vmul.f32 %v6256_v53, %v2819_v44 }
 0xc88   : > { %v2554_v39 = vpop.f32.mrf.mxu2  ;;  %v2821_v33 = vadd.f32 %v6256_v53, %v2820_v50 }
 0xc89   : > { %2712 = vst [vmem:[#allocation1 + $0x1] ss:$4 sm:$0xff] %v2554_v39 }
 0xc8a   : > { %v2578_v27 = vpop.f32.mrf.mxu3  ;;  %v7094_v47 = vsel %vm2822_vm11, %v6256_v53, %v2821_v33 }
 0xc8b   : > { %2714 = vst [vmem:[#allocation1 + $0x2] ss:$4 sm:$0xff] %v2578_v27 }
 0xc8c   : > { %v2682_v4 = vpop.permute.xlu0 %2681 }
 0xc8d   : > { %v2687_v48 = vsel %vm512_vm2, %v2682_v4, 0 }
 0xc8e   : > { %2696 = vmatpush.bf16.msra.mxu0 %v2687_v48 }
 0xc90   : > { %v2556_v56 = vpop.f32.mrf.mxu2 }
 0xc91   : > { %4988 = vmatmul.msk.bf16.vlgmr.msra.gmra.mxu0 %vm867_vm8, %v2509_v37 }
 0xc92   : > { %v2580_v25 = vpop.f32.mrf.mxu3 }
 0xc9b   : > { %v2530_v0 = vpop.f32.mrf.mxu1 }
 0xc9c   : > { %2710 = vst [vmem:[#allocation1] ss:$4 sm:$0xff] %v2530_v0 }
 0xca3   : > { %v2532_v63 = vpop.f32.mrf.mxu1 }
 0xcbb   : > { %v2602_v55 = vpop.f32.mrf.mxu0 }
 0xcbc   : > { %2716 = vst [vmem:[#allocation1 + $0x3] ss:$4 sm:$0xff] %v2602_v55 }
 0xcc3   : > { %v2604_v31 = vpop.f32.mrf.mxu0  ;;  %v2725_v5 = vld.sshfl [vmem:[#allocation1] sm:$0xff pattern:$0x73625140] }
 0xcc4   : > { %v2729_v61 = vpack.c.bf16 %v2725_v5, %v2725_v5 }
 0xcc6   : > { %v2752_v13 = vunpack.c.l.b16 %v2729_v61 }
 0xcf0   : > { %v2650_v15 = vpop.f32.mrf.mxu2 }
 0xcf1   : > { %2720 = vst [vmem:[#allocation1 + $0x21] ss:$4 sm:$0xff] %v2650_v15 }
 0xcf8   : > { %v2652_v11 = vpop.f32.mrf.mxu2 }
 0xcfc   : > { %v2626_v54 = vpop.f32.mrf.mxu1 }
 0xcfd   : > { %2718 = vst [vmem:[#allocation1 + $0x20] ss:$4 sm:$0xff] %v2626_v54 }
 0xd03   : > { %v2674_v49 = vpop.f32.mrf.mxu3 }
 0xd04   : > { %2722 = vst [vmem:[#allocation1 + $0x22] ss:$4 sm:$0xff] %v2674_v49  ;;  %v2628_v3 = vpop.f32.mrf.mxu1 }
 0xd0b   : > { %v2676_v46 = vpop.f32.mrf.mxu3 }
 0xd0e   : > { %v2698_v40 = vpop.f32.mrf.mxu0 }
 0xd0f   : > { %2724 = vst [vmem:[#allocation1 + $0x23] ss:$4 sm:$0xff] %v2698_v40 }
 0xd16   : > { %v2700_v17 = vpop.f32.mrf.mxu0  ;;  %v2726_v8 = vld.sshfl [vmem:[#allocation1 + $0x20] sm:$0xff pattern:$0x73625140] }
 0xd17   : > { %v2730_v18 = vpack.c.bf16 %v2726_v8, %v2726_v8 }
 0xd19   : > { %v2753_v9 = vunpack.c.l.b16 %v2730_v18 }
 0xd1b   : > { %v2754_v12 = vpack.c.b16 %v2753_v9, %v2752_v13 }
 0xd1d   : > { %2755 = vrot.lane.b32.xlu0 %v2754_v12, %s6336_s21  ;;  %s7112_s21 = scalar_lea.vmem %s7470_s7, %s5905_s18  ;;  %s5914_s18 = sshll.u32 %s6313_s25, 10 }
 0xd1e   : > { %v5020_v48 = vld [vmem:[%s7112_s21 + $0x80] sm:$0xf]  ;;  %v5910_v56 = vld [vmem:[%s7112_s21 + $0x84] sm:$0xf]  ;;  %v5028_v55 = vld [vmem:[%s7112_s21 + $0x88] sm:$0xf] }
 0xd1f   : > { %v5912_v37 = vld [vmem:[%s7112_s21 + $0xbc] sm:$0xf0]  ;;  %v5022_v63 = vld [vmem:[%s7112_s21 + $0xc0] sm:$0xf0]  ;;  %v5913_v31 = vld [vmem:[%s7112_s21 + $0xc4] sm:$0xf0] }
 0xd20   : > { %v5021_v0 = vor.u32 %v5912_v37, %v5020_v48  ;;  %v5025_v11 = vor.u32 %v5910_v56, %v5022_v63  ;;  %v5029_v54 = vor.u32 %v5913_v31, %v5028_v55  ;;  %v5911_v60 = vld [vmem:[%s7112_s21 + $0x8c] sm:$0xf]  ;;  %v5004_v46 = vld [vmem:[%s7112_s21] sm:$0xf]  ;;  %v5906_v61 = vld [vmem:[%s7112_s21 + $0x4] sm:$0xf] }
 0xd21   : > { %v5030_v62 = vld [vmem:[%s7112_s21 + $0xc8] sm:$0xf0]  ;;  %v5908_v40 = vld [vmem:[%s7112_s21 + $0x3c] sm:$0xf0]  ;;  %v5006_v17 = vld [vmem:[%s7112_s21 + $0x40] sm:$0xf0] }
 0xd22   : > { %2947 = vmatpush.bf16.msra.mxu2 %v5021_v0  ;;  %v5033_v49 = vor.u32 %v5911_v60, %v5030_v62  ;;  %2961 = vmatpush.bf16.msra.mxu3 %v5025_v11  ;;  %v5005_v5 = vor.u32 %v5908_v40, %v5004_v46  ;;  %v5012_v8 = vld [vmem:[%s7112_s21 + $0x8] sm:$0xf]  ;;  %v5009_v18 = vor.u32 %v5906_v61, %v5006_v17  ;;  %v5907_v9 = vld [vmem:[%s7112_s21 + $0xc] sm:$0xf]  ;;  %v5070_v10 = vld [vmem:[%s7112_s21 + $0x90] sm:$0xf] }
 0xd23   : > { %2975 = vmatpush.bf16.msrb.mxu0 %v5029_v54  ;;  %v5909_v13 = vld [vmem:[%s7112_s21 + $0x44] sm:$0xf0]  ;;  %v5014_v12 = vld [vmem:[%s7112_s21 + $0x48] sm:$0xf0]  ;;  %v5954_v20 = vld [vmem:[%s7112_s21 + $0xcc] sm:$0xf0] }
 0xd24   : > { %2989 = vmatpush.bf16.msrb.mxu1 %v5033_v49  ;;  %v5013_v52 = vor.u32 %v5909_v13, %v5012_v8  ;;  %v5017_v6 = vor.u32 %v5907_v9, %v5014_v12  ;;  %v5952_v21 = vld [vmem:[%s7112_s21 + $0x94] sm:$0xf]  ;;  %v5071_v16 = vor.u32 %v5954_v20, %v5070_v10  ;;  %v5062_v57 = vld [vmem:[%s7112_s21 + $0x18] sm:$0xf]  ;;  %v6122_v63 = vld [vmem:[%s2807_s30] ss:$0 sm:$0xff]  ;;  %s7169_s30 = scalar_lea.vmem %s7472_s9, %s5914_s18 }
 0xd25   : > { %v5056_v53 = vld [vmem:[%s7112_s21 + $0x50] sm:$0xf0]  ;;  %v5951_v44 = vld [vmem:[%s7112_s21 + $0x54] sm:$0xf0]  ;;  %v6123_v11 = vld [vmem:[%s2809_s16] ss:$0 sm:$0xff]  ;;  %s4726_s16 = scalar_lea.vmem %s7475_s12, %s6313_s25 }
 0xd26   : > { %2948 = vmatpush.bf16.msra.mxu2 %v5005_v5  ;;  %2962 = vmatpush.bf16.msra.mxu3 %v5009_v18  ;;  %v5063_v33 = vor.u32 %v5951_v44, %v5062_v57  ;;  %v5988_v46 = vld [vmem:[%s7169_s30 + $0x1f8] sm:$0xff]  ;;  %v5979_v61 = vld [vmem:[%s7169_s30 + $0x1b0] sm:$0xff]  ;;  %v5978_v13 = vld [vmem:[%s7169_s30 + $0x1a8] sm:$0xff] }
 0xd27   : > { %2976 = vmatpush.bf16.msrb.mxu0 %v5013_v52  ;;  %v5964_v40 = vld [vmem:[%s7169_s30 + $0x138] sm:$0xff]  ;;  %v5987_v17 = vld [vmem:[%s7169_s30 + $0x1f0] sm:$0xff]  ;;  %v5986_v9 = vld [vmem:[%s7169_s30 + $0x1e8] sm:$0xff] }
 0xd28   : > { %2990 = vmatpush.bf16.msrb.mxu1 %v5017_v6  ;;  %v5972_v5 = vld [vmem:[%s7169_s30 + $0x178] sm:$0xff]  ;;  %v5963_v8 = vld [vmem:[%s7169_s30 + $0x130] sm:$0xff]  ;;  %v5977_v12 = vld [vmem:[%s7169_s30 + $0x1a0] sm:$0xff] }
 0xd29   : > { %v5971_v18 = vld [vmem:[%s7169_s30 + $0x170] sm:$0xff]  ;;  %v5985_v52 = vld [vmem:[%s7169_s30 + $0x1e0] sm:$0xff]  ;;  %v5962_v6 = vld [vmem:[%s7169_s30 + $0x128] sm:$0xff] }
 0xd2a   : > { %3158 = vmatpush.bf16.msrb.mxu2 %v5071_v16  ;;  %v5976_v10 = vld [vmem:[%s7169_s30 + $0x198] sm:$0xff]  ;;  %v5975_v16 = vld [vmem:[%s7169_s30 + $0x190] sm:$0xff]  ;;  %v5965_v57 = vld [vmem:[%s7169_s30 + $0x140] sm:$0xff] }
 0xd2b   : > { %v5984_v20 = vld [vmem:[%s7169_s30 + $0x1d8] sm:$0xff] }
 0xd2c   : > { %v5922_v44 = vld [vmem:[%s7169_s30 + $0x38] sm:$0xff] }
 0xd8f   : > { %v2756_v7 = vpop.permute.xlu0 %2755 }
 0xd90   : > { %v2765_v45 = vsel %vm2763_vm10, %v2762_v23, %v2756_v7  ;;  %v5072_v23 = vld [vmem:[%s7112_s21 + $0xd0] sm:$0xf0]  ;;  %v5078_v7 = vld [vmem:[%s7112_s21 + $0x98] sm:$0xf] }
 0xd91   : > { %4998 = vmatmul.msk.bf16.vlgmr.msra.gmra.mxu1 %vm484_vm1, %v2765_v45  ;;  %v5955_v45 = vld [vmem:[%s7112_s21 + $0xd4] sm:$0xf0] }
 0xe0e   : > { %v2800_v24 = vpop.f32.mrf.mxu1 }
 0xe0f   : > { %v2801_v42 = vadd.f32 %v6121_v2, %v2800_v24  ;;  %v5079_v24 = vor.u32 %v5955_v45, %v5078_v7  ;;  %v5960_v7 = vld [vmem:[%s7169_s30 + $0x118] sm:$0xff] }
 0xe10   : > { %v5968_v45 = vld [vmem:[%s7169_s30 + $0x158] sm:$0xff] }
 0xe11   : > { %v2805_v29 = vadd.f32 %v6265_v1, %v2801_v42  ;;  %v5953_v42 = vld [vmem:[%s7112_s21 + $0x9c] sm:$0xf]  ;;  %3186 = vmatpush.bf16.msra.mxu0 %v5079_v24  ;;  %v5982_v24 = vld [vmem:[%s7169_s30 + $0x1c8] sm:$0xff] }
 0xe12   : > { %v5080_v1 = vld [vmem:[%s7112_s21 + $0xd8] sm:$0xf0] }
 0xe13   : > { %v2811_v22 = vsel %vm484_vm1, %v2805_v29, 0.0 }
 0xe14   : > { %2812 = vadd.xlane.f32.xlu1 %v2811_v22 }
 0xe15   : > { %3187 = vmatpush.bf16.msra.mxu0 %v5063_v33  ;;  %v5936_v33 = vld [vmem:[%s7169_s30 + $0xa8] sm:$0xff] }
 0xe16   : > { %v2802_v43 = vpop.f32.mrf.mxu1 }
 0xe17   : > { %v2803_v34 = vadd.f32 %v6121_v2, %v2802_v43  ;;  %v5075_v2 = vor.u32 %v5952_v21, %v5072_v23  ;;  %v5961_v21 = vld [vmem:[%s7169_s30 + $0x120] sm:$0xff]  ;;  %v5983_v23 = vld [vmem:[%s7169_s30 + $0x1d0] sm:$0xff] }
 0xe19   : > { %v2806_v38 = vadd.f32 %v6266_v32, %v2803_v34  ;;  %v5083_v34 = vor.u32 %v5953_v42, %v5080_v1  ;;  %v5950_v32 = vld [vmem:[%s7112_s21 + $0x4c] sm:$0xf0]  ;;  %3172 = vmatpush.bf16.msrb.mxu3 %v5075_v2  ;;  %v5974_v2 = vld [vmem:[%s7169_s30 + $0x188] sm:$0xff] }
 0xe1a   : > { %v5959_v42 = vld [vmem:[%s7169_s30 + $0x110] sm:$0xff] }
 0xe1b   : > { %v2814_v30 = vsel %vm484_vm1, %v2806_v38, 0.0  ;;  %3200 = vmatpush.bf16.msra.mxu1 %v5083_v34  ;;  %v5967_v1 = vld [vmem:[%s7169_s30 + $0x150] sm:$0xff]  ;;  %v5946_v34 = vld [vmem:[%s7169_s30 + $0xf8] sm:$0xff] }
 0xe1c   : > { %2815 = vadd.xlane.f32.xlu2 %v2814_v30 }
 0xe87   : > { %v2813_v26 = vpop.xlane.xlu1 %2812 }
 0xe88   : > { %v2824_v51 = vmul.f32 %v7094_v47, %v2813_v26  ;;  %v5949_v26 = vld [vmem:[%s7112_s21 + $0x1c] sm:$0xf] }
 0xe8a   : > { %v7097_v58 = vsub.f32 %v2805_v29, %v2824_v51  ;;  %v5054_v29 = vld [vmem:[%s7112_s21 + $0x10] sm:$0xf]  ;;  %v5064_v51 = vld [vmem:[%s7112_s21 + $0x58] sm:$0xf0] }
 0xe8b   : > { %v5055_v41 = vor.u32 %v5950_v32, %v5054_v29  ;;  %v5973_v29 = vld [vmem:[%s7169_s30 + $0x180] sm:$0xff]  ;;  %v5958_v32 = vld [vmem:[%s7169_s30 + $0x108] sm:$0xff] }
 0xe8c   : > { %v2828_v59 = vmul.f32 %v7097_v58, %v7097_v58 }
 0xe8d   : > { %3159 = vmatpush.bf16.msrb.mxu2 %v5055_v41  ;;  %v5945_v41 = vld [vmem:[%s7169_s30 + $0xf0] sm:$0xff] }
 0xe8e   : > { %v2830_v36 = vsel %vm484_vm1, %v2828_v59, 0.0 }
 0xe8f   : > { %v2816_v28 = vpop.xlane.xlu2 %2815  ;;  %2831 = vadd.xlane.f32.xlu0 %v2830_v36  ;;  %v5067_v36 = vor.u32 %v5949_v26, %v5064_v51  ;;  %v5944_v26 = vld [vmem:[%s7169_s30 + $0xe8] sm:$0xff]  ;;  %v5921_v51 = vld [vmem:[%s7169_s30 + $0x30] sm:$0xff] }
 0xe90   : > { %v2825_v39 = vmul.f32 %v7094_v47, %v2816_v28 }
 0xe91   : > { %3201 = vmatpush.bf16.msra.mxu1 %v5067_v36  ;;  %v5935_v36 = vld [vmem:[%s7169_s30 + $0xa0] sm:$0xff] }
 0xe92   : > { %v7103_v27 = vsub.f32 %v2806_v38, %v2825_v39  ;;  %v5948_v38 = vld [vmem:[%s7112_s21 + $0x14] sm:$0xf] }
 0xe93   : > { %v5059_v50 = vor.u32 %v5948_v38, %v5056_v53  ;;  %v5966_v38 = vld [vmem:[%s7169_s30 + $0x148] sm:$0xff]  ;;  %v5957_v53 = vld [vmem:[%s7169_s30 + $0x100] sm:$0xff] }
 0xe94   : > { %v2829_v35 = vmul.f32 %v7103_v27, %v7103_v27 }
 0xe95   : > { %3173 = vmatpush.bf16.msrb.mxu3 %v5059_v50  ;;  %v5930_v50 = vld [vmem:[%s7169_s30 + $0x78] sm:$0xff] }
 0xe96   : > { %v2833_v4 = vsel %vm484_vm1, %v2829_v35, 0.0 }
 0xe97   : > { %2834 = vadd.xlane.f32.xlu2 %v2833_v4 }
 0xf02   : > { %v2832_v25 = vpop.xlane.xlu0 %2831 }
 0xf03   : > { %v2836_v15 = vmul.f32 %v2832_v25, %v7094_v47 }
 0xf05   : > { %v7123_v3 = vadd.f32 1e-05, %v2836_v15 }
 0xf07   : > { %6257 = vrsqrt.f32 %v7123_v3  ;;  %vm2846_vm13 = vweird.f32 %v7123_v3 }
 0xf0a   : > { %v2835_v19 = vpop.xlane.xlu2 %2834 }
 0xf0b   : > { %v2837_v14 = vmul.f32 %v2835_v19, %v7094_v47  ;;  %v5970_v19 = vld [vmem:[%s7169_s30 + $0x168] sm:$0xff] }
 0xf0d   : > { %v6258_v22 = vpop.eup %6257  ;;  %v2839_v43 = vadd.f32 1e-05, %v2837_v14  ;;  %v5969_v14 = vld [vmem:[%s7169_s30 + $0x160] sm:$0xff] }
 0xf0e   : > { %v2841_v30 = vmul.f32 %v6258_v22, %v7123_v3  ;;  %vm2847_vm12 = vweird.f32 %v6258_v22  ;;  %v5980_v3 = vld [vmem:[%s7169_s30 + $0x1b8] sm:$0xff] }
 0xf0f   : > { %6259 = vrsqrt.f32 %v2839_v43  ;;  %vm2848_vm14 = vmor %vm2846_vm13, %vm2847_vm12  ;;  %vm2856_vm0 = vweird.f32 %v2839_v43 }
 0xf10   : > { %v2842_v59 = vmul.f32 %v6258_v22, %v2841_v30  ;;  %v5937_v30 = vld [vmem:[%s7169_s30 + $0xb0] sm:$0xff] }
 0xf12   : > { %v2843_v28 = vmul.f32 0.5, %v2842_v59  ;;  %v5929_v59 = vld [vmem:[%s7169_s30 + $0x70] sm:$0xff] }
 0xf14   : > { %v2844_v39 = vsub.f32 1.5, %v2843_v28  ;;  %v5943_v28 = vld [vmem:[%s7169_s30 + $0xe0] sm:$0xff] }
 0xf15   : > { %v6260_v35 = vpop.eup %6259 }
 0xf16   : > { %v2845_v4 = vmul.f32 %v6258_v22, %v2844_v39  ;;  %v2851_v48 = vmul.f32 %v6260_v35, %v2839_v43  ;;  %vm2857_vm15 = vweird.f32 %v6260_v35  ;;  %v5938_v43 = vld [vmem:[%s7169_s30 + $0xb8] sm:$0xff]  ;;  %v5920_v39 = vld [vmem:[%s7169_s30 + $0x28] sm:$0xff] }
 0xf17   : > { %vm2858_vm2 = vmor %vm2856_vm0, %vm2857_vm15 }
 0xf18   : > { %v2852_v37 = vmul.f32 %v6260_v35, %v2851_v48  ;;  %v2849_v56 = vsel %vm2848_vm14, %v6258_v22, %v2845_v4  ;;  %v5981_v22 = vld [vmem:[%s7169_s30 + $0x1c0] sm:$0xff]  ;;  %v5934_v4 = vld [vmem:[%s7169_s30 + $0x98] sm:$0xff] }
 0xf19   : > { %v2860_v55 = vmul.f32 %v2849_v56, %v7097_v58  ;;  %v5942_v48 = vld [vmem:[%s7169_s30 + $0xd8] sm:$0xff] }
 0xf1a   : > { %v2853_v25 = vmul.f32 0.5, %v2852_v37 }
 0xf1b   : > { %v2865_v54 = vmul.f32 %v6122_v63, %v2860_v55  ;;  %v5941_v55 = vld [vmem:[%s7169_s30 + $0xd0] sm:$0xff] }
 0xf1c   : > { %v2854_v0 = vsub.f32 1.5, %v2853_v25  ;;  %v5919_v25 = vld [vmem:[%s7169_s30 + $0x20] sm:$0xff] }
 0xf1d   : > { %v7171_v58 = vadd.f32 %v6123_v11, %v2865_v54 }
 0xf1e   : > { %v2855_v31 = vmul.f32 %v6260_v35, %v2854_v0  ;;  %v5927_v0 = vld [vmem:[%s7169_s30 + $0x60] sm:$0xff] }
 0xf20   : > { %v2859_v15 = vsel %vm2858_vm2, %v6260_v35, %v2855_v31  ;;  %v5928_v35 = vld [vmem:[%s7169_s30 + $0x68] sm:$0xff]  ;;  %v5918_v31 = vld [vmem:[%s7169_s30 + $0x18] sm:$0xff] }
 0xf21   : > { %v2861_v60 = vmul.f32 %v2859_v15, %v7103_v27  ;;  %v5926_v15 = vld [vmem:[%s7169_s30 + $0x58] sm:$0xff] }
 0xf23   : > { %v2866_v62 = vmul.f32 %v6122_v63, %v2861_v60  ;;  %v5933_v63 = vld [vmem:[%s7169_s30 + $0x90] sm:$0xff]  ;;  %v5932_v60 = vld [vmem:[%s7169_s30 + $0x88] sm:$0xff] }
 0xf25   : > { %v7173_v49 = vadd.f32 %v6123_v11, %v2866_v62  ;;  %v5940_v62 = vld [vmem:[%s7169_s30 + $0xc8] sm:$0xff] }
 0xf27   : > { %v7177_v27 = vpack.c.bf16 %v7173_v49, %v7171_v58 }
 0xf29   : > { %5034 = vmatmul.msk.bf16.vlgmr.msra.gmra.mxu2 %vm484_vm1, %v7177_v27  ;;  %5035 = vmatmul.msk.bf16.vlgmr.msra.gmra.mxu3 %vm484_vm1, %v7177_v27 }
 0xf2a   : > { %5036 = vmatmul.msk.bf16.vlgmr.msrb.gmra.mxu0 %vm484_vm1, %v7177_v27  ;;  %5037 = vmatmul.msk.bf16.vlgmr.msrb.gmra.mxu1 %vm484_vm1, %v7177_v27 }
 0xf2b   : > { %3519 = vmatpush.bf16.msrb.mxu0 %v5980_v3  ;;  %3533 = vmatpush.bf16.msrb.mxu1 %v5988_v46  ;;  %v5917_v3 = vld [vmem:[%s7169_s30 + $0x10] sm:$0xff] }
 0xf2c   : > { %3491 = vmatpush.bf16.msra.mxu2 %v5964_v40  ;;  %3505 = vmatpush.bf16.msra.mxu3 %v5972_v5  ;;  %v5925_v46 = vld [vmem:[%s7169_s30 + $0x50] sm:$0xff] }
 0xf2f   : > { %3520 = vmatpush.bf16.msrb.mxu0 %v5979_v61  ;;  %3534 = vmatpush.bf16.msrb.mxu1 %v5987_v17  ;;  %v5931_v61 = vld [vmem:[%s7169_s30 + $0x80] sm:$0xff] }
 0xf30   : > { %3492 = vmatpush.bf16.msra.mxu2 %v5963_v8  ;;  %3506 = vmatpush.bf16.msra.mxu3 %v5971_v18  ;;  %v5939_v17 = vld [vmem:[%s7169_s30 + $0xc0] sm:$0xff]  ;;  %v5916_v8 = vld [vmem:[%s7169_s30 + $0x8] sm:$0xff] }
 0xf31   : > { %v5924_v18 = vld [vmem:[%s7169_s30 + $0x48] sm:$0xff] }
 0xf33   : > { %3521 = vmatpush.bf16.msrb.mxu0 %v5978_v13  ;;  %3535 = vmatpush.bf16.msrb.mxu1 %v5986_v9 }
 0xf34   : > { %3493 = vmatpush.bf16.msra.mxu2 %v5962_v6  ;;  %3507 = vmatpush.bf16.msra.mxu3 %v5970_v19  ;;  %v5051_v6 = vld [vmem:[%s7277_s23 + $0x4] sm:$0xf] }
 0xf37   : > { %3522 = vmatpush.bf16.msrb.mxu0 %v5977_v12  ;;  %3536 = vmatpush.bf16.msrb.mxu1 %v5985_v52  ;;  %v5915_v12 = vld [vmem:[%s7169_s30] sm:$0xff] }
 0xf38   : > { %3494 = vmatpush.bf16.msra.mxu2 %v5961_v21  ;;  %3508 = vmatpush.bf16.msra.mxu3 %v5969_v14  ;;  %v5923_v52 = vld [vmem:[%s7169_s30 + $0x40] sm:$0xff]  ;;  %v3107_v21 = vperm.slane %v5051_v6, 3 }
 0xf39   : > { %5084 = vmatmul.msk.bf16.vlgmr.msrb.gmra.mxu2 %vm484_vm1, %v7177_v27  ;;  %5085 = vmatmul.msk.bf16.vlgmr.msrb.gmra.mxu3 %vm484_vm1, %v7177_v27 }
 0xf3a   : > { %5086 = vmatmul.msk.bf16.vlgmr.msra.gmra.mxu0 %vm484_vm1, %v7177_v27  ;;  %5087 = vmatmul.msk.bf16.vlgmr.msra.gmra.mxu1 %vm484_vm1, %v7177_v27 }
 0xf3b   : > { %3523 = vmatpush.bf16.msrb.mxu0 %v5976_v10  ;;  %3537 = vmatpush.bf16.msrb.mxu1 %v5984_v20  ;;  %v3106_v20 = vperm.slane %v5051_v6, 2 }
 0xf3c   : > { %3495 = vmatpush.bf16.msra.mxu2 %v5960_v7  ;;  %3509 = vmatpush.bf16.msra.mxu3 %v5968_v45  ;;  %v3104_v45 = vperm.slane %v5051_v6, 0 }
 0xf3f   : > { %3524 = vmatpush.bf16.msrb.mxu0 %v5975_v16  ;;  %3538 = vmatpush.bf16.msrb.mxu1 %v5983_v23 }
 0xf40   : > { %3496 = vmatpush.bf16.msra.mxu2 %v5959_v42  ;;  %3510 = vmatpush.bf16.msra.mxu3 %v5967_v1  ;;  %v5448_v1 = vld [vmem:[%s7112_s21 + $0xa8] sm:$0xf] }
 0xf43   : > { %3525 = vmatpush.bf16.msrb.mxu0 %v5974_v2  ;;  %3539 = vmatpush.bf16.msrb.mxu1 %v5982_v24  ;;  %v3105_v2 = vperm.slane %v5051_v6, 1 }
 0xf44   : > { %3497 = vmatpush.bf16.msra.mxu2 %v5958_v32  ;;  %3511 = vmatpush.bf16.msra.mxu3 %v5966_v38  ;;  %v5450_v32 = vld [vmem:[%s7112_s21 + $0xe8] sm:$0xf0] }
 0xf47   : > { %3526 = vmatpush.bf16.msrb.mxu0 %v5973_v29  ;;  %3540 = vmatpush.bf16.msrb.mxu1 %v5981_v22 }
 0xf48   : > { %3498 = vmatpush.bf16.msra.mxu2 %v5957_v53  ;;  %3512 = vmatpush.bf16.msra.mxu3 %v5965_v57 }
 0xf4b   : > { %3767 = vmatpush.bf16.msra.mxu0 %v5938_v43  ;;  %3781 = vmatpush.bf16.msra.mxu1 %v5946_v34  ;;  %v5997_v43 = vld [vmem:[%s7112_s21 + $0xe4] sm:$0xf0]  ;;  %v5995_v34 = vld [vmem:[%s7112_s21 + $0xac] sm:$0xf] }
 0xf4c   : > { %3739 = vmatpush.bf16.msrb.mxu2 %v5922_v44  ;;  %3753 = vmatpush.bf16.msrb.mxu3 %v5930_v50  ;;  %v5449_v50 = vor.u32 %v5997_v43, %v5448_v1 }
 0xf4f   : > { %3768 = vmatpush.bf16.msra.mxu0 %v5937_v30  ;;  %3782 = vmatpush.bf16.msra.mxu1 %v5945_v41 }
 0xf50   : > { %3740 = vmatpush.bf16.msrb.mxu2 %v5921_v51  ;;  %3754 = vmatpush.bf16.msrb.mxu3 %v5929_v59 }
 0xf53   : > { %3769 = vmatpush.bf16.msra.mxu0 %v5936_v33  ;;  %3783 = vmatpush.bf16.msra.mxu1 %v5944_v26  ;;  %v5453_v33 = vor.u32 %v5995_v34, %v5450_v32  ;;  %v2888_v26 = vld [vmem:[%s7277_s23] sm:$0xf] }
 0xf54   : > { %3741 = vmatpush.bf16.msrb.mxu2 %v5920_v39  ;;  %3755 = vmatpush.bf16.msrb.mxu3 %v5928_v35  ;;  %v5432_v39 = vld [vmem:[%s7112_s21 + $0x28] sm:$0xf]  ;;  %v2891_v1 = vperm.slane %v2888_v26, 1 }
 0xf55   : > { %v5993_v35 = vld [vmem:[%s7112_s21 + $0x64] sm:$0xf0] }
 0xf57   : > { %3770 = vmatpush.bf16.msra.mxu0 %v5935_v36  ;;  %3784 = vmatpush.bf16.msra.mxu1 %v5943_v28 }
 0xf58   : > { %3742 = vmatpush.bf16.msrb.mxu2 %v5919_v25  ;;  %3756 = vmatpush.bf16.msrb.mxu3 %v5927_v0  ;;  %v5991_v25 = vld [vmem:[%s7112_s21 + $0x2c] sm:$0xf] }
 0xf59   : > { %v5434_v0 = vld [vmem:[%s7112_s21 + $0x68] sm:$0xf0] }
 0xf5b   : > { %3771 = vmatpush.bf16.msra.mxu0 %v5934_v4  ;;  %3785 = vmatpush.bf16.msra.mxu1 %v5942_v48 }
 0xf5c   : > { %3743 = vmatpush.bf16.msrb.mxu2 %v5918_v31  ;;  %3757 = vmatpush.bf16.msrb.mxu3 %v5926_v15  ;;  %v5994_v31 = vld [vmem:[%s7112_s21 + $0xa4] sm:$0xf] }
 0xf5d   : > { %v5442_v15 = vld [vmem:[%s7112_s21 + $0xe0] sm:$0xf0] }
 0xf5f   : > { %3772 = vmatpush.bf16.msra.mxu0 %v5933_v63  ;;  %3786 = vmatpush.bf16.msra.mxu1 %v5941_v55  ;;  %v5440_v63 = vld [vmem:[%s7112_s21 + $0xa0] sm:$0xf] }
 0xf60   : > { %3744 = vmatpush.bf16.msrb.mxu2 %v5917_v3  ;;  %3758 = vmatpush.bf16.msrb.mxu3 %v5925_v46  ;;  %v5996_v55 = vld [vmem:[%s7112_s21 + $0xdc] sm:$0xf0] }
 0xf61   : > { %v5441_v6 = vor.u32 %v5996_v55, %v5440_v63  ;;  %v6004_v63 = vld [vmem:[%s7169_s30 + $0x228] sm:$0xff] }
 0xf62   : > { %v6012_v55 = vld [vmem:[%s7169_s30 + $0x268] sm:$0xff] }
 0xf63   : > { %3773 = vmatpush.bf16.msra.mxu0 %v5932_v60  ;;  %3787 = vmatpush.bf16.msra.mxu1 %v5940_v62 }
 0xf64   : > { %3745 = vmatpush.bf16.msrb.mxu2 %v5916_v8  ;;  %3759 = vmatpush.bf16.msrb.mxu3 %v5924_v18  ;;  %v5433_v8 = vor.u32 %v5993_v35, %v5432_v39  ;;  %v5437_v18 = vor.u32 %v5991_v25, %v5434_v0  ;;  %v6005_v39 = vld [vmem:[%s7169_s30 + $0x230] sm:$0xff]  ;;  %v6018_v25 = vld [vmem:[%s7169_s30 + $0x298] sm:$0xff] }
 0xf65   : > { %v6013_v35 = vld [vmem:[%s7169_s30 + $0x270] sm:$0xff]  ;;  %v6026_v0 = vld [vmem:[%s7169_s30 + $0x2d8] sm:$0xff] }
 0xf67   : > { %3774 = vmatpush.bf16.msra.mxu0 %v5931_v61  ;;  %3788 = vmatpush.bf16.msra.mxu1 %v5939_v17  ;;  %v2892_v61 = vperm.slane %v2888_v26, 2  ;;  %v2893_v17 = vperm.slane %v2888_v26, 3 }
 0xf68   : > { %3746 = vmatpush.bf16.msrb.mxu2 %v5915_v12  ;;  %3760 = vmatpush.bf16.msrb.mxu3 %v5923_v52 }
 0xfa7   : > { %v7243_v37 = vpop.f32.mrf.mxu0  ;;  %v7245_v56 = vpop.f32.mrf.mxu1 }
 0xfac   : > { %v7253_v11 = vpop.f32.mrf.mxu2  ;;  %v7255_v54 = vpop.f32.mrf.mxu3 }
 0xfaf   : > { %v7261_v40 = vpop.f32.mrf.mxu0  ;;  %v7263_v5 = vpop.f32.mrf.mxu1 }
 0xfb4   : > { %v7269_v13 = vpop.f32.mrf.mxu2  ;;  %v7271_v9 = vpop.f32.mrf.mxu3 }
 0xfb7   : > { %v3189_v19 = vpop.f32.mrf.mxu0  ;;  %v3203_v10 = vpop.f32.mrf.mxu1 }
 0xfb8   : > { %v3190_v23 = vadd.f32 %v3189_v19, %v3106_v20  ;;  %v3204_v7 = vadd.f32 %v3203_v10, %v3107_v21  ;;  %v5445_v19 = vor.u32 %v5994_v31, %v5442_v15  ;;  %v5424_v10 = vld [vmem:[%s7112_s21 + $0x20] sm:$0xf]  ;;  %v6017_v31 = vld [vmem:[%s7169_s30 + $0x290] sm:$0xff] }
 0xfb9   : > { %v6025_v15 = vld [vmem:[%s7169_s30 + $0x2d0] sm:$0xff] }
 0xfba   : > { %v3222_v38 = vmax.f32 %v3190_v23, 0.0  ;;  %v3223_v30 = vmax.f32 %v3204_v7, 0.0  ;;  %v2995_v23 = vadd.f32 %v7263_v5, %v2893_v17 }
 0xfbc   : > { %v3161_v14 = vpop.f32.mrf.mxu2  ;;  %v3175_v16 = vpop.f32.mrf.mxu3 }
 0xfbd   : > { %v3162_v57 = vadd.f32 %v3161_v14, %v3104_v45  ;;  %v3176_v44 = vadd.f32 %v3175_v16, %v3105_v2  ;;  %v5426_v14 = vld [vmem:[%s7112_s21 + $0x60] sm:$0xf0]  ;;  %v2981_v16 = vadd.f32 %v7261_v40, %v2892_v61  ;;  %v2967_v40 = vadd.f32 %v7271_v9, %v2891_v1 }
 0xfbf   : > { %v3191_v24 = vpop.f32.mrf.mxu0  ;;  %v3205_v42 = vpop.f32.mrf.mxu1  ;;  %v3220_v60 = vmax.f32 %v3162_v57, 0.0  ;;  %v3221_v62 = vmax.f32 %v3176_v44, 0.0  ;;  %v6021_v44 = vld [vmem:[%s7169_s30 + $0x2b0] sm:$0xff] }
 0xfc0   : > { %v3192_v29 = vadd.f32 %v3191_v24, %v3106_v20  ;;  %v3206_v22 = vadd.f32 %v3205_v42, %v3107_v21  ;;  %v5992_v20 = vld [vmem:[%s7112_s21 + $0x5c] sm:$0xf0]  ;;  %v5990_v21 = vld [vmem:[%s7112_s21 + $0x24] sm:$0xf]  ;;  %v2993_v24 = vadd.f32 %v7245_v56, %v2893_v17  ;;  %v2890_v42 = vperm.slane %v2888_v26, 0  ;;  %v6028_v26 = vld [vmem:[%s7169_s30 + $0x2e8] sm:$0xff] }
 0xfc1   : > { %v5425_v7 = vor.u32 %v5992_v20, %v5424_v10  ;;  %v6024_v17 = vld [vmem:[%s7169_s30 + $0x2c8] sm:$0xff]  ;;  %v6023_v10 = vld [vmem:[%s7169_s30 + $0x2c0] sm:$0xff] }
 0xfc2   : > { %v3226_v41 = vmax.f32 %v3192_v29, 0.0  ;;  %v3227_v53 = vmax.f32 %v3206_v22, 0.0  ;;  %v3015_v29 = vmax.f32 %v2981_v16, 0.0  ;;  %v3016_v22 = vmax.f32 %v2995_v23, 0.0 }
 0xfc3   : > { %v2953_v43 = vadd.f32 %v7269_v13, %v2890_v42  ;;  %v3012_v34 = vmax.f32 %v2993_v24, 0.0  ;;  %v2951_v32 = vadd.f32 %v7253_v11, %v2890_v42  ;;  %v6022_v11 = vld [vmem:[%s7169_s30 + $0x2b8] sm:$0xff]  ;;  %v6000_v24 = vld [vmem:[%s7169_s30 + $0x208] sm:$0xff] }
 0xfc4   : > { %v3230_v51 = vpack.c.bf16 %v3226_v41, %v3222_v38  ;;  %v3231_v59 = vpack.c.bf16 %v3227_v53, %v3223_v30  ;;  %v3163_v36 = vpop.f32.mrf.mxu2  ;;  %v3177_v28 = vpop.f32.mrf.mxu3  ;;  %v2965_v38 = vadd.f32 %v7255_v54, %v2891_v1  ;;  %v3014_v41 = vmax.f32 %v2967_v40, 0.0  ;;  %v6030_v54 = vld [vmem:[%s7169_s30 + $0x2f8] sm:$0xff]  ;;  %v6008_v42 = vld [vmem:[%s7169_s30 + $0x248] sm:$0xff] }
 0xfc5   : > { %v3164_v4 = vadd.f32 %v3163_v36, %v3104_v45  ;;  %v3178_v48 = vadd.f32 %v3177_v28, %v3105_v2  ;;  %v5429_v45 = vor.u32 %v5990_v21, %v5426_v14  ;;  %v2979_v2 = vadd.f32 %v7243_v37, %v2892_v61  ;;  %v6019_v36 = vld [vmem:[%s7169_s30 + $0x2a0] sm:$0xff]  ;;  %v6001_v21 = vld [vmem:[%s7169_s30 + $0x210] sm:$0xff]  ;;  %v6037_v40 = vld [vmem:[%s7112_s21 + $0xbc] sm:$0xf] }
 0xfc6   : > { %3527 = vmatmul.bf16.vlgmr.msrb.gmra.mxu0 %v3230_v51  ;;  %3541 = vmatmul.bf16.vlgmr.msrb.gmra.mxu1 %v3231_v59  ;;  %v3020_v37 = vpack.c.bf16 %v3016_v22, %v3012_v34  ;;  %v3013_v56 = vmax.f32 %v2953_v43, 0.0  ;;  %v3009_v13 = vmax.f32 %v2951_v32, 0.0  ;;  %v3010_v9 = vmax.f32 %v2965_v38, 0.0  ;;  %v6006_v51 = vld [vmem:[%s7169_s30 + $0x238] sm:$0xff]  ;;  %v6027_v28 = vld [vmem:[%s7169_s30 + $0x2e0] sm:$0xff]  ;;  %v6009_v14 = vld [vmem:[%s7169_s30 + $0x250] sm:$0xff] }
 0xfc7   : > { %v3224_v3 = vmax.f32 %v3164_v4, 0.0  ;;  %v3225_v46 = vmax.f32 %v3178_v48, 0.0  ;;  %3892 = vmatpush.bf16.msrb.mxu0 %v5449_v50  ;;  %3906 = vmatpush.bf16.msrb.mxu1 %v5453_v33  ;;  %v3011_v5 = vmax.f32 %v2979_v2, 0.0  ;;  %v6029_v50 = vld [vmem:[%s7169_s30 + $0x2f0] sm:$0xff]  ;;  %v6020_v33 = vld [vmem:[%s7169_s30 + $0x2a8] sm:$0xff]  ;;  %v6014_v59 = vld [vmem:[%s7169_s30 + $0x278] sm:$0xff] }
 0xfc8   : > { %v3017_v53 = vpack.c.bf16 %v3013_v56, %v3009_v13  ;;  %v3018_v57 = vpack.c.bf16 %v3014_v41, %v3010_v9  ;;  %v5690_v22 = vld [vmem:[%s7112_s21 + $0xb8] sm:$0xf]  ;;  %v6007_v34 = vld [vmem:[%s7169_s30 + $0x240] sm:$0xff]  ;;  %v5692_v38 = vld [vmem:[%s7112_s21 + $0xf8] sm:$0xf0] }
 0xfc9   : > { %v3228_v12 = vpack.c.bf16 %v3224_v3, %v3220_v60  ;;  %v3229_v52 = vpack.c.bf16 %v3225_v46, %v3221_v62  ;;  %v3019_v30 = vpack.c.bf16 %v3015_v29, %v3011_v5  ;;  %v6003_v60 = vld [vmem:[%s7169_s30 + $0x220] sm:$0xff]  ;;  %v6016_v3 = vld [vmem:[%s7169_s30 + $0x288] sm:$0xff]  ;;  %v6039_v43 = vld [vmem:[%s7112_s21 + $0xf4] sm:$0xf0]  ;;  %v5695_v41 = vor.u32 %v6037_v40, %v5692_v38 }
 0xfca   : > { %v6011_v62 = vld [vmem:[%s7169_s30 + $0x260] sm:$0xff]  ;;  %v5691_v32 = vor.u32 %v6039_v43, %v5690_v22  ;;  %v5674_v13 = vld [vmem:[%s7112_s21 + $0x38] sm:$0xf] }
 0xfcb   : > { %3499 = vmatmul.bf16.vlgmr.msra.gmra.mxu2 %v3228_v12  ;;  %3513 = vmatmul.bf16.vlgmr.msra.gmra.mxu3 %v3229_v52  ;;  %v6002_v12 = vld [vmem:[%s7169_s30 + $0x218] sm:$0xff]  ;;  %v5999_v5 = vld [vmem:[%s7169_s30 + $0x200] sm:$0xff] }
 0xfcc   : > { %3893 = vmatpush.bf16.msrb.mxu0 %v5433_v8  ;;  %3907 = vmatpush.bf16.msrb.mxu1 %v5437_v18  ;;  %v6010_v52 = vld [vmem:[%s7169_s30 + $0x258] sm:$0xff] }
 0xfcd   : > { %3864 = vmatpush.bf16.msra.mxu2 %v5441_v6  ;;  %3878 = vmatpush.bf16.msra.mxu3 %v5445_v19  ;;  %v6015_v6 = vld [vmem:[%s7169_s30 + $0x280] sm:$0xff]  ;;  %v6035_v9 = vld [vmem:[%s7112_s21 + $0x74] sm:$0xf0] }
 0xfd1   : > { %3865 = vmatpush.bf16.msra.mxu2 %v5425_v7  ;;  %3879 = vmatpush.bf16.msra.mxu3 %v5429_v45 }
 0xfd6   : > { %3775 = vmatmul.bf16.vlgmr.msra.gmra.mxu0 %v3019_v30  ;;  %3789 = vmatmul.bf16.vlgmr.msra.gmra.mxu1 %v3020_v37 }
 0xfd7   : > { %4225 = vmatpush.bf16.msra.mxu0 %v6022_v11  ;;  %4239 = vmatpush.bf16.msra.mxu1 %v6030_v54  ;;  %v5675_v54 = vor.u32 %v6035_v9, %v5674_v13 }
 0xfdb   : > { %3747 = vmatmul.bf16.vlgmr.msrb.gmra.mxu2 %v3017_v53  ;;  %3761 = vmatmul.bf16.vlgmr.msrb.gmra.mxu3 %v3018_v57  ;;  %v6033_v53 = vld [vmem:[%s7112_s21 + $0x3c] sm:$0xf] }
 0xfdc   : > { %4226 = vmatpush.bf16.msra.mxu0 %v6021_v44  ;;  %4240 = vmatpush.bf16.msra.mxu1 %v6029_v50  ;;  %v5676_v44 = vld [vmem:[%s7112_s21 + $0x78] sm:$0xf0] }
 0xfdd   : > { %4197 = vmatpush.bf16.msrb.mxu2 %v6006_v51  ;;  %4211 = vmatpush.bf16.msrb.mxu3 %v6014_v59  ;;  %v5421_v51 = vld [vmem:[%s7277_s23 + $0x8] sm:$0xf]  ;;  %v5682_v59 = vld [vmem:[%s7112_s21 + $0xb0] sm:$0xf] }
 0xfde   : > { %v3810_v22 = vperm.slane %v5421_v51, 0  ;;  %v3811_v43 = vperm.slane %v5421_v51, 1 }
 0xfe0   : > { %4227 = vmatpush.bf16.msra.mxu0 %v6020_v33  ;;  %4241 = vmatpush.bf16.msra.mxu1 %v6028_v26  ;;  %v5679_v33 = vor.u32 %v6033_v53, %v5676_v44  ;;  %v6071_v44 = vld [vmem:[%s7169_s30 + $0x3f0] sm:$0xff] }
 0xfe1   : > { %4198 = vmatpush.bf16.msrb.mxu2 %v6005_v39  ;;  %4212 = vmatpush.bf16.msrb.mxu3 %v6013_v35 }
 0xfe4   : > { %4228 = vmatpush.bf16.msra.mxu0 %v6019_v36  ;;  %4242 = vmatpush.bf16.msra.mxu1 %v6027_v28  ;;  %v6038_v36 = vld [vmem:[%s7112_s21 + $0xec] sm:$0xf0]  ;;  %v6036_v28 = vld [vmem:[%s7112_s21 + $0xb4] sm:$0xf] }
 0xfe5   : > { %4199 = vmatpush.bf16.msrb.mxu2 %v6004_v63  ;;  %4213 = vmatpush.bf16.msrb.mxu3 %v6012_v55  ;;  %v6034_v63 = vld [vmem:[%s7112_s21 + $0x6c] sm:$0xf0] }
 0xfe6   : > { %5456 = vmatmul.msk.bf16.vlgmr.msrb.gmra.mxu0 %vm484_vm1, %v7177_v27  ;;  %5457 = vmatmul.msk.bf16.vlgmr.msrb.gmra.mxu1 %vm484_vm1, %v7177_v27 }
 0xfe8   : > { %4229 = vmatpush.bf16.msra.mxu0 %v6018_v25  ;;  %4243 = vmatpush.bf16.msra.mxu1 %v6026_v0  ;;  %v5684_v25 = vld [vmem:[%s7112_s21 + $0xf0] sm:$0xf0]  ;;  %v5666_v0 = vld [vmem:[%s7112_s21 + $0x30] sm:$0xf] }
 0xfe9   : > { %4200 = vmatpush.bf16.msrb.mxu2 %v6003_v60  ;;  %4214 = vmatpush.bf16.msrb.mxu3 %v6011_v62  ;;  %v5687_v55 = vor.u32 %v6036_v28, %v5684_v25  ;;  %v5667_v62 = vor.u32 %v6034_v63, %v5666_v0  ;;  %v6056_v28 = vld [vmem:[%s7169_s30 + $0x378] sm:$0xff]  ;;  %v6058_v25 = vld [vmem:[%s7169_s30 + $0x388] sm:$0xff] }
 0xfea   : > { %v6066_v0 = vld [vmem:[%s7169_s30 + $0x3c8] sm:$0xff] }
 0xfeb   : > { %5454 = vmatmul.msk.bf16.vlgmr.msra.gmra.mxu2 %vm484_vm1, %v7177_v27  ;;  %5455 = vmatmul.msk.bf16.vlgmr.msra.gmra.mxu3 %vm484_vm1, %v7177_v27  ;;  %v6046_v63 = vld [vmem:[%s7169_s30 + $0x328] sm:$0xff] }
 0xfec   : > { %4230 = vmatpush.bf16.msra.mxu0 %v6017_v31  ;;  %4244 = vmatpush.bf16.msra.mxu1 %v6025_v15  ;;  %v6032_v31 = vld [vmem:[%s7112_s21 + $0x34] sm:$0xf] }
 0xfed   : > { %4201 = vmatpush.bf16.msrb.mxu2 %v6002_v12  ;;  %4215 = vmatpush.bf16.msrb.mxu3 %v6010_v52  ;;  %v5668_v15 = vld [vmem:[%s7112_s21 + $0x70] sm:$0xf0] }
 0xff0   : > { %4231 = vmatpush.bf16.msra.mxu0 %v6016_v3  ;;  %4245 = vmatpush.bf16.msra.mxu1 %v6024_v17  ;;  %v3812_v3 = vperm.slane %v5421_v51, 2 }
 0xff1   : > { %4202 = vmatpush.bf16.msrb.mxu2 %v6001_v21  ;;  %4216 = vmatpush.bf16.msrb.mxu3 %v6009_v14 }
 0xff4   : > { %4232 = vmatpush.bf16.msra.mxu0 %v6015_v6  ;;  %4246 = vmatpush.bf16.msra.mxu1 %v6023_v10 }
 0xff5   : > { %4203 = vmatpush.bf16.msrb.mxu2 %v6000_v24  ;;  %4217 = vmatpush.bf16.msrb.mxu3 %v6008_v42 }
 0xff8   : > { %4352 = vmatpush.bf16.msrb.mxu0 %v5691_v32  ;;  %4366 = vmatpush.bf16.msrb.mxu1 %v5695_v41 }
 0xff9   : > { %4204 = vmatpush.bf16.msrb.mxu2 %v5999_v5  ;;  %4218 = vmatpush.bf16.msrb.mxu3 %v6007_v34 }
 0xffc   : > { %4353 = vmatpush.bf16.msrb.mxu0 %v5675_v54  ;;  %4367 = vmatpush.bf16.msrb.mxu1 %v5679_v33  ;;  %v6063_v54 = vld [vmem:[%s7169_s30 + $0x3b0] sm:$0xff]  ;;  %v6070_v33 = vld [vmem:[%s7169_s30 + $0x3e8] sm:$0xff] }
 0xffd   : > { %4338 = vmatpush.bf16.msra.mxu3 %v5687_v55  ;;  %v6054_v55 = vld [vmem:[%s7169_s30 + $0x368] sm:$0xff] }
0x1043   : > { %v3528_v4 = vpop.f32.mrf.mxu0  ;;  %v3542_v48 = vpop.f32.mrf.mxu1 }
0x104b   : > { %v3530_v46 = vpop.f32.mrf.mxu0  ;;  %v3544_v61 = vpop.f32.mrf.mxu1 }
0x104e   : > { %v3500_v8 = vpop.f32.mrf.mxu2  ;;  %v3514_v18 = vpop.f32.mrf.mxu3 }
0x104f   : > { %v3515_v19 = vadd.f32 %v3514_v18, %v3500_v8  ;;  %v5671_v8 = vor.u32 %v6032_v31, %v5668_v15  ;;  %v6057_v31 = vld [vmem:[%s7169_s30 + $0x380] sm:$0xff] }
0x1050   : > { %v6065_v15 = vld [vmem:[%s7169_s30 + $0x3c0] sm:$0xff] }
0x1051   : > { %v3529_v20 = vadd.f32 %v3528_v4, %v3515_v19  ;;  %4339 = vmatpush.bf16.msra.mxu3 %v5671_v8  ;;  %v6052_v8 = vld [vmem:[%s7169_s30 + $0x358] sm:$0xff] }
0x1053   : > { %v3776_v16 = vpop.f32.mrf.mxu0  ;;  %v3790_v23 = vpop.f32.mrf.mxu1  ;;  %v3543_v7 = vadd.f32 %v3542_v48, %v3529_v20  ;;  %v5683_v48 = vor.u32 %v6038_v36, %v5682_v59  ;;  %v6068_v59 = vld [vmem:[%s7169_s30 + $0x3d8] sm:$0xff] }
0x1054   : > { %v6048_v36 = vld [vmem:[%s7169_s30 + $0x338] sm:$0xff] }
0x1055   : > { %4324 = vmatpush.bf16.msra.mxu2 %v5683_v48  ;;  %v6055_v48 = vld [vmem:[%s7169_s30 + $0x370] sm:$0xff] }
0x1056   : > { %v3502_v45 = vpop.f32.mrf.mxu2  ;;  %v3516_v2 = vpop.f32.mrf.mxu3 }
0x1057   : > { %v3517_v1 = vadd.f32 %v3516_v2, %v3502_v45 }
0x1059   : > { %v3531_v29 = vadd.f32 %v3530_v46, %v3517_v1  ;;  %v3813_v46 = vperm.slane %v5421_v51, 3  ;;  %4325 = vmatpush.bf16.msra.mxu2 %v5667_v62  ;;  %v6060_v51 = vld [vmem:[%s7169_s30 + $0x398] sm:$0xff]  ;;  %v6045_v62 = vld [vmem:[%s7169_s30 + $0x320] sm:$0xff] }
0x105b   : > { %v3778_v30 = vpop.f32.mrf.mxu0  ;;  %v3792_v37 = vpop.f32.mrf.mxu1  ;;  %v3545_v56 = vadd.f32 %v3544_v61, %v3531_v29 }
0x105e   : > { %v3748_v57 = vpop.f32.mrf.mxu2  ;;  %v3762_v11 = vpop.f32.mrf.mxu3 }
0x105f   : > { %v3749_v50 = vadd.f32 %v3748_v57, %v3543_v7  ;;  %v6064_v57 = vld [vmem:[%s7169_s30 + $0x3b8] sm:$0xff] }
0x1061   : > { %v3763_v26 = vadd.f32 %v3762_v11, %v3749_v50  ;;  %v6072_v11 = vld [vmem:[%s7169_s30 + $0x3f8] sm:$0xff]  ;;  %v6062_v50 = vld [vmem:[%s7169_s30 + $0x3a8] sm:$0xff] }
0x1063   : > { %v3777_v39 = vadd.f32 %v3776_v16, %v3763_v26  ;;  %v3895_v35 = vpop.f32.mrf.mxu0  ;;  %v3909_v4 = vpop.f32.mrf.mxu1  ;;  %v6061_v26 = vld [vmem:[%s7169_s30 + $0x3a0] sm:$0xff] }
0x1064   : > { %v3896_v52 = vadd.f32 %v3895_v35, %v3812_v3  ;;  %v3910_v6 = vadd.f32 %v3909_v4, %v3813_v46  ;;  %v6067_v35 = vld [vmem:[%s7169_s30 + $0x3d0] sm:$0xff] }
0x1065   : > { %v7364_v60 = vadd.f32 %v3790_v23, %v3777_v39  ;;  %v6059_v39 = vld [vmem:[%s7169_s30 + $0x390] sm:$0xff] }
0x1066   : > { %v3750_v61 = vpop.f32.mrf.mxu2  ;;  %v3764_v17 = vpop.f32.mrf.mxu3  ;;  %v3928_v23 = vmax.f32 %v3896_v52, 0.0  ;;  %v3929_v7 = vmax.f32 %v3910_v6, 0.0  ;;  %v6047_v4 = vld [vmem:[%s7169_s30 + $0x330] sm:$0xff] }
0x1067   : > { %v3751_v18 = vadd.f32 %v3750_v61, %v3545_v56 }
0x1069   : > { %v3765_v12 = vadd.f32 %v3764_v17, %v3751_v18  ;;  %v6044_v17 = vld [vmem:[%s7169_s30 + $0x318] sm:$0xff]  ;;  %v6043_v18 = vld [vmem:[%s7169_s30 + $0x310] sm:$0xff] }
0x106b   : > { %v3779_v19 = vadd.f32 %v3778_v30, %v3765_v12  ;;  %v3897_v10 = vpop.f32.mrf.mxu0  ;;  %v3911_v20 = vpop.f32.mrf.mxu1  ;;  %v6051_v12 = vld [vmem:[%s7169_s30 + $0x350] sm:$0xff] }
0x106c   : > { %v3898_v21 = vadd.f32 %v3897_v10, %v3812_v3  ;;  %v3912_v14 = vadd.f32 %v3911_v20, %v3813_v46  ;;  %v6053_v3 = vld [vmem:[%s7169_s30 + $0x360] sm:$0xff]  ;;  %v6050_v10 = vld [vmem:[%s7169_s30 + $0x348] sm:$0xff] }
0x106d   : > { %v7366_v16 = vadd.f32 %v3792_v37, %v3779_v19  ;;  %v6042_v19 = vld [vmem:[%s7169_s30 + $0x308] sm:$0xff]  ;;  %v6041_v20 = vld [vmem:[%s7169_s30 + $0x300] sm:$0xff] }
0x106e   : > { %v3932_v45 = vmax.f32 %v3898_v21, 0.0  ;;  %v3933_v2 = vmax.f32 %v3912_v14, 0.0  ;;  %v3867_v24 = vpop.f32.mrf.mxu2  ;;  %v3881_v42 = vpop.f32.mrf.mxu3  ;;  %v6049_v21 = vld [vmem:[%s7169_s30 + $0x340] sm:$0xff]  ;;  %v5663_v14 = vld [vmem:[%s7277_s23 + $0xc] sm:$0xf] }
0x106f   : > { %v3868_v40 = vadd.f32 %v3867_v24, %v3810_v22  ;;  %v3882_v5 = vadd.f32 %v3881_v42, %v3811_v43  ;;  %v4272_v42 = vperm.slane %v5663_v14, 2 }
0x1070   : > { %v3936_v1 = vpack.c.bf16 %v3932_v45, %v3928_v23  ;;  %v3937_v29 = vpack.c.bf16 %v3933_v2, %v3929_v7 }
0x1071   : > { %v3926_v37 = vmax.f32 %v3868_v40, 0.0  ;;  %v3927_v56 = vmax.f32 %v3882_v5, 0.0 }
0x1072   : > { %4233 = vmatmul.bf16.vlgmr.msra.gmra.mxu0 %v3936_v1  ;;  %4247 = vmatmul.bf16.vlgmr.msra.gmra.mxu1 %v3937_v29  ;;  %v4273_v1 = vperm.slane %v5663_v14, 3 }
0x1073   : > { %4685 = vmatpush.bf16.msra.mxu0 %v6064_v57  ;;  %4699 = vmatpush.bf16.msra.mxu1 %v6072_v11 }
0x1076   : > { %v3869_v34 = vpop.f32.mrf.mxu2  ;;  %v3883_v32 = vpop.f32.mrf.mxu3 }
0x1077   : > { %v3870_v38 = vadd.f32 %v3869_v34, %v3810_v22  ;;  %v3884_v30 = vadd.f32 %v3883_v32, %v3811_v43  ;;  %4686 = vmatpush.bf16.msra.mxu0 %v6063_v54  ;;  %4700 = vmatpush.bf16.msra.mxu1 %v6071_v44 }
0x1079   : > { %v3930_v41 = vmax.f32 %v3870_v38, 0.0  ;;  %v3931_v13 = vmax.f32 %v3884_v30, 0.0 }
0x107b   : > { %v3934_v9 = vpack.c.bf16 %v3930_v41, %v3926_v37  ;;  %v3935_v53 = vpack.c.bf16 %v3931_v13, %v3927_v56  ;;  %4687 = vmatpush.bf16.msra.mxu0 %v6062_v50  ;;  %4701 = vmatpush.bf16.msra.mxu1 %v6070_v33 }
0x107d   : > { %4205 = vmatmul.bf16.vlgmr.msrb.gmra.mxu2 %v3934_v9  ;;  %4219 = vmatmul.bf16.vlgmr.msrb.gmra.mxu3 %v3935_v53 }
0x107e   : > { %4657 = vmatpush.bf16.msrb.mxu2 %v6048_v36  ;;  %4671 = vmatpush.bf16.msrb.mxu3 %v6056_v28 }
0x107f   : > { %4688 = vmatpush.bf16.msra.mxu0 %v6061_v26 }
0x1082   : > { %5698 = vmatmul.msk.bf16.vlgmr.msrb.gmra.mxu0 %vm484_vm1, %v7177_v27  ;;  %5699 = vmatmul.msk.bf16.vlgmr.msrb.gmra.mxu1 %vm484_vm1, %v7177_v27 }
0x1083   : > { %4689 = vmatpush.bf16.msra.mxu0 %v6060_v51  ;;  %4658 = vmatpush.bf16.msrb.mxu2 %v6047_v4  ;;  %v4271_v51 = vperm.slane %v5663_v14, 1 }
0x1084   : > { %4672 = vmatpush.bf16.msrb.mxu3 %v6055_v48 }
0x1087   : > { %4690 = vmatpush.bf16.msra.mxu0 %v6059_v39  ;;  %4659 = vmatpush.bf16.msrb.mxu2 %v6046_v63 }
0x1088   : > { %4673 = vmatpush.bf16.msrb.mxu3 %v6054_v55 }
0x108b   : > { %4691 = vmatpush.bf16.msra.mxu0 %v6058_v25  ;;  %4660 = vmatpush.bf16.msrb.mxu2 %v6045_v62 }
0x108c   : > { %4674 = vmatpush.bf16.msrb.mxu3 %v6053_v3 }
0x108d   : > { %5696 = vmatmul.msk.bf16.vlgmr.msra.gmra.mxu2 %vm484_vm1, %v7177_v27  ;;  %5697 = vmatmul.msk.bf16.vlgmr.msra.gmra.mxu3 %vm484_vm1, %v7177_v27  ;;  %v6069_v27 = vld [vmem:[%s7169_s30 + $0x3e0] sm:$0xff] }
0x108e   : > { %4702 = vmatpush.bf16.msra.mxu1 %v6069_v27  ;;  %v4270_v27 = vperm.slane %v5663_v14, 0 }
0x108f   : > { %4692 = vmatpush.bf16.msra.mxu0 %v6057_v31  ;;  %4661 = vmatpush.bf16.msrb.mxu2 %v6044_v17 }
0x1090   : > { %4675 = vmatpush.bf16.msrb.mxu3 %v6052_v8  ;;  %v6124_v8 = vld [vmem:[%s4715_s14] ss:$0 sm:$0xff] }
0x1092   : > { %4703 = vmatpush.bf16.msra.mxu1 %v6068_v59 }
0x1093   : > { %4662 = vmatpush.bf16.msrb.mxu2 %v6043_v18 }
0x1094   : > { %4676 = vmatpush.bf16.msrb.mxu3 %v6051_v12 }
0x1096   : > { %4704 = vmatpush.bf16.msra.mxu1 %v6067_v35 }
0x1097   : > { %4663 = vmatpush.bf16.msrb.mxu2 %v6042_v19 }
0x1098   : > { %4677 = vmatpush.bf16.msrb.mxu3 %v6050_v10 }
0x109a   : > { %4705 = vmatpush.bf16.msra.mxu1 %v6066_v0 }
0x109b   : > { %4664 = vmatpush.bf16.msrb.mxu2 %v6041_v20 }
0x109c   : > { %4678 = vmatpush.bf16.msrb.mxu3 %v6049_v21 }
0x109e   : > { %4706 = vmatpush.bf16.msra.mxu1 %v6065_v15 }
0x10ef   : > { %v4234_v46 = vpop.f32.mrf.mxu0  ;;  %v4248_v61 = vpop.f32.mrf.mxu1 }
0x10f7   : > { %v4236_v52 = vpop.f32.mrf.mxu0  ;;  %v4250_v6 = vpop.f32.mrf.mxu1 }
0x10ff   : > { %v4355_v23 = vpop.f32.mrf.mxu0  ;;  %v4369_v7 = vpop.f32.mrf.mxu1 }
0x1100   : > { %v4206_v45 = vpop.f32.mrf.mxu2  ;;  %v4220_v2 = vpop.f32.mrf.mxu3  ;;  %v4356_v43 = vadd.f32 %v4355_v23, %v4272_v42  ;;  %v4370_v40 = vadd.f32 %v4369_v7, %v4273_v1 }
0x1101   : > { %v4221_v24 = vadd.f32 %v4220_v2, %v4206_v45 }
0x1102   : > { %v4388_v13 = vmax.f32 %v4356_v43, 0.0  ;;  %v4389_v9 = vmax.f32 %v4370_v40, 0.0 }
0x1103   : > { %v4235_v29 = vadd.f32 %v4234_v46, %v4221_v24 }
0x1105   : > { %v4249_v22 = vadd.f32 %v4248_v61, %v4235_v29 }
0x1107   : > { %v4253_v5 = vadd.f32 %v4249_v22, %v7364_v60  ;;  %v4357_v34 = vpop.f32.mrf.mxu0  ;;  %v4371_v32 = vpop.f32.mrf.mxu1 }
0x1108   : > { %v4358_v38 = vadd.f32 %v4357_v34, %v4272_v42  ;;  %v4372_v30 = vadd.f32 %v4371_v32, %v4273_v1  ;;  %v4208_v37 = vpop.f32.mrf.mxu2  ;;  %v4222_v56 = vpop.f32.mrf.mxu3 }
0x1109   : > { %v4223_v41 = vadd.f32 %v4222_v56, %v4208_v37 }
0x110a   : > { %v4392_v53 = vmax.f32 %v4358_v38, 0.0  ;;  %v4393_v57 = vmax.f32 %v4372_v30, 0.0 }
0x110b   : > { %v4237_v11 = vadd.f32 %v4236_v52, %v4223_v41 }
0x110c   : > { %v4396_v54 = vpack.c.bf16 %v4392_v53, %v4388_v13  ;;  %v4397_v44 = vpack.c.bf16 %v4393_v57, %v4389_v9 }
0x110d   : > { %v4251_v50 = vadd.f32 %v4250_v6, %v4237_v11 }
0x110e   : > { %4693 = vmatmul.bf16.vlgmr.msra.gmra.mxu0 %v4396_v54  ;;  %4707 = vmatmul.bf16.vlgmr.msra.gmra.mxu1 %v4397_v44 }
0x110f   : > { %v4254_v33 = vadd.f32 %v4251_v50, %v7366_v16 }
0x1110   : > { %v4327_v60 = vpop.f32.mrf.mxu2  ;;  %v4341_v26 = vpop.f32.mrf.mxu3 }
0x1111   : > { %v4328_v59 = vadd.f32 %v4327_v60, %v4270_v27  ;;  %v4342_v36 = vadd.f32 %v4341_v26, %v4271_v51  ;;  %v6125_v60 = vld [vmem:[%s4724_s19] ss:$0 sm:$0xff] }
0x1113   : > { %v4386_v48 = vmax.f32 %v4328_v59, 0.0  ;;  %v4387_v25 = vmax.f32 %v4342_v36, 0.0 }
0x1118   : > { %v4329_v28 = vpop.f32.mrf.mxu2  ;;  %v4343_v39 = vpop.f32.mrf.mxu3 }
0x1119   : > { %v4330_v35 = vadd.f32 %v4329_v28, %v4270_v27  ;;  %v4344_v4 = vadd.f32 %v4343_v39, %v4271_v51  ;;  %v6126_v27 = vld [vmem:[%s4726_s16] ss:$0 sm:$0xff] }
0x111b   : > { %v4390_v0 = vmax.f32 %v4330_v35, 0.0  ;;  %v4391_v63 = vmax.f32 %v4344_v4, 0.0 }
0x111d   : > { %v4394_v55 = vpack.c.bf16 %v4390_v0, %v4386_v48  ;;  %v4395_v31 = vpack.c.bf16 %v4391_v63, %v4387_v25 }
0x111f   : > { %4665 = vmatmul.bf16.vlgmr.msrb.gmra.mxu2 %v4394_v55  ;;  %4679 = vmatmul.bf16.vlgmr.msrb.gmra.mxu3 %v4395_v31 }
0x118b   : > { %v4694_v16 = vpop.f32.mrf.mxu0  ;;  %v4708_v46 = vpop.f32.mrf.mxu1 }
0x1193   : > { %v4696_v10 = vpop.f32.mrf.mxu0  ;;  %v4710_v14 = vpop.f32.mrf.mxu1 }
0x11a2   : > { %v4666_v15 = vpop.f32.mrf.mxu2  ;;  %v4680_v62 = vpop.f32.mrf.mxu3 }
0x11a3   : > { %v4681_v3 = vadd.f32 %v4680_v62, %v4666_v15 }
0x11a5   : > { %v4695_v61 = vadd.f32 %v4694_v16, %v4681_v3 }
0x11a7   : > { %v4709_v17 = vadd.f32 %v4708_v46, %v4695_v61 }
0x11a9   : > { %v4713_v18 = vadd.f32 %v4709_v17, %v4253_v5 }
0x11aa   : > { %v4668_v12 = vpop.f32.mrf.mxu2  ;;  %v4682_v52 = vpop.f32.mrf.mxu3 }
0x11ab   : > { %v4683_v6 = vadd.f32 %v4682_v52, %v4668_v12  ;;  %v4720_v19 = vadd.f32 %v6124_v8, %v4713_v18 }
0x11ad   : > { %v4697_v20 = vadd.f32 %v4696_v10, %v4683_v6  ;;  %v4722_v21 = vadd.f32 %v4720_v19, %v7171_v58 }
0x11af   : > { %v4711_v23 = vadd.f32 %v4710_v14, %v4697_v20  ;;  %v4728_v7 = vsel %vm484_vm1, %v4722_v21, 0.0 }
0x11b0   : > { %4729 = vadd.xlane.f32.xlu1 %v4728_v7 }
0x11b1   : > { %v4714_v45 = vadd.f32 %v4711_v23, %v4254_v33 }
0x11b3   : > { %v4721_v2 = vadd.f32 %v6124_v8, %v4714_v45 }
0x11b5   : > { %v4723_v24 = vadd.f32 %v4721_v2, %v7173_v49 }
0x11b7   : > { %v4731_v42 = vsel %vm484_vm1, %v4723_v24, 0.0 }
0x11b8   : > { %4732 = vadd.xlane.f32.xlu2 %v4731_v42 }
0x1223   : > { %v4730_v58 = vpop.xlane.xlu1 %4729 }
0x1224   : > { %v4734_v1 = vmul.f32 %v4730_v58, %v7094_v47 }
0x1226   : > { %v4736_v29 = vsub.f32 %v4722_v21, %v4734_v1 }
0x1228   : > { %v4738_v22 = vmul.f32 %v4736_v29, %v4736_v29 }
0x122a   : > { %v4740_v43 = vsel %vm484_vm1, %v4738_v22, 0.0 }
0x122b   : > { %v4733_v40 = vpop.xlane.xlu2 %4732  ;;  %4741 = vadd.xlane.f32.xlu0 %v4740_v43 }
0x122c   : > { %v4735_v5 = vmul.f32 %v4733_v40, %v7094_v47 }
0x122e   : > { %v4737_v34 = vsub.f32 %v4723_v24, %v4735_v5 }
0x1230   : > { %v4739_v32 = vmul.f32 %v4737_v34, %v4737_v34 }
0x1232   : > { %v4743_v38 = vsel %vm484_vm1, %v4739_v32, 0.0 }
0x1233   : > { %4744 = vadd.xlane.f32.xlu1 %v4743_v38 }
0x129e   : > { %v4742_v49 = vpop.xlane.xlu0 %4741 }
0x129f   : > { %v4746_v30 = vmul.f32 %v4742_v49, %v7094_v47 }
0x12a1   : > { %v4748_v37 = vadd.f32 1e-05, %v4746_v30 }
0x12a3   : > { %6261 = vrsqrt.f32 %v4748_v37  ;;  %vm4756_vm4 = vweird.f32 %v4748_v37 }
0x12a6   : > { %v4745_v56 = vpop.xlane.xlu1 %4744 }
0x12a7   : > { %v4747_v41 = vmul.f32 %v4745_v56, %v7094_v47 }
0x12a9   : > { %v6262_v13 = vpop.eup %6261  ;;  %v4749_v9 = vadd.f32 1e-05, %v4747_v41 }
0x12aa   : > { %v4751_v53 = vmul.f32 %v6262_v13, %v4748_v37  ;;  %vm4757_vm3 = vweird.f32 %v6262_v13 }
0x12ab   : > { %6263 = vrsqrt.f32 %v4749_v9  ;;  %vm4758_vm5 = vmor %vm4756_vm4, %vm4757_vm3  ;;  %vm4766_vm7 = vweird.f32 %v4749_v9 }
0x12ac   : > { %v4752_v57 = vmul.f32 %v6262_v13, %v4751_v53 }
0x12ae   : > { %v4753_v11 = vmul.f32 0.5, %v4752_v57 }
0x12b0   : > { %v4754_v54 = vsub.f32 1.5, %v4753_v11 }
0x12b1   : > { %v6264_v44 = vpop.eup %6263 }
0x12b2   : > { %v4755_v50 = vmul.f32 %v6262_v13, %v4754_v54  ;;  %v4761_v33 = vmul.f32 %v6264_v44, %v4749_v9  ;;  %vm4767_vm6 = vweird.f32 %v6264_v44 }
0x12b3   : > { %vm4768_vm8 = vmor %vm4766_vm7, %vm4767_vm6 }
0x12b4   : > { %v4759_v47 = vsel %vm4758_vm5, %v6262_v13, %v4755_v50  ;;  %v4762_v26 = vmul.f32 %v6264_v44, %v4761_v33 }
0x12b5   : > { %v4770_v51 = vmul.f32 %v4759_v47, %v4736_v29 }
0x12b6   : > { %v4763_v59 = vmul.f32 0.5, %v4762_v26 }
0x12b7   : > { %v4775_v36 = vmul.f32 %v6125_v60, %v4770_v51 }
0x12b8   : > { %v4764_v28 = vsub.f32 1.5, %v4763_v59 }
0x12b9   : > { %v4780_v39 = vadd.f32 %v6126_v27, %v4775_v36 }
0x12ba   : > { %v4765_v35 = vmul.f32 %v6264_v44, %v4764_v28 }
0x12bb   : > { %4782 = vst.msk [vmem:[#allocation2] sm:$0xff] %vm484_vm1, %v4780_v39 }
0x12bc   : > { %v4769_v4 = vsel %vm4768_vm8, %v6264_v44, %v4765_v35 }
0x12bd   : > { %v4771_v48 = vmul.f32 %v4769_v4, %v4737_v34 }
0x12bf   : > { %v4776_v25 = vmul.f32 %v6125_v60, %v4771_v48  ;;  %4787 = sbr.rel (%p5894_p5) target bundleno = 4806 (0x12c6), region = 80 }
0x12c1   : > { %v4781_v0 = vadd.f32 %v6126_v27, %v4776_v25 }
0x12c3   : > { %4783 = vst.msk [vmem:[#allocation2 + $0x8] sm:$0xff] %vm484_vm1, %v4781_v0 }
0x12c4   : > { %4788 = vst.msk [vmem:[#allocation3] sm:$0xff] %vm484_vm1, %v4780_v39 }
0x12c5   : > { %4789 = vst.msk [vmem:[#allocation3 + $0x8] sm:$0xff] %vm484_vm1, %v4781_v0 }
0x12c6 PF: > { %p6077_p6 = scmp.eq.s32.totalorder %s4909_s28, 1  ;;  %s4800_s18 = sshll.u32 %s7476_s13, 4  ;;  %s4801_s18 = int_to_ptr.hbm [resolvable:$true] %s4800_s18 }
0x12c7   : > { %s6338_s19 = smov [#allocation3]   ;;  %s6339_s30 = smov 128  }
0x12c8   : > { %s4798_s20 = sshll.u32 %s6338_s19, 4  ;;  %s4799_s20 = int_to_ptr.vmem [resolvable:$true] %s4798_s20 }
0x12c9   : > { %6074 = dma.vmem_to_hbm [thread:$0]  (%p6077_p6), %s4799_s20, 256, %s4801_s18, [#allocation4], %s6339_s30, %s6339_s30, %s6334_s24  }
0x12ca   : > { %6308 = dma.done.wait (%p6077_p6), [#allocation4], 256  }
0x12cb   : > { %6310 = vsyncadd (%p6077_p6), [#allocation4], 4294967040 }
0x12cc PF: > { %s24_s27 = sadd.s32 1, %s6321_s27   ;;  %s7477_s25 = smov %s6317_s26 }
0x12cd   : > { %p21_p7 = scmp.ge.s32.totalorder %s24_s27, 4   ;;  %s7478_s26 = smov %s7480_s29 }
0x12cf   :  { %23 = sbr.rel (!%p21_p7) target bundleno = 2 (0x2), region = 157 }
0x12d4   :  { %4817 = vsyncpa [#allocation4], 1 }
0x12d5   :  { %4819 = vsyncpa [#allocation4 + $0x1], 1 }

</bundles_post_ra>
